<compile_context>
chip_gen: v7x
topology: tpu7x:2x2x1
jax: 0.10.0
libtpu: 0.0.40
codegen_flags: <defaults>
</compile_context>

<pallas_src>
import functools

import jax
import jax.numpy as jnp
from jax.experimental import pallas as pl
from jax.experimental.pallas import tpu as pltpu

# ---- Hamburger / matrix-decomposition hyper-parameters (reference-implementation defaults) ----
MD_D = 512        # hamburger hidden dim (MD_D default)
MD_R = 64         # number of NMF bases (MD_R default)
NMF_STEPS = 6     # train_steps default (module is constructed in training mode)
NMF_INV_T = 1.0   # NMF2D uses inv_t = 1 (the 100 default applies to the VQ/CD hams)
NMF_EPS = 1e-6


def _ham_attn_kernel(Bc, S, F,
                     x_ref, wvq_ref, bvq_ref, wl_ref, bl_ref, wu_ref, wo_ref, bo_ref,
                     bases_ref, out_ref):
  """One batch *chunk* (Bc batches) per grid step; all operands are whole VMEM blocks.

  x_ref     : (Bc, S, F)   natural layout chunk of x
  wvq_ref   : (F, 2F)      [Wv^T | Wq^T]  packed
  bvq_ref   : (1, 2F)      [bv | bq]
  wl_ref    : (S, D)       lower-bread conv weight, transposed (lane-dense)
  bl_ref    : (1, D)       lower-bread bias
  wu_ref    : (S, D)       upper-bread conv weight, natural orientation (lane-dense)
  wo_ref    : (F, F)       Wout^T
  bo_ref    : (1, F)       bout
  bases_ref : (Bc, R, D)   rand-init NMF bases, transposed (lane-dense)
  out_ref   : (Bc, S, F)
  """
  f32 = jnp.float32
  bf16 = jnp.bfloat16

  xc = x_ref[...].astype(f32)                                # (Bc, S, F)
  xm = xc.reshape(Bc * S, F)                                 # batch-folded rows

  # ---- fused V / Q projections (batch-folded, one MXU dot) -------------------
  vq = jnp.dot(xm.astype(bf16), wvq_ref[...].astype(bf16),
               preferred_element_type=f32) + bvq_ref[...]    # (Bc*S, 2F)
  v3 = vq[:, :F].reshape(Bc, S, F)
  q3 = vq[:, F:].reshape(Bc, S, F)

  # ---- Hamburger lower bread: 1x1 conv over the seq "channels" + ReLU --------
  # rows indexed by (batch, feature); contraction over seq.  h_all[(b,f), d] == x_nmf^T.
  xt = jnp.transpose(xc, (0, 2, 1)).reshape(Bc * F, S)       # (Bc*F, S)
  h_all = jnp.maximum(
      jnp.dot(xt.astype(bf16), wl_ref[...].astype(bf16),
              preferred_element_type=f32) + bl_ref[...], 0.0)          # (Bc*F, D) f32
  h_bf = h_all.astype(bf16)

  # ---- NMF2D per batch element (bases differ per batch) ----------------------
  # Transposed, lane-dense state: Bt = bases^T (R, D), Ct = coef^T (R, F).
  recon_rows = []
  for b in range(Bc):
    hb = h_bf[b * F:(b + 1) * F, :]                          # (F, D)  x_nmf^T, bf16
    htb = hb.T                                               # (D, F)  hoisted, loop-invariant
    bt0 = bases_ref[b].astype(f32)                           # (R, D)

    # coef init: softmax over R of inv_t * bases^T @ x_nmf   (axis 0 in the Ct layout)
    logits = NMF_INV_T * jnp.dot(bt0.astype(bf16), htb, preferred_element_type=f32)
    logits = logits - jnp.max(logits, axis=0, keepdims=True)
    e = jnp.exp(logits)
    ct0 = e / jnp.sum(e, axis=0, keepdims=True)              # (R, F) f32

    def coef_update(ct, bt):
      bt_b = bt.astype(bf16)
      num_t = jnp.dot(bt_b, htb, preferred_element_type=f32)                    # (R, F)
      btb = jax.lax.dot_general(bt_b, bt_b, (((1,), (1,)), ((), ())),
                                preferred_element_type=f32)                     # (R, R) sym
      den = jnp.dot(btb.astype(bf16), ct.astype(bf16), preferred_element_type=f32)
      return ct * num_t / (den + NMF_EPS)                    # exact f32 ratio

    def body(_, carry):
      ct, bt = carry
      ct = coef_update(ct, bt)
      ct_b = ct.astype(bf16)
      num_bt = jnp.dot(ct_b, hb, preferred_element_type=f32)                    # (R, D)
      ctc = jax.lax.dot_general(ct_b, ct_b, (((1,), (1,)), ((), ())),
                                preferred_element_type=f32)                     # (R, R) sym
      den_bt = jnp.dot(ctc.astype(bf16), bt.astype(bf16), preferred_element_type=f32)
      bt = bt * num_bt / (den_bt + NMF_EPS)
      return (ct, bt)

    ct, bt = jax.lax.fori_loop(0, NMF_STEPS, body, (ct0, bt0), unroll=False)
    ct = coef_update(ct, bt)                                 # compute_coef

    # recon^T = coef @ bases^T = Ct^T @ Bt  -> (F, D), lane-dense
    recon_rows.append(jnp.dot(ct.T.astype(bf16), bt.astype(bf16),
                              preferred_element_type=f32))
  recon_all = jnp.concatenate(recon_rows, axis=0)            # (Bc*F, D)

  # ---- upper bread (1x1 conv over D, no bias) + residual + ReLU --------------
  kpre_t = jax.lax.dot_general(recon_all.astype(bf16), wu_ref[...].astype(bf16),
                               (((1,), (1,)), ((), ())),
                               preferred_element_type=f32)   # (Bc*F, S)
  kpre = jnp.transpose(kpre_t.reshape(Bc, F, S), (0, 2, 1))  # (Bc, S, F)
  k = jnp.maximum(kpre + xc, 0.0)                            # K = relu(upper + x)

  # ---- attention: softmax over the sequence axis, Yt = sum_s A*V -------------
  m = jnp.max(k, axis=1, keepdims=True)                      # (Bc, 1, F)
  a = jnp.exp(k - m)
  denom = jnp.sum(a, axis=1, keepdims=True)
  yt = jnp.sum(a * v3, axis=1, keepdims=True) * pl.reciprocal(denom, approx=True)

  gate = pl.reciprocal(1.0 + jnp.exp(-q3), approx=True)      # sigmoid(Q)
  g = (gate * yt).reshape(Bc * S, F)

  # ---- out_project (dropout p=0.0 is the identity) ----------------------------
  out = jnp.dot(g.astype(bf16), wo_ref[...].astype(bf16),
                preferred_element_type=f32) + bo_ref[...]    # (Bc*S, F)
  out_ref[...] = out.reshape(Bc, S, F).astype(out_ref.dtype)


def hamburger_attention(x, params, bases, *, batch_chunk=None):
  """x: (B, S, F) float32, bases: (B, D, R).  Returns HamburgerAttention.forward(x)."""
  B, S, F = x.shape
  D = params["w_lower"].shape[0]
  R = bases.shape[-1]

  # Batch-fold chunk: raise matmul M while keeping >= 2 parallel grid blocks (v7x megacore).
  if batch_chunk is None:
    batch_chunk = max(1, min(8, B // 2)) if B >= 2 else 1
  while B % batch_chunk:
    batch_chunk -= 1
  Bc = batch_chunk

  # ---- parameter packing / lane-dense orientations (tiny one-time XLA ops) ----
  w_vq_t = jnp.concatenate([params["w_v"].T, params["w_q"].T], axis=1)    # (F, 2F)
  b_vq = jnp.concatenate([params["b_v"], params["b_q"]]).reshape(1, 2 * F)
  wl_t = params["w_lower"].T                                              # (S, D)
  bl = params["b_lower"].reshape(1, D)
  wu = params["w_upper"]                                                  # (S, D) -- not pre-transposed
  wo_t = params["w_out"].T                                                # (F, F)
  bo = params["b_out"].reshape(1, F)
  bases_t = jnp.transpose(bases, (0, 2, 1))                               # (B, R, D) lane-dense

  mm = lambda m, k, n: 2 * m * k * n
  per_batch_nmf = ((NMF_STEPS + 1) * (mm(R, D, F) + mm(R, D, R) + mm(R, R, F))
                   + NMF_STEPS * (mm(R, F, D) + mm(R, F, R) + mm(R, R, D))
                   + mm(F, R, D))
  flops = B * (mm(S, F, 2 * F) + mm(F, S, D) + per_batch_nmf + mm(F, D, S) + mm(S, F, F))
  transcendentals = B * (R * F + 3 * S * F)
  bytes_accessed = 4 * (2 * x.size + w_vq_t.size + b_vq.size + wl_t.size + bl.size
                        + wu.size + wo_t.size + bo.size + bases_t.size)

  out = pl.pallas_call(
      functools.partial(_ham_attn_kernel, Bc, S, F),
      grid=(B // Bc,),
      in_specs=[
          pl.BlockSpec((Bc, S, F), lambda i: (i, 0, 0)),      # x chunk (natural layout)
          pl.BlockSpec((F, 2 * F), lambda i: (0, 0)),         # packed Wv^T | Wq^T
          pl.BlockSpec((1, 2 * F), lambda i: (0, 0)),         # packed biases
          pl.BlockSpec((S, D), lambda i: (0, 0)),             # lower-bread weight^T
          pl.BlockSpec((1, D), lambda i: (0, 0)),             # lower-bread bias
          pl.BlockSpec((S, D), lambda i: (0, 0)),             # upper-bread weight (lane-dense)
          pl.BlockSpec((F, F), lambda i: (0, 0)),             # Wout^T
          pl.BlockSpec((1, F), lambda i: (0, 0)),             # bout
          pl.BlockSpec((Bc, R, D), lambda i: (i, 0, 0)),      # NMF bases^T, per batch
      ],
      out_specs=pl.BlockSpec((Bc, S, F), lambda i: (i, 0, 0)),
      out_shape=jax.ShapeDtypeStruct((B, S, F), jnp.float32),
      compiler_params=pltpu.CompilerParams(dimension_semantics=("parallel",)),
      cost_estimate=pl.CostEstimate(flops=flops, transcendentals=transcendentals,
                                    bytes_accessed=bytes_accessed),
  )(x, w_vq_t, b_vq, wl_t, bl, wu, wo_t, bo, bases_t)
  return out


def _reference(x, params, bases):
  """Plain-JAX forward mirroring the PyTorch module in the natural (B, S, F) layout."""
  linear = lambda t, w, b: jnp.einsum('bsf,of->bso', t, w) + b
  V = linear(x, params["w_v"], params["b_v"])
  Q = linear(x, params["w_q"], params["b_q"])

  # Hamburger(x), x viewed as NCHW (B, C=S, H=1, W=F).
  h = jnp.einsum('ds,bsf->bdf', params["w_lower"], x) + params["b_lower"][None, :, None]
  h = jnp.maximum(h, 0.0)                                          # lower bread
  xn = h                                                           # (B, D, N), N = F
  bs = bases

  coef = jax.nn.softmax(NMF_INV_T * jnp.einsum('bdn,bdr->bnr', xn, bs), axis=-1)

  def coef_update(coef, bs):
    num = jnp.einsum('bdn,bdr->bnr', xn, bs)
    den = jnp.einsum('bnr,brq->bnq', coef, jnp.einsum('bdr,bdq->brq', bs, bs))
    return coef * num / (den + NMF_EPS)

  for _ in range(NMF_STEPS):
    coef = coef_update(coef, bs)
    num = jnp.einsum('bdn,bnr->bdr', xn, coef)
    den = jnp.einsum('bdr,brq->bdq', bs, jnp.einsum('bnr,bnq->brq', coef, coef))
    bs = bs * num / (den + NMF_EPS)
  coef = coef_update(coef, bs)                                     # compute_coef
  recon = jnp.einsum('bdr,bnr->bdn', bs, coef)                     # bases @ coef^T
  up = jnp.einsum('sd,bdn->bsn', params["w_upper"], recon)         # upper bread (no bias)
  K = jnp.maximum(up + x, 0.0)                                     # residual + ReLU

  A = jax.nn.softmax(K, axis=1)
  Yt = jnp.sum(A * V, axis=1, keepdims=True)
  Yt = jax.nn.sigmoid(Q) * Yt
  return linear(Yt, params["w_out"], params["b_out"])              # dropout(p=0) == identity


if __name__ == "__main__":
  # module config: features=32, seq_len=8; Hamburger(in_c=seq_len, NMF, MD_D/MD_R defaults).
  # batch=4 so batch folding (Bc=2) *and* >=2 parallel grid blocks are both exercised.
  B, SEQ, FEAT = 4, 8, 32
  D, R = MD_D, MD_R

  key = jax.random.PRNGKey(0)
  k = jax.random.split(key, 11)
  x = jax.random.normal(k[0], (B, SEQ, FEAT), jnp.float32)

  def uinit(kk, shape, fan_in):   # PyTorch default U(-1/sqrt(fan_in), 1/sqrt(fan_in))
    bound = 1.0 / (fan_in ** 0.5)
    return jax.random.uniform(kk, shape, jnp.float32, -bound, bound)

  params = dict(
      w_v=uinit(k[1], (FEAT, FEAT), FEAT),   b_v=uinit(k[2], (FEAT,), FEAT),
      w_q=uinit(k[3], (FEAT, FEAT), FEAT),   b_q=uinit(k[4], (FEAT,), FEAT),
      w_out=uinit(k[5], (FEAT, FEAT), FEAT), b_out=uinit(k[6], (FEAT,), FEAT),
      w_lower=uinit(k[7], (D, SEQ), SEQ),    b_lower=uinit(k[8], (D,), SEQ),
      w_upper=uinit(k[9], (SEQ, D), D),                       # Conv2d(D, seq, 1, bias=False)
  )
  # NMF rand-init bases: uniform, L2-normalised along D (torch: F.normalize(rand, dim=1)).
  raw = jax.random.uniform(k[10], (B, D, R), jnp.float32)
  bases = raw / jnp.maximum(jnp.sqrt(jnp.sum(raw * raw, axis=1, keepdims=True)), 1e-12)

  out = hamburger_attention(x, params, bases)
  jax.block_until_ready(out)

  ref = _reference(x, params, bases)
  assert out.shape == (B, SEQ, FEAT)
  err = float(jnp.max(jnp.abs(out - ref)))
  assert err < 5e-2, f"mismatch vs f32 reference (bf16 MXU operands): {err}"
  print("KERNEL_OK")
</pallas_src>

<mosaic_0001>
module attributes {stable_mosaic.version = 11 : i64} {
  func.func @_ham_attn_kernel(%arg0: i32, %arg1: memref<2x8x32xf32, #tpu.memory_space<vmem>>, %arg2: memref<32x64xf32, #tpu.memory_space<vmem>>, %arg3: memref<1x64xf32, #tpu.memory_space<vmem>>, %arg4: memref<8x512xf32, #tpu.memory_space<vmem>>, %arg5: memref<1x512xf32, #tpu.memory_space<vmem>>, %arg6: memref<8x512xf32, #tpu.memory_space<vmem>>, %arg7: memref<32x32xf32, #tpu.memory_space<vmem>>, %arg8: memref<1x32xf32, #tpu.memory_space<vmem>>, %arg9: memref<2x64x512xf32, #tpu.memory_space<vmem>>, %arg10: memref<2x8x32xf32, #tpu.memory_space<vmem>>) attributes {dimension_semantics = [#tpu.dimension_semantics<parallel>], iteration_bounds = array<i64: 2>, scalar_prefetch = 0 : i64, scratch_operands = 0 : i64, tpu.core_type = #tpu.core_type<tc>, window_params = [{transform_indices = @transform_0, window_bounds = array<i64: 2, 8, 32>}, {pipeline_mode = #tpu.pipeline_mode<synchronous>, transform_indices = @transform_1, window_bounds = array<i64: 32, 64>}, {pipeline_mode = #tpu.pipeline_mode<synchronous>, transform_indices = @transform_2, window_bounds = array<i64: 1, 64>}, {pipeline_mode = #tpu.pipeline_mode<synchronous>, transform_indices = @transform_3, window_bounds = array<i64: 8, 512>}, {pipeline_mode = #tpu.pipeline_mode<synchronous>, transform_indices = @transform_4, window_bounds = array<i64: 1, 512>}, {pipeline_mode = #tpu.pipeline_mode<synchronous>, transform_indices = @transform_5, window_bounds = array<i64: 8, 512>}, {pipeline_mode = #tpu.pipeline_mode<synchronous>, transform_indices = @transform_6, window_bounds = array<i64: 32, 32>}, {pipeline_mode = #tpu.pipeline_mode<synchronous>, transform_indices = @transform_7, window_bounds = array<i64: 1, 32>}, {transform_indices = @transform_8, window_bounds = array<i64: 2, 64, 512>}, {transform_indices = @transform_9, window_bounds = array<i64: 2, 8, 32>}]} {
    %c0 = arith.constant 0 : index
    %c0_0 = arith.constant 0 : index
    %c0_1 = arith.constant 0 : index
    %0 = vector.load %arg1[%c0, %c0_0, %c0_1] : memref<2x8x32xf32, #tpu.memory_space<vmem>>, vector<2x8x32xf32>
    %1 = vector.shape_cast %0 : vector<2x8x32xf32> to vector<16x32xf32>
    %2 = arith.truncf %1 : vector<16x32xf32> to vector<16x32xbf16>
    %c0_2 = arith.constant 0 : index
    %c0_3 = arith.constant 0 : index
    %3 = vector.load %arg2[%c0_2, %c0_3] : memref<32x64xf32, #tpu.memory_space<vmem>>, vector<32x64xf32>
    %4 = arith.truncf %3 : vector<32x64xf32> to vector<32x64xbf16>
    %cst = arith.constant dense<0.000000e+00> : vector<16x64xf32>
    %5 = tpu.matmul %2, %4, %cst {dimension_numbers = #tpu.dot_dimension_numbers<[1], [0], [0], [1], [0, 0, 1, 1], [], []>} : vector<16x32xbf16>, vector<32x64xbf16>, vector<16x64xf32> -> vector<16x64xf32>
    %c0_4 = arith.constant 0 : index
    %c0_5 = arith.constant 0 : index
    %6 = vector.load %arg3[%c0_4, %c0_5] : memref<1x64xf32, #tpu.memory_space<vmem>>, vector<1x64xf32>
    %7 = vector.broadcast %6 : vector<1x64xf32> to vector<16x64xf32>
    %8 = arith.addf %5, %7 : vector<16x64xf32>
    %9 = vector.extract_strided_slice %8 {offsets = [0, 0], sizes = [16, 32], strides = [1, 1]} : vector<16x64xf32> to vector<16x32xf32>
    %10 = vector.shape_cast %9 : vector<16x32xf32> to vector<2x8x32xf32>
    %11 = vector.extract_strided_slice %8 {offsets = [0, 32], sizes = [16, 32], strides = [1, 1]} : vector<16x64xf32> to vector<16x32xf32>
    %12 = vector.shape_cast %11 : vector<16x32xf32> to vector<2x8x32xf32>
    %13 = tpu.transpose %0, [0, 2, 1] : vector<2x8x32xf32> -> vector<2x32x8xf32>
    %14 = vector.shape_cast %13 : vector<2x32x8xf32> to vector<64x8xf32>
    %15 = arith.truncf %14 : vector<64x8xf32> to vector<64x8xbf16>
    %c0_6 = arith.constant 0 : index
    %c0_7 = arith.constant 0 : index
    %16 = vector.load %arg4[%c0_6, %c0_7] : memref<8x512xf32, #tpu.memory_space<vmem>>, vector<8x512xf32>
    %17 = arith.truncf %16 : vector<8x512xf32> to vector<8x512xbf16>
    %cst_8 = arith.constant dense<0.000000e+00> : vector<64x512xf32>
    %18 = tpu.matmul %15, %17, %cst_8 {dimension_numbers = #tpu.dot_dimension_numbers<[1], [0], [0], [1], [0, 0, 1, 1], [], []>} : vector<64x8xbf16>, vector<8x512xbf16>, vector<64x512xf32> -> vector<64x512xf32>
    %c0_9 = arith.constant 0 : index
    %c0_10 = arith.constant 0 : index
    %19 = vector.load %arg5[%c0_9, %c0_10] : memref<1x512xf32, #tpu.memory_space<vmem>>, vector<1x512xf32>
    %20 = vector.broadcast %19 : vector<1x512xf32> to vector<64x512xf32>
    %21 = arith.addf %18, %20 : vector<64x512xf32>
    %cst_11 = arith.constant 0.000000e+00 : f32
    %22 = vector.broadcast %cst_11 : f32 to vector<64x512xf32>
    %23 = arith.maximumf %21, %22 : vector<64x512xf32>
    %24 = arith.truncf %23 : vector<64x512xf32> to vector<64x512xbf16>
    %25 = vector.extract_strided_slice %24 {offsets = [0, 0], sizes = [32, 512], strides = [1, 1]} : vector<64x512xbf16> to vector<32x512xbf16>
    %26 = tpu.transpose %25, [1, 0] : vector<32x512xbf16> -> vector<512x32xbf16>
    %c0_12 = arith.constant 0 : index
    %c0_13 = arith.constant 0 : index
    %c0_14 = arith.constant 0 : index
    %27 = vector.load %arg9[%c0_12, %c0_13, %c0_14] : memref<2x64x512xf32, #tpu.memory_space<vmem>>, vector<1x64x512xf32>
    %28 = vector.shape_cast %27 : vector<1x64x512xf32> to vector<64x512xf32>
    %29 = arith.truncf %28 : vector<64x512xf32> to vector<64x512xbf16>
    %cst_15 = arith.constant dense<0.000000e+00> : vector<64x32xf32>
    %30 = tpu.matmul %29, %26, %cst_15 {dimension_numbers = #tpu.dot_dimension_numbers<[1], [0], [0], [1], [0, 0, 1, 1], [], []>} : vector<64x512xbf16>, vector<512x32xbf16>, vector<64x32xf32> -> vector<64x32xf32>
    %cst_16 = arith.constant 1.000000e+00 : f32
    %31 = vector.broadcast %cst_16 : f32 to vector<64x32xf32>
    %32 = arith.mulf %31, %30 : vector<64x32xf32>
    %cst_17 = arith.constant dense<0xFF800000> : vector<32xf32>
    %33 = vector.multi_reduction <maximumf>, %32, %cst_17 [0] : vector<64x32xf32> to vector<32xf32>
    %34 = vector.shape_cast %33 : vector<32xf32> to vector<1x32xf32>
    %35 = vector.broadcast %34 : vector<1x32xf32> to vector<64x32xf32>
    %36 = arith.subf %32, %35 : vector<64x32xf32>
    %37 = math.exp %36 : vector<64x32xf32>
    %cst_18 = arith.constant dense<0.000000e+00> : vector<32xf32>
    %38 = vector.multi_reduction <add>, %37, %cst_18 [0] : vector<64x32xf32> to vector<32xf32>
    %39 = vector.shape_cast %38 : vector<32xf32> to vector<1x32xf32>
    %40 = vector.broadcast %39 : vector<1x32xf32> to vector<64x32xf32>
    %41 = arith.divf %37, %40 : vector<64x32xf32>
    %c0_i32 = arith.constant 0 : i32
    %c6_i32 = arith.constant 6 : i32
    %42 = arith.addi %c0_i32, %c6_i32 : i32
    %c1_i32 = arith.constant 1 : i32
    %43:2 = scf.for %arg11 = %c0_i32 to %42 step %c1_i32 iter_args(%arg12 = %41, %arg13 = %28) -> (vector<64x32xf32>, vector<64x512xf32>)  : i32 {
      %131 = arith.truncf %arg13 : vector<64x512xf32> to vector<64x512xbf16>
      %cst_55 = arith.constant dense<0.000000e+00> : vector<64x32xf32>
      %132 = tpu.matmul %131, %26, %cst_55 {dimension_numbers = #tpu.dot_dimension_numbers<[1], [0], [0], [1], [0, 0, 1, 1], [], []>} : vector<64x512xbf16>, vector<512x32xbf16>, vector<64x32xf32> -> vector<64x32xf32>
      %cst_56 = arith.constant dense<0.000000e+00> : vector<64x64xf32>
      %133 = tpu.matmul %131, %131, %cst_56 {dimension_numbers = #tpu.dot_dimension_numbers<[1], [1], [0], [0], [0, 0, 1, 0], [], []>} : vector<64x512xbf16>, vector<64x512xbf16>, vector<64x64xf32> -> vector<64x64xf32>
      %134 = arith.truncf %133 : vector<64x64xf32> to vector<64x64xbf16>
      %135 = arith.truncf %arg12 : vector<64x32xf32> to vector<64x32xbf16>
      %cst_57 = arith.constant dense<0.000000e+00> : vector<64x32xf32>
      %136 = tpu.matmul %134, %135, %cst_57 {dimension_numbers = #tpu.dot_dimension_numbers<[1], [0], [0], [1], [0, 0, 1, 1], [], []>} : vector<64x64xbf16>, vector<64x32xbf16>, vector<64x32xf32> -> vector<64x32xf32>
      %137 = arith.mulf %arg12, %132 : vector<64x32xf32>
      %cst_58 = arith.constant 9.99999997E-7 : f32
      %138 = vector.broadcast %cst_58 : f32 to vector<64x32xf32>
      %139 = arith.addf %136, %138 : vector<64x32xf32>
      %140 = arith.divf %137, %139 : vector<64x32xf32>
      %141 = arith.truncf %140 : vector<64x32xf32> to vector<64x32xbf16>
      %cst_59 = arith.constant dense<0.000000e+00> : vector<64x512xf32>
      %142 = tpu.matmul %141, %25, %cst_59 {dimension_numbers = #tpu.dot_dimension_numbers<[1], [0], [0], [1], [0, 0, 1, 1], [], []>} : vector<64x32xbf16>, vector<32x512xbf16>, vector<64x512xf32> -> vector<64x512xf32>
      %cst_60 = arith.constant dense<0.000000e+00> : vector<64x64xf32>
      %143 = tpu.matmul %141, %141, %cst_60 {dimension_numbers = #tpu.dot_dimension_numbers<[1], [1], [0], [0], [0, 0, 1, 0], [], []>} : vector<64x32xbf16>, vector<64x32xbf16>, vector<64x64xf32> -> vector<64x64xf32>
      %144 = arith.truncf %143 : vector<64x64xf32> to vector<64x64xbf16>
      %145 = arith.truncf %arg13 : vector<64x512xf32> to vector<64x512xbf16>
      %cst_61 = arith.constant dense<0.000000e+00> : vector<64x512xf32>
      %146 = tpu.matmul %144, %145, %cst_61 {dimension_numbers = #tpu.dot_dimension_numbers<[1], [0], [0], [1], [0, 0, 1, 1], [], []>} : vector<64x64xbf16>, vector<64x512xbf16>, vector<64x512xf32> -> vector<64x512xf32>
      %147 = arith.mulf %arg13, %142 : vector<64x512xf32>
      %cst_62 = arith.constant 9.99999997E-7 : f32
      %148 = vector.broadcast %cst_62 : f32 to vector<64x512xf32>
      %149 = arith.addf %146, %148 : vector<64x512xf32>
      %150 = arith.divf %147, %149 : vector<64x512xf32>
      scf.yield %140, %150 : vector<64x32xf32>, vector<64x512xf32>
    }
    %44 = arith.truncf %43#1 : vector<64x512xf32> to vector<64x512xbf16>
    %cst_19 = arith.constant dense<0.000000e+00> : vector<64x32xf32>
    %45 = tpu.matmul %44, %26, %cst_19 {dimension_numbers = #tpu.dot_dimension_numbers<[1], [0], [0], [1], [0, 0, 1, 1], [], []>} : vector<64x512xbf16>, vector<512x32xbf16>, vector<64x32xf32> -> vector<64x32xf32>
    %cst_20 = arith.constant dense<0.000000e+00> : vector<64x64xf32>
    %46 = tpu.matmul %44, %44, %cst_20 {dimension_numbers = #tpu.dot_dimension_numbers<[1], [1], [0], [0], [0, 0, 1, 0], [], []>} : vector<64x512xbf16>, vector<64x512xbf16>, vector<64x64xf32> -> vector<64x64xf32>
    %47 = arith.truncf %46 : vector<64x64xf32> to vector<64x64xbf16>
    %48 = arith.truncf %43#0 : vector<64x32xf32> to vector<64x32xbf16>
    %cst_21 = arith.constant dense<0.000000e+00> : vector<64x32xf32>
    %49 = tpu.matmul %47, %48, %cst_21 {dimension_numbers = #tpu.dot_dimension_numbers<[1], [0], [0], [1], [0, 0, 1, 1], [], []>} : vector<64x64xbf16>, vector<64x32xbf16>, vector<64x32xf32> -> vector<64x32xf32>
    %50 = arith.mulf %43#0, %45 : vector<64x32xf32>
    %cst_22 = arith.constant 9.99999997E-7 : f32
    %51 = vector.broadcast %cst_22 : f32 to vector<64x32xf32>
    %52 = arith.addf %49, %51 : vector<64x32xf32>
    %53 = arith.divf %50, %52 : vector<64x32xf32>
    %54 = tpu.transpose %53, [1, 0] : vector<64x32xf32> -> vector<32x64xf32>
    %55 = arith.truncf %54 : vector<32x64xf32> to vector<32x64xbf16>
    %56 = arith.truncf %43#1 : vector<64x512xf32> to vector<64x512xbf16>
    %cst_23 = arith.constant dense<0.000000e+00> : vector<32x512xf32>
    %57 = tpu.matmul %55, %56, %cst_23 {dimension_numbers = #tpu.dot_dimension_numbers<[1], [0], [0], [1], [0, 0, 1, 1], [], []>} : vector<32x64xbf16>, vector<64x512xbf16>, vector<32x512xf32> -> vector<32x512xf32>
    %58 = vector.extract_strided_slice %24 {offsets = [32, 0], sizes = [32, 512], strides = [1, 1]} : vector<64x512xbf16> to vector<32x512xbf16>
    %59 = tpu.transpose %58, [1, 0] : vector<32x512xbf16> -> vector<512x32xbf16>
    %c1 = arith.constant 1 : index
    %c0_24 = arith.constant 0 : index
    %c0_25 = arith.constant 0 : index
    %60 = vector.load %arg9[%c1, %c0_24, %c0_25] : memref<2x64x512xf32, #tpu.memory_space<vmem>>, vector<1x64x512xf32>
    %61 = vector.shape_cast %60 : vector<1x64x512xf32> to vector<64x512xf32>
    %62 = arith.truncf %61 : vector<64x512xf32> to vector<64x512xbf16>
    %cst_26 = arith.constant dense<0.000000e+00> : vector<64x32xf32>
    %63 = tpu.matmul %62, %59, %cst_26 {dimension_numbers = #tpu.dot_dimension_numbers<[1], [0], [0], [1], [0, 0, 1, 1], [], []>} : vector<64x512xbf16>, vector<512x32xbf16>, vector<64x32xf32> -> vector<64x32xf32>
    %cst_27 = arith.constant 1.000000e+00 : f32
    %64 = vector.broadcast %cst_27 : f32 to vector<64x32xf32>
    %65 = arith.mulf %64, %63 : vector<64x32xf32>
    %cst_28 = arith.constant dense<0xFF800000> : vector<32xf32>
    %66 = vector.multi_reduction <maximumf>, %65, %cst_28 [0] : vector<64x32xf32> to vector<32xf32>
    %67 = vector.shape_cast %66 : vector<32xf32> to vector<1x32xf32>
    %68 = vector.broadcast %67 : vector<1x32xf32> to vector<64x32xf32>
    %69 = arith.subf %65, %68 : vector<64x32xf32>
    %70 = math.exp %69 : vector<64x32xf32>
    %cst_29 = arith.constant dense<0.000000e+00> : vector<32xf32>
    %71 = vector.multi_reduction <add>, %70, %cst_29 [0] : vector<64x32xf32> to vector<32xf32>
    %72 = vector.shape_cast %71 : vector<32xf32> to vector<1x32xf32>
    %73 = vector.broadcast %72 : vector<1x32xf32> to vector<64x32xf32>
    %74 = arith.divf %70, %73 : vector<64x32xf32>
    %c0_i32_30 = arith.constant 0 : i32
    %c6_i32_31 = arith.constant 6 : i32
    %75 = arith.addi %c0_i32_30, %c6_i32_31 : i32
    %c1_i32_32 = arith.constant 1 : i32
    %76:2 = scf.for %arg11 = %c0_i32_30 to %75 step %c1_i32_32 iter_args(%arg12 = %74, %arg13 = %61) -> (vector<64x32xf32>, vector<64x512xf32>)  : i32 {
      %131 = arith.truncf %arg13 : vector<64x512xf32> to vector<64x512xbf16>
      %cst_55 = arith.constant dense<0.000000e+00> : vector<64x32xf32>
      %132 = tpu.matmul %131, %59, %cst_55 {dimension_numbers = #tpu.dot_dimension_numbers<[1], [0], [0], [1], [0, 0, 1, 1], [], []>} : vector<64x512xbf16>, vector<512x32xbf16>, vector<64x32xf32> -> vector<64x32xf32>
      %cst_56 = arith.constant dense<0.000000e+00> : vector<64x64xf32>
      %133 = tpu.matmul %131, %131, %cst_56 {dimension_numbers = #tpu.dot_dimension_numbers<[1], [1], [0], [0], [0, 0, 1, 0], [], []>} : vector<64x512xbf16>, vector<64x512xbf16>, vector<64x64xf32> -> vector<64x64xf32>
      %134 = arith.truncf %133 : vector<64x64xf32> to vector<64x64xbf16>
      %135 = arith.truncf %arg12 : vector<64x32xf32> to vector<64x32xbf16>
      %cst_57 = arith.constant dense<0.000000e+00> : vector<64x32xf32>
      %136 = tpu.matmul %134, %135, %cst_57 {dimension_numbers = #tpu.dot_dimension_numbers<[1], [0], [0], [1], [0, 0, 1, 1], [], []>} : vector<64x64xbf16>, vector<64x32xbf16>, vector<64x32xf32> -> vector<64x32xf32>
      %137 = arith.mulf %arg12, %132 : vector<64x32xf32>
      %cst_58 = arith.constant 9.99999997E-7 : f32
      %138 = vector.broadcast %cst_58 : f32 to vector<64x32xf32>
      %139 = arith.addf %136, %138 : vector<64x32xf32>
      %140 = arith.divf %137, %139 : vector<64x32xf32>
      %141 = arith.truncf %140 : vector<64x32xf32> to vector<64x32xbf16>
      %cst_59 = arith.constant dense<0.000000e+00> : vector<64x512xf32>
      %142 = tpu.matmul %141, %58, %cst_59 {dimension_numbers = #tpu.dot_dimension_numbers<[1], [0], [0], [1], [0, 0, 1, 1], [], []>} : vector<64x32xbf16>, vector<32x512xbf16>, vector<64x512xf32> -> vector<64x512xf32>
      %cst_60 = arith.constant dense<0.000000e+00> : vector<64x64xf32>
      %143 = tpu.matmul %141, %141, %cst_60 {dimension_numbers = #tpu.dot_dimension_numbers<[1], [1], [0], [0], [0, 0, 1, 0], [], []>} : vector<64x32xbf16>, vector<64x32xbf16>, vector<64x64xf32> -> vector<64x64xf32>
      %144 = arith.truncf %143 : vector<64x64xf32> to vector<64x64xbf16>
      %145 = arith.truncf %arg13 : vector<64x512xf32> to vector<64x512xbf16>
      %cst_61 = arith.constant dense<0.000000e+00> : vector<64x512xf32>
      %146 = tpu.matmul %144, %145, %cst_61 {dimension_numbers = #tpu.dot_dimension_numbers<[1], [0], [0], [1], [0, 0, 1, 1], [], []>} : vector<64x64xbf16>, vector<64x512xbf16>, vector<64x512xf32> -> vector<64x512xf32>
      %147 = arith.mulf %arg13, %142 : vector<64x512xf32>
      %cst_62 = arith.constant 9.99999997E-7 : f32
      %148 = vector.broadcast %cst_62 : f32 to vector<64x512xf32>
      %149 = arith.addf %146, %148 : vector<64x512xf32>
      %150 = arith.divf %147, %149 : vector<64x512xf32>
      scf.yield %140, %150 : vector<64x32xf32>, vector<64x512xf32>
    }
    %77 = arith.truncf %76#1 : vector<64x512xf32> to vector<64x512xbf16>
    %cst_33 = arith.constant dense<0.000000e+00> : vector<64x32xf32>
    %78 = tpu.matmul %77, %59, %cst_33 {dimension_numbers = #tpu.dot_dimension_numbers<[1], [0], [0], [1], [0, 0, 1, 1], [], []>} : vector<64x512xbf16>, vector<512x32xbf16>, vector<64x32xf32> -> vector<64x32xf32>
    %cst_34 = arith.constant dense<0.000000e+00> : vector<64x64xf32>
    %79 = tpu.matmul %77, %77, %cst_34 {dimension_numbers = #tpu.dot_dimension_numbers<[1], [1], [0], [0], [0, 0, 1, 0], [], []>} : vector<64x512xbf16>, vector<64x512xbf16>, vector<64x64xf32> -> vector<64x64xf32>
    %80 = arith.truncf %79 : vector<64x64xf32> to vector<64x64xbf16>
    %81 = arith.truncf %76#0 : vector<64x32xf32> to vector<64x32xbf16>
    %cst_35 = arith.constant dense<0.000000e+00> : vector<64x32xf32>
    %82 = tpu.matmul %80, %81, %cst_35 {dimension_numbers = #tpu.dot_dimension_numbers<[1], [0], [0], [1], [0, 0, 1, 1], [], []>} : vector<64x64xbf16>, vector<64x32xbf16>, vector<64x32xf32> -> vector<64x32xf32>
    %83 = arith.mulf %76#0, %78 : vector<64x32xf32>
    %cst_36 = arith.constant 9.99999997E-7 : f32
    %84 = vector.broadcast %cst_36 : f32 to vector<64x32xf32>
    %85 = arith.addf %82, %84 : vector<64x32xf32>
    %86 = arith.divf %83, %85 : vector<64x32xf32>
    %87 = tpu.transpose %86, [1, 0] : vector<64x32xf32> -> vector<32x64xf32>
    %88 = arith.truncf %87 : vector<32x64xf32> to vector<32x64xbf16>
    %89 = arith.truncf %76#1 : vector<64x512xf32> to vector<64x512xbf16>
    %cst_37 = arith.constant dense<0.000000e+00> : vector<32x512xf32>
    %90 = tpu.matmul %88, %89, %cst_37 {dimension_numbers = #tpu.dot_dimension_numbers<[1], [0], [0], [1], [0, 0, 1, 1], [], []>} : vector<32x64xbf16>, vector<64x512xbf16>, vector<32x512xf32> -> vector<32x512xf32>
    %91 = tpu.concatenate %57, %90 in 0 : vector<32x512xf32>, vector<32x512xf32> -> vector<64x512xf32>
    %92 = arith.truncf %91 : vector<64x512xf32> to vector<64x512xbf16>
    %c0_38 = arith.constant 0 : index
    %c0_39 = arith.constant 0 : index
    %93 = vector.load %arg6[%c0_38, %c0_39] : memref<8x512xf32, #tpu.memory_space<vmem>>, vector<8x512xf32>
    %94 = arith.truncf %93 : vector<8x512xf32> to vector<8x512xbf16>
    %cst_40 = arith.constant dense<0.000000e+00> : vector<64x8xf32>
    %95 = tpu.matmul %92, %94, %cst_40 {dimension_numbers = #tpu.dot_dimension_numbers<[1], [1], [0], [0], [0, 0, 1, 0], [], []>} : vector<64x512xbf16>, vector<8x512xbf16>, vector<64x8xf32> -> vector<64x8xf32>
    %96 = vector.shape_cast %95 : vector<64x8xf32> to vector<2x32x8xf32>
    %97 = tpu.transpose %96, [0, 2, 1] : vector<2x32x8xf32> -> vector<2x8x32xf32>
    %98 = arith.addf %97, %0 : vector<2x8x32xf32>
    %cst_41 = arith.constant 0.000000e+00 : f32
    %99 = vector.broadcast %cst_41 : f32 to vector<2x8x32xf32>
    %100 = arith.maximumf %98, %99 : vector<2x8x32xf32>
    %cst_42 = arith.constant dense<0xFF800000> : vector<2x32xf32>
    %101 = vector.multi_reduction <maximumf>, %100, %cst_42 [1] : vector<2x8x32xf32> to vector<2x32xf32>
    %102 = vector.shape_cast %101 : vector<2x32xf32> to vector<2x1x32xf32>
    %103 = vector.broadcast %102 : vector<2x1x32xf32> to vector<2x8x32xf32>
    %104 = arith.subf %100, %103 : vector<2x8x32xf32>
    %105 = math.exp %104 : vector<2x8x32xf32>
    %cst_43 = arith.constant dense<0.000000e+00> : vector<2x32xf32>
    %106 = vector.multi_reduction <add>, %105, %cst_43 [1] : vector<2x8x32xf32> to vector<2x32xf32>
    %107 = vector.shape_cast %106 : vector<2x32xf32> to vector<2x1x32xf32>
    %108 = arith.mulf %105, %10 : vector<2x8x32xf32>
    %cst_44 = arith.constant dense<0.000000e+00> : vector<2x32xf32>
    %109 = vector.multi_reduction <add>, %108, %cst_44 [1] : vector<2x8x32xf32> to vector<2x32xf32>
    %110 = vector.shape_cast %109 : vector<2x32xf32> to vector<2x1x32xf32>
    %111 = tpu.reciprocal %107 {approx = true} : vector<2x1x32xf32> -> vector<2x1x32xf32>
    %112 = arith.mulf %110, %111 : vector<2x1x32xf32>
    %cst_45 = arith.constant 0.000000e+00 : f32
    %113 = vector.broadcast %cst_45 : f32 to vector<2x8x32xf32>
    %114 = arith.subf %113, %12 : vector<2x8x32xf32>
    %115 = math.exp %114 : vector<2x8x32xf32>
    %cst_46 = arith.constant 1.000000e+00 : f32
    %116 = vector.broadcast %cst_46 : f32 to vector<2x8x32xf32>
    %117 = arith.addf %116, %115 : vector<2x8x32xf32>
    %118 = tpu.reciprocal %117 {approx = true} : vector<2x8x32xf32> -> vector<2x8x32xf32>
    %119 = vector.broadcast %112 : vector<2x1x32xf32> to vector<2x8x32xf32>
    %120 = arith.mulf %118, %119 : vector<2x8x32xf32>
    %121 = vector.shape_cast %120 : vector<2x8x32xf32> to vector<16x32xf32>
    %122 = arith.truncf %121 : vector<16x32xf32> to vector<16x32xbf16>
    %c0_47 = arith.constant 0 : index
    %c0_48 = arith.constant 0 : index
    %123 = vector.load %arg7[%c0_47, %c0_48] : memref<32x32xf32, #tpu.memory_space<vmem>>, vector<32x32xf32>
    %124 = arith.truncf %123 : vector<32x32xf32> to vector<32x32xbf16>
    %cst_49 = arith.constant dense<0.000000e+00> : vector<16x32xf32>
    %125 = tpu.matmul %122, %124, %cst_49 {dimension_numbers = #tpu.dot_dimension_numbers<[1], [0], [0], [1], [0, 0, 1, 1], [], []>} : vector<16x32xbf16>, vector<32x32xbf16>, vector<16x32xf32> -> vector<16x32xf32>
    %c0_50 = arith.constant 0 : index
    %c0_51 = arith.constant 0 : index
    %126 = vector.load %arg8[%c0_50, %c0_51] : memref<1x32xf32, #tpu.memory_space<vmem>>, vector<1x32xf32>
    %127 = vector.broadcast %126 : vector<1x32xf32> to vector<16x32xf32>
    %128 = arith.addf %125, %127 : vector<16x32xf32>
    %129 = vector.shape_cast %128 : vector<16x32xf32> to vector<2x8x32xf32>
    %c0_52 = arith.constant 0 : index
    %c0_53 = arith.constant 0 : index
    %c0_54 = arith.constant 0 : index
    %130 = vector.load %arg10[%c0_52, %c0_53, %c0_54] : memref<2x8x32xf32, #tpu.memory_space<vmem>>, vector<2x8x32xf32>
    tpu.vector_store %arg10[%c0_52, %c0_53, %c0_54], %129 {strides = array<i32>} : memref<2x8x32xf32, #tpu.memory_space<vmem>>, vector<2x8x32xf32>,
    return
  }
  func.func @transform_0(%arg0: i32) -> (i32, i32, i32) {
    %c0_i32 = arith.constant 0 : i32
    %c0_i32_0 = arith.constant 0 : i32
    %c0_i32_1 = arith.constant 0 : i32
    return %arg0, %c0_i32, %c0_i32_0 : i32, i32, i32
  }
  func.func @transform_1(%arg0: i32) -> (i32, i32) {
    %c0_i32 = arith.constant 0 : i32
    %c0_i32_0 = arith.constant 0 : i32
    %c0_i32_1 = arith.constant 0 : i32
    return %c0_i32, %c0_i32_0 : i32, i32
  }
  func.func @transform_2(%arg0: i32) -> (i32, i32) {
    %c0_i32 = arith.constant 0 : i32
    %c0_i32_0 = arith.constant 0 : i32
    %c0_i32_1 = arith.constant 0 : i32
    return %c0_i32, %c0_i32_0 : i32, i32
  }
  func.func @transform_3(%arg0: i32) -> (i32, i32) {
    %c0_i32 = arith.constant 0 : i32
    %c0_i32_0 = arith.constant 0 : i32
    %c0_i32_1 = arith.constant 0 : i32
    return %c0_i32, %c0_i32_0 : i32, i32
  }
  func.func @transform_4(%arg0: i32) -> (i32, i32) {
    %c0_i32 = arith.constant 0 : i32
    %c0_i32_0 = arith.constant 0 : i32
    %c0_i32_1 = arith.constant 0 : i32
    return %c0_i32, %c0_i32_0 : i32, i32
  }
  func.func @transform_5(%arg0: i32) -> (i32, i32) {
    %c0_i32 = arith.constant 0 : i32
    %c0_i32_0 = arith.constant 0 : i32
    %c0_i32_1 = arith.constant 0 : i32
    return %c0_i32, %c0_i32_0 : i32, i32
  }
  func.func @transform_6(%arg0: i32) -> (i32, i32) {
    %c0_i32 = arith.constant 0 : i32
    %c0_i32_0 = arith.constant 0 : i32
    %c0_i32_1 = arith.constant 0 : i32
    return %c0_i32, %c0_i32_0 : i32, i32
  }
  func.func @transform_7(%arg0: i32) -> (i32, i32) {
    %c0_i32 = arith.constant 0 : i32
    %c0_i32_0 = arith.constant 0 : i32
    %c0_i32_1 = arith.constant 0 : i32
    return %c0_i32, %c0_i32_0 : i32, i32
  }
  func.func @transform_8(%arg0: i32) -> (i32, i32, i32) {
    %c0_i32 = arith.constant 0 : i32
    %c0_i32_0 = arith.constant 0 : i32
    %c0_i32_1 = arith.constant 0 : i32
    return %arg0, %c0_i32, %c0_i32_0 : i32, i32, i32
  }
  func.func @transform_9(%arg0: i32) -> (i32, i32, i32) {
    %c0_i32 = arith.constant 0 : i32
    %c0_i32_0 = arith.constant 0 : i32
    %c0_i32_1 = arith.constant 0 : i32
    return %arg0, %c0_i32, %c0_i32_0 : i32, i32, i32
  }
}

</mosaic_0001>

<bundles_post_ra>
// kernel: tpu_custom_call.1
= control target key start
LH: loop header
LB: loop body
LE: loop exit
PB: predicated region body
PF: predicated region fallthrough
CT: control target
= control target key end

     0   :  { %s10263_s0 = inlined_call_operand.hbm [shape: f32[4,8,32], index: 0, kind: input, shape index: {}]   ;;  %s10264_s1 = inlined_call_operand.hbm [shape: f32[32,64], index: 1, kind: input, shape index: {}]   ;;  %s10265_s2 = inlined_call_operand.vmem [shape: f32[1,64], index: 2, kind: input, shape index: {}]   ;;  %s10266_s3 = inlined_call_operand.hbm [shape: f32[8,512], index: 3, kind: input, shape index: {}]   ;;  %s10267_s4 = inlined_call_operand.vmem [shape: f32[1,512], index: 4, kind: input, shape index: {}]   ;;  %s10268_s5 = inlined_call_operand.hbm [shape: f32[8,512], index: 5, kind: input, shape index: {}]   ;;  %s10269_s6 = inlined_call_operand.hbm [shape: f32[32,32], index: 6, kind: input, shape index: {}]   ;;  %s10270_s7 = inlined_call_operand.vmem [shape: f32[1,32], index: 7, kind: input, shape index: {}]   ;;  %s10271_s8 = inlined_call_operand.hbm [shape: f32[4,64,512], index: 8, kind: input, shape index: {}]   ;;  %s10272_s9 = inlined_call_operand.hbm [shape: f32[4,8,32], index: 9, kind: output, shape index: {}]  }
   0x1   :  { %10411 = sst [smem:[#allocation119_spill]] %s10263_s0 }
   0x2   :  { %10412 = sst [smem:[#allocation120_spill]] %s10264_s1 }
   0x3   :  { %10413 = sst [smem:[#allocation121_spill]] %s10266_s3 }
   0x4   :  { %10414 = sst [smem:[#allocation122_spill]] %s10272_s9 }
   0x5   :  { %14 = vsyncpa [#allocation3], 0 }
   0x6   :  { %16 = vsyncpa [#allocation3 + $0x1], 0 }
   0x7   :  { %17 = vsyncpa [#allocation6], 0 }
   0x8   :  { %18 = vsyncpa [#allocation9], 0 }
   0x9   :  { %19 = vsyncpa [#allocation12], 0 }
   0xa   :  { %21 = vsyncpa [#allocation12 + $0x1], 0 }
   0xb   :  { %22 = vsyncpa [#allocation4], 0 }
   0xc   :  { %24 = vsyncpa [#allocation4 + $0x1], 0  ;;  %s7463_s30 = smov 0   ;;  %s7465_s10 = smov 0  }
   0xd   :  { %s7467_s11 = smov 0   ;;  %s7469_s12 = smov 0  }
   0xe LB: > { %10415 = sst [smem:[#allocation19_spill]] %s7051_s30  ;;  %s7484_s13 = sadd.s32 4294967295, %s7063_s12   ;;  %s7063_s12 = sphi %s7469_s12, %s10911_s12   ;;  %s7059_s11 = sphi %s7467_s11, %s10910_s11   ;;  %s7055_s10 = sphi %s7465_s10, %s10909_s10   ;;  %s7051_s30 = sphi %s7463_s30, %s10908_s30  }
   0xf   : > { %s4989_s14 = sadd.s32 4294967294, %s7063_s12   ;;  %p50_p0 = scmp.ne.s32.totalorder %s7055_s10, %s7051_s30 }
  0x10   : > { %p10273_p1 = scmp.eq.s32.totalorder %s7484_s13, 0  ;;  %p253_p3 = scmp.eq.s32.totalorder %s4989_s14, 1 }
  0x11   : > { %p4990_p5 = scmp.ge.s32.totalorder %s7063_s12, 1  ;;  %p260_p7 = scmp.lt.s32.totalorder %s7063_s12, 3 }
  0x12   : > { %p7493_p4 = por %p10273_p1, %p50_p0  ;;  %p7498_p6 = por %p253_p3, %p50_p0 }
  0x13   : > { %p7503_p8 = pnand %p4990_p5, %p260_p7  ;;  %s7393_s18 = smov [#allocation5]  }
  0x14   : > { %s10416_s15 = scalar_select %p7493_p4, 1, 0 }
  0x15   : > { %s10417_s16 = scalar_select %p7498_p6, 1, 0 }
  0x16   : > { %s10419_s17 = scalar_select %p7503_p8, 1, 0 }
  0x17   : > { %10418 = sst [smem:[#allocation20_spill]] %s10417_s16  ;;  %s272_s19 = sshll.u32 %s7393_s18, 4  ;;  %s7507_s19 = int_to_ptr.vmem [resolvable:$true] %s272_s19 }
  0x18   : > { %p5502_p9 = pneg %p7503_p8  ;;  %s7394_s21 = smov [#allocation8]  }
  0x19   : > { %s303_s22 = sshll.u32 %s7394_s21, 4  ;;  %s7395_s23 = smov [#allocation7]   ;;  %s7518_s22 = int_to_ptr.vmem [resolvable:$true] %s303_s22 }
  0x1a   : > { %p7514_p11 = pnand %p5502_p9, %p10273_p1  ;;  %s7520_s24 = sshll.u32 %s7395_s23, 4  ;;  %s290_s24 = int_to_ptr.vmem [resolvable:$true] %s7520_s24 }
  0x1b   : > { %s10421_s1 = sld [smem:[#allocation120_spill]] }
  0x1c   : > { %p7530_p13 = pneg %p7514_p11 }
  0x21   : > { %s6485_s27 = scalar_lea.hbm %s10421_s1, 512 }
  0x22   : > { %p6486_p12 = scmp.ne.s32.totalorder %s10421_s1, %s6485_s27  ;;  %p6492_p5 = scmp.lt.u32.totalorder %s6485_s27, %s10421_s1 }
  0x24   : > { %p6488_p0 = pnand %p7530_p13, %p6486_p12 }
  0x26   : > { %p6489_p3 = pneg %p6488_p0 }
  0x28   : > { %p6494_p7 = pnand %p6492_p5, %p6489_p3 }
  0x2a   : > { %6497 = shalt.err (!%p6494_p7)
}
  0x2b   : > { %s6498_s23 = scalar_lea.vmem %s7507_s19, 512  ;;  %p6506_p2 = scmp.lt.s32.totalorder %s7507_s19, %s7507_s19 }
  0x2c   : > { %p6499_p9 = scmp.ne.s32.totalorder %s7507_s19, %s6498_s23  ;;  %p6507_p6 = scmp.lt.s32.totalorder %s6498_s23, %s6498_s23 }
  0x2e   : > { %p6501_p10 = pnand %p6499_p9, %p7530_p13  ;;  %p6508_p12 = por %p6507_p6, %p6506_p2 }
  0x30   : > { %p6502_p1 = pneg %p6501_p10 }
  0x32   : > { %p6509_p0 = pnand %p6508_p12, %p6502_p1 }
  0x34   : > { %6512 = shalt.err (!%p6509_p0)
}
  0x35   : > { %s10279_s25 = smov 128   ;;  %s7397_s26 = smov 8  }
  0x36   : > { %5505 = dma.hbm_to_vmem [thread:$0]  (!%p7514_p11), %s10421_s1, 512, %s7507_s19, [#allocation6], %s10279_s25, %s10279_s25, %s7397_s26  }
  0x37   : > { %s6513_s21 = scalar_lea.hbm %s10268_s5, 512 }
  0x38   : > { %p6514_p1 = scmp.ne.s32.totalorder %s10268_s5, %s6513_s21  ;;  %p6520_p10 = scmp.lt.u32.totalorder %s6513_s21, %s10268_s5 }
  0x3a   : > { %p6516_p2 = pnand %p6514_p1, %p7530_p13 }
  0x3c   : > { %p6517_p6 = pneg %p6516_p2 }
  0x3e   : > { %p6522_p3 = pnand %p6520_p10, %p6517_p6 }
  0x40   : > { %6525 = shalt.err (!%p6522_p3)
}
  0x41   : > { %s6526_s19 = scalar_lea.vmem %s7518_s22, 512  ;;  %p6534_p12 = scmp.lt.s32.totalorder %s7518_s22, %s7518_s22 }
  0x42   : > { %p6527_p5 = scmp.ne.s32.totalorder %s7518_s22, %s6526_s19  ;;  %p6535_p0 = scmp.lt.s32.totalorder %s6526_s19, %s6526_s19 }
  0x44   : > { %p6529_p7 = pnand %p6527_p5, %p7530_p13  ;;  %p6536_p1 = por %p6535_p0, %p6534_p12 }
  0x46   : > { %p6530_p9 = pneg %p6529_p7 }
  0x48   : > { %p6537_p2 = pnand %p6536_p1, %p6530_p9 }
  0x4a   : > { %6540 = shalt.err (!%p6537_p2)
}
  0x4b   : > { %5511 = dma.hbm_to_vmem [thread:$0]  (!%p7514_p11), %s10268_s5, 512, %s7518_s22, [#allocation9]  }
  0x4c   : > { %s10423_s3 = sld [smem:[#allocation121_spill]] }
  0x52   : > { %s6541_s28 = scalar_lea.hbm %s10423_s3, 512 }
  0x53   : > { %p6542_p6 = scmp.ne.s32.totalorder %s10423_s3, %s6541_s28  ;;  %p6548_p5 = scmp.lt.u32.totalorder %s6541_s28, %s10423_s3 }
  0x55   : > { %p6544_p10 = pnand %p6542_p6, %p7530_p13 }
  0x57   : > { %p6545_p3 = pneg %p6544_p10 }
  0x59   : > { %p6550_p7 = pnand %p6548_p5, %p6545_p3 }
  0x5b   : > { %6553 = shalt.err (!%p6550_p7)
}
  0x5c   : > { %s6554_s19 = scalar_lea.vmem %s290_s24, 512  ;;  %p6562_p1 = scmp.lt.s32.totalorder %s290_s24, %s290_s24 }
  0x5d   : > { %p6555_p9 = scmp.ne.s32.totalorder %s290_s24, %s6554_s19  ;;  %p6563_p2 = scmp.lt.s32.totalorder %s6554_s19, %s6554_s19 }
  0x5f   : > { %p6557_p12 = pnand %p6555_p9, %p7530_p13  ;;  %p6564_p4 = por %p6563_p2, %p6562_p1 }
  0x61   : > { %p6558_p0 = pneg %p6557_p12 }
  0x63   : > { %p6565_p8 = pnand %p6564_p4, %p6558_p0 }
  0x65   : > { %6568 = shalt.err (!%p6565_p8)
}
  0x66   : > { %5508 = dma.hbm_to_vmem [thread:$0]  (!%p7514_p11), %s10423_s3, 512, %s290_s24, [#allocation6]  }
  0x67   : > { %s7398_s30 = smov [#allocation10]   ;;  %s6569_s29 = scalar_lea.hbm %s10269_s6, 512 }
  0x68   : > { %s313_s16 = sshll.u32 %s7398_s30, 4  ;;  %p6570_p6 = scmp.ne.s32.totalorder %s10269_s6, %s6569_s29  ;;  %s314_s16 = int_to_ptr.vmem [resolvable:$true] %s313_s16 }
  0x69   : > { %p6576_p10 = scmp.lt.u32.totalorder %s6569_s29, %s10269_s6 }
  0x6a   : > { %p6572_p4 = pnand %p6570_p6, %p7530_p13 }
  0x6c   : > { %p6573_p8 = pneg %p6572_p4 }
  0x6e   : > { %p6578_p3 = pnand %p6576_p10, %p6573_p8 }
  0x70   : > { %6581 = shalt.err (!%p6578_p3)
}
  0x71   : > { %s6582_s24 = scalar_lea.vmem %s314_s16, 512  ;;  %p6590_p12 = scmp.lt.s32.totalorder %s314_s16, %s314_s16 }
  0x72   : > { %p6583_p5 = scmp.ne.s32.totalorder %s314_s16, %s6582_s24  ;;  %p6591_p0 = scmp.lt.s32.totalorder %s6582_s24, %s6582_s24 }
  0x74   : > { %p6585_p7 = pnand %p6583_p5, %p7530_p13  ;;  %p6592_p1 = por %p6591_p0, %p6590_p12 }
  0x76   : > { %p6586_p9 = pneg %p6585_p7 }
  0x78   : > { %p6593_p2 = pnand %p6592_p1, %p6586_p9 }
  0x7a   : > { %6596 = shalt.err (!%p6593_p2)
}
  0x7b   : > { %5514 = dma.hbm_to_vmem [thread:$0]  (!%p7514_p11), %s10269_s6, 512, %s314_s16, [#allocation9], %s10279_s25, %s10279_s25, %s7397_s26  }
  0x7c   : > { %s7618_s14 = sadd.s32 1, %s7063_s12   ;;  %s37_s20 = sadd.s32 1, %s7059_s11 }
  0x7d   : > { %s34_s30 = ssub.s32 %s7063_s12, %s7618_s14  ;;  %p44_p13 = scmp.ne.s32.totalorder %s7059_s11, %s7055_s10 }
  0x7e   : > { %p35_p6 = scmp.eq.s32.totalorder %s34_s30, 0  ;;  %p45_p4 = scmp.eq.s32.totalorder %s7063_s12, 0 }
  0x7f   : > { %p10424_p8 = scmp.eq.s32.totalorder %s7484_s13, 1  ;;  %p5530_p3 = scmp.lt.s32.totalorder %s7063_s12, 2 }
  0x80   : > { %s7634_s28 = scalar_select %p35_p6, %s7059_s11, %s37_s20  }
  0x81   : > { %p7628_p10 = por %p10424_p8, %p44_p13  ;;  %p46_p5 = por %p45_p4, %p44_p13 }
  0x82   : > { %s7637_s29 = sand.u32 1, %s7059_s11   ;;  %s5126_s18 = sshll.u32 %s7063_s12, 8 }
  0x83   : > { %s4996_s16 = sshll.u32 %s7637_s29, 4  ;;  %s10426_s0 = sld [smem:[#allocation119_spill]] }
  0x84   : > { %s334_s24 = scalar_lea.vmem [#allocation2], %s4996_s16  ;;  %p7648_p11 = pnand %p5530_p3, %p46_p5 }
  0x85   : > { %s341_s22 = sshll.u32 %s334_s24, 4  ;;  %s331_s30 = scalar_lea.sflag [#allocation3], %s7637_s29  ;;  %s7646_s22 = int_to_ptr.vmem [resolvable:$true] %s341_s22 }
  0x86   : > { %p6599_p9 = pneg %p7648_p11 }
  0x89   : > { %s7644_s19 = scalar_lea.hbm %s10426_s0, %s5126_s18  ;;  %s6602_s21 = scalar_lea.hbm %s10426_s0, 512 }
  0x8a   : > { %s6597_s25 = scalar_lea.hbm %s7644_s19, 256  ;;  %p6603_p1 = scmp.lt.u32.totalorder %s7644_s19, %s10426_s0 }
  0x8b   : > { %p6598_p7 = scmp.ne.s32.totalorder %s7644_s19, %s6597_s25  ;;  %p6604_p2 = scmp.lt.u32.totalorder %s6602_s21, %s6597_s25 }
  0x8c   : > { %p6606_p6 = scmp.lt.u32.totalorder %s6597_s25, %s7644_s19 }
  0x8d   : > { %p6600_p12 = pnand %p6599_p9, %p6598_p7  ;;  %p6605_p13 = por %p6604_p2, %p6603_p1 }
  0x8f   : > { %p6601_p0 = pneg %p6600_p12  ;;  %p6607_p4 = por %p6606_p6, %p6605_p13 }
  0x91   : > { %p6608_p8 = pnand %p6607_p4, %p6601_p0 }
  0x93   : > { %6611 = shalt.err (!%p6608_p8)
}
  0x94   : > { %s6612_s20 = scalar_lea.vmem %s7646_s22, 256  ;;  %s7399_s16 = smov [#allocation2]  }
  0x95   : > { %p6613_p3 = scmp.ne.s32.totalorder %s7646_s22, %s6612_s20  ;;  %s6617_s18 = sshll.u32 %s7399_s16, 4  ;;  %s6618_s18 = int_to_ptr.vmem [resolvable:$false] %s6617_s18 }
  0x96   : > { %s6619_s23 = scalar_lea.vmem %s6618_s18, 512  ;;  %p6620_p12 = scmp.lt.s32.totalorder %s7646_s22, %s6618_s18 }
  0x97   : > { %p6615_p5 = pnand %p6613_p3, %p6599_p9  ;;  %p6621_p1 = scmp.lt.s32.totalorder %s6619_s23, %s6612_s20 }
  0x99   : > { %p6616_p7 = pneg %p6615_p5  ;;  %p6622_p2 = por %p6621_p1, %p6620_p12 }
  0x9b   : > { %p6623_p13 = pnand %p6622_p2, %p6616_p7 }
  0x9d   : > { %6626 = shalt.err (!%p6623_p13)
}
  0x9e   : > { %s10428_s25 = smov 128   ;;  %s5128_s21 = sshll.u32 %s7063_s12, 13 }
  0x9f   : > { %5518 = dma.hbm_to_vmem [thread:$0]  (!%p7648_p11), %s7644_s19, 256, %s7646_s22, %s331_s30, %s10428_s25, %s10428_s25, %s7397_s26  }
  0xa0   : > { %s10429_s24 = sshll.u32 %s7637_s29, 9  ;;  %s7690_s0 = scalar_lea.hbm %s10271_s8, %s5128_s21 }
  0xa1   : > { %s355_s20 = scalar_lea.vmem [#allocation11], %s10429_s24  ;;  %s352_s1 = scalar_lea.sflag [#allocation12], %s7637_s29 }
  0xa2   : > { %s363_s16 = sshll.u32 %s355_s20, 4  ;;  %s6627_s3 = scalar_lea.hbm %s7690_s0, 8192  ;;  %s7692_s16 = int_to_ptr.vmem [resolvable:$true] %s363_s16 }
  0xa3   : > { %p6628_p0 = scmp.ne.s32.totalorder %s7690_s0, %s6627_s3  ;;  %s6632_s22 = scalar_lea.hbm %s10271_s8, 16384 }
  0xa4   : > { %p6633_p8 = scmp.lt.u32.totalorder %s7690_s0, %s10271_s8  ;;  %p6634_p3 = scmp.lt.u32.totalorder %s6632_s22, %s6627_s3 }
  0xa5   : > { %p6630_p6 = pnand %p6628_p0, %p6599_p9  ;;  %p6636_p7 = scmp.lt.u32.totalorder %s6627_s3, %s7690_s0 }
  0xa6   : > { %p6635_p5 = por %p6634_p3, %p6633_p8 }
  0xa7   : > { %p6631_p4 = pneg %p6630_p6 }
  0xa8   : > { %p6637_p12 = por %p6636_p7, %p6635_p5 }
  0xaa   : > { %p6638_p1 = pnand %p6637_p12, %p6631_p4 }
  0xac   : > { %6641 = shalt.err (!%p6638_p1)
}
  0xad   : > { %s6642_s21 = scalar_lea.vmem %s7692_s16, 8192  ;;  %s7400_s24 = smov [#allocation11]  }
  0xae   : > { %p6643_p2 = scmp.ne.s32.totalorder %s7692_s16, %s6642_s21  ;;  %s6647_s20 = sshll.u32 %s7400_s24, 4  ;;  %s6648_s20 = int_to_ptr.vmem [resolvable:$false] %s6647_s20 }
  0xaf   : > { %s6649_s18 = scalar_lea.vmem %s6648_s20, 16384  ;;  %p6650_p6 = scmp.lt.s32.totalorder %s7692_s16, %s6648_s20 }
  0xb0   : > { %p6645_p13 = pnand %p6643_p2, %p6599_p9  ;;  %p6651_p8 = scmp.lt.s32.totalorder %s6649_s18, %s6642_s21 }
  0xb2   : > { %p6646_p0 = pneg %p6645_p13  ;;  %p6652_p3 = por %p6651_p8, %p6650_p6 }
  0xb4   : > { %p6653_p5 = pnand %p6652_p3, %p6646_p0 }
  0xb6   : > { %6656 = shalt.err (!%p6653_p5)
}
  0xb7   : > { %s7401_s3 = smov 512   ;;  %s7402_s23 = smov 32  }
  0xb8   : > { %5521 = dma.hbm_to_vmem [thread:$0]  (!%p7648_p11), %s7690_s0, 8192, %s7692_s16, %s352_s1, %s7401_s3, %s7401_s3, %s7402_s23  }
  0xb9   : > { %p10430_p9 = scmp.ne.s32.totalorder %s10419_s17, 0 }
  0xbb   : > { %375 = sbr.rel (%p10430_p9) target bundleno = 5777 (0x1691), region = 56 }
  0xc2   : > { %s7723_s26 = sand.u32 1, %s7055_s10   ;;  %p10431_p4 = scmp.ne.s32.totalorder %s10416_s15, 0 }
  0xc3   : > { %s5004_s19 = sshll.u32 %s7723_s26, 4  ;;  %s378_s22 = scalar_lea.sflag [#allocation3], %s7723_s26 }
  0xc4   : > { %s381_s30 = scalar_lea.vmem [#allocation2], %s5004_s19 }
  0xc5   : > { %7030 = dma.done.wait (%p10431_p4), %s378_s22, 256  }
  0xc6   : > { %7032 = vsyncadd (%p10431_p4), %s378_s22, 4294967040  ;;  %p10432_p11 = scmp.eq.s32.totalorder %s7484_s13, 0 }
  0xc8   : > { %7034 = dma.done.wait (%p10432_p11), [#allocation6], 1024   ;;  %p10433_p7 = pmov %p10432_p11 }
  0xca   : > { %7036 = vsyncadd (%p10433_p7), [#allocation6], 4294966272  ;;  %p10434_p12 = pmov %p10433_p7 }
  0xcb   : > { %p10435_p1 = pmov %p10433_p7 }
  0xcc   : > { %7038 = dma.done.wait (%p10434_p12), [#allocation9], 1024  }
  0xcd   : > { %7040 = vsyncadd (%p10435_p1), [#allocation9], 4294966272  ;;  %s5009_s0 = sshll.u32 %s7723_s26, 9  ;;  %s403_s1 = scalar_lea.sflag [#allocation12], %s7723_s26 }
  0xce   : > { %s7743_s17 = scalar_lea.vmem [#allocation11], %s5009_s0 }
  0xcf   : > { %7042 = dma.done.wait (%p10431_p4), %s403_s1, 8192  }
  0xd0   : > { %7044 = vsyncadd (%p10431_p4), %s403_s1, 4294959104  ;;  %v10280_v0 = vmov 0.0   ;;  %vm7404_vm0 = vmmov 0   ;;  %v7752_v1 = vld [vmem:[%s381_s30] sm:$0xff]  ;;  %v454_v3 = vld [vmem:[#allocation5 + $0x8] sm:$0xff]  ;;  %vm622_vm1 = vcmask 1043456   ;;  %v589_v46 = vlaneseq }
  0xd1   : > { %5184 = vmatprep.subr.bf16.mxu0 %v10280_v0  ;;  %5188 = vmatprep.mubr.msk.bf16.mxu0 %vm7404_vm0, %v10280_v0  ;;  %10436 = vst [vmem:[#allocation21_spill] sm:$0xff] %v7752_v1  ;;  %v453_v2 = vld [vmem:[#allocation5] sm:$0xff]  ;;  %v455_v4 = vld [vmem:[#allocation5 + $0x10] sm:$0xff]  ;;  %v456_v5 = vld [vmem:[#allocation5 + $0x18] sm:$0xff]  ;;  %v10282_v19 = vmov 0   ;;  %vm466_vm2 = vcmask 261120  }
  0xd2   : > { %511 = vxpose.xlu0.b32.start.end [1/1] (short) (narrow) %v7752_v1, 32  ;;  %v457_v6 = vpack.c.bf16 %v454_v3, %v453_v2  ;;  %v580_v7 = vld [vmem:[#allocation7 + $0x8] sm:$0xff]  ;;  %v582_v8 = vld [vmem:[#allocation7 + $0x18] sm:$0xff]  ;;  %v579_v9 = vld [vmem:[#allocation7] sm:$0xff]  ;;  %v458_v14 = vpack.c.bf16 %v456_v5, %v455_v4  ;;  %667 = vmatprep.mubr.bf16.mxu1 %v10282_v19  ;;  %vm609_vm3 = vcmask 64512   ;;  %v590_v47 = vshrl.u32 %v589_v46, 7 }
  0xd3   : > { %v584_v10 = vpack.c.bf16 %v580_v7, %v580_v7  ;;  %v583_v11 = vpack.c.bf16 %v579_v9, %v579_v9  ;;  %v581_v12 = vld [vmem:[#allocation7 + $0x10] sm:$0xff]  ;;  %v7755_v13 = vld [vmem:[%s381_s30 + $0x8] sm:$0xff]  ;;  %v586_v15 = vpack.c.bf16 %v582_v8, %v582_v8  ;;  %v5011_v29 = vld [vmem:[%s10265_s2] ss:$0 sm:$0xff]  ;;  %s8022_s25 = scalar_lea.vmem [#allocation13], %s5004_s19  ;;  %s8136_s21 = smov 0  }
  0xd4   : > { %10437 = vst [vmem:[#allocation22_spill] sm:$0xff] %v7755_v13  ;;  %5185 = vmatpush3.bf16.msra.mxu0 %v457_v6  ;;  %v585_v17 = vpack.c.bf16 %v581_v12, %v581_v12  ;;  %v452_v18 = vpack.c.bf16 %v7755_v13, %v7752_v1  ;;  %v7790_v40 = vld [vmem:[%s7743_s17 + $0x8] sm:$0xff]   ;;  %v7796_v42 = vld [vmem:[%s7743_s17 + $0x18] sm:$0xff]   ;;  %v591_v48 = vsub.s32 0, %v590_v47  ;;  %v599_v49 = vsub.s32 2, %v590_v47 }
  0xd5   : > { %5186 = vmatprep.subr.bf16.mxu0 %v10280_v0  ;;  %5013 = vmatprep.subr.msk.bf16.mxu1 %vm622_vm1, %v584_v10  ;;  %v624_v16 = vsel %vm622_vm1, %v583_v11, 0  ;;  %v7793_v41 = vld [vmem:[%s7743_s17 + $0x28] sm:$0xff]   ;;  %v7801_v44 = vld [vmem:[%s7743_s17 + $0x38] sm:$0xff]   ;;  %v587_v50 = vld [vmem:[%s10267_s4] sm:$0xf]  ;;  %v595_v51 = vsub.s32 1, %v590_v47 }
  0xd6   : > { %636 = vmatpush1.bf16.msra.mxu1 %v624_v16  ;;  %v630_v20 = vsel %vm622_vm1, %v585_v17, 0  ;;  %v862_v43 = vpack.c.bf16 %v7793_v41, %v7790_v40  ;;  %v864_v45 = vpack.c.bf16 %v7801_v44, %v7796_v42  ;;  %v603_v52 = vsub.s32 3, %v590_v47 }
  0xd7   : > { %v7808_v53 = vrot.slane %v587_v50, %v591_v48  ;;  %v7810_v54 = vrot.slane %v587_v50, %v599_v49  ;;  %v7812_v55 = vrot.slane %v587_v50, %v595_v51 }
  0xd8   : > { %5187 = vmatpush3.bf16.msra.mxu0 %v458_v14  ;;  %v7814_v56 = vrot.slane %v587_v50, %v603_v52 }
  0xd9   : > { %5018 = vmatprep.subr.msk.bf16.mxu0 %vm622_vm1, %v586_v15 }
  0xdb   : > { %5189 = vmatmul.mubr.msk.bf16.vlgmr.msra.gmra.mrb[0].mxu0 %vm466_vm2, %v452_v18 }
  0xdc   : > { %709 = vmatpush1.bf16.msra.mxu0 %v630_v20  ;;  %740 = vmatprep.mubr.bf16.mxu0 %v10282_v19 }
  0xdf   : > { %543 = vxpose.xlu0.b32.start.end [1/1] (short) (narrow) %v7755_v13, 32 }
 0x152   : > { %v527_v21 = vpop.trf.xlu0 }
 0x156   : > { %v528_v22 = vpop.trf.xlu0 }
 0x157   : > { %v575_v23 = vpack.c.bf16 %v528_v22, %v527_v21 }
 0x159   : > { %5014 = vmatmul.mubr.msk.bf16.vlgmr.msra.gmra.mrb[0].mxu1 %vm609_vm3, %v575_v23  ;;  %5019 = vmatmul.mubr.msk.bf16.vlgmr.msra.gmra.mrb[4].mxu0 %vm609_vm3, %v575_v23 }
 0x15a   : > { %v529_v24 = vpop.trf.xlu0  ;;  %677 = vmatprep.mubr.bf16.mxu1 %v10282_v19  ;;  %750 = vmatprep.mubr.bf16.mxu0 %v10282_v19 }
 0x15e   : > { %v530_v25 = vpop.trf.xlu0 }
 0x15f   : > { %v576_v26 = vpack.c.bf16 %v530_v25, %v529_v24 }
 0x161   : > { %5015 = vmatmul.mubr.msk.bf16.gmra.mrb[4].mxu1 %vm609_vm3, %v576_v26  ;;  %5020 = vmatmul.mubr.msk.bf16.gmra.mrb[8].mxu0 %vm609_vm3, %v576_v26 }
 0x162   : > { %687 = vmatprep.mubr.bf16.mxu1 %v10282_v19  ;;  %760 = vmatprep.mubr.bf16.mxu0 %v10282_v19  ;;  %v559_v27 = vpop.trf.xlu0 }
 0x166   : > { %v560_v28 = vpop.trf.xlu0 }
 0x167   : > { %v577_v30 = vpack.c.bf16 %v560_v28, %v559_v27 }
 0x169   : > { %5016 = vmatmul.mubr.msk.bf16.gmra.mrb[8].mxu1 %vm609_vm3, %v577_v30  ;;  %5021 = vmatmul.mubr.msk.bf16.gmra.mrb[12].mxu0 %vm609_vm3, %v577_v30 }
 0x16a   : > { %v561_v34 = vpop.trf.xlu0  ;;  %697 = vmatprep.mubr.bf16.mxu1 %v10282_v19  ;;  %770 = vmatprep.mubr.bf16.mxu0 %v10282_v19 }
 0x16e   : > { %v562_v38 = vpop.trf.xlu0 }
 0x16f   : > { %v578_v39 = vpack.c.bf16 %v562_v38, %v561_v34 }
 0x171   : > { %5017 = vmatmul.mubr.msk.bf16.gmra.mrb[12].mxu1 %vm609_vm3, %v578_v39  ;;  %5022 = vmatmul.mubr.msk.bf16.gmra.mrb[16].mxu0 %vm609_vm3, %v578_v39 }
 0x172   : > { %909 = vmatprep.mubr.bf16.mxu1 %v862_v43  ;;  %974 = vmatprep.mubr.bf16.mxu0 %v864_v45 }
 0x1ae   : > { %v504_v31 = vpop.f32.mrb[0].mxu0 }
 0x1af   : > { %v7781_v32 = vadd.f32 %v5011_v29, %v504_v31  ;;  %v5190_v33 = vpop.f32.mrb[1].mxu0 }
 0x1b0   : > { %v507_v35 = vpop.f32.mrb[2].mxu0 }
 0x1b1   : > { %10438 = vst [vmem:[#allocation23_spill] sm:$0xff] %v7781_v32  ;;  %v7785_v36 = vadd.f32 %v5011_v29, %v507_v35  ;;  %v5191_v37 = vpop.f32.mrb[3].mxu0 }
 0x1b3   : > { %10439 = vst [vmem:[#allocation24_spill] sm:$0xff] %v7785_v36 }
 0x22c   : > { %v669_v57 = vpop.f32.mrb[0].mxu1  ;;  %v742_v58 = vpop.f32.mrb[4].mxu0 }
 0x22d   : > { %v670_v59 = vadd.f32 %v669_v57, %v7808_v53  ;;  %v743_v60 = vadd.f32 %v742_v58, %v7810_v54  ;;  %v671_v61 = vpop.f32.mrb[1].mxu1  ;;  %v744_v62 = vpop.f32.mrb[5].mxu0 }
 0x22e   : > { %v672_v63 = vadd.f32 %v671_v61, %v7812_v55  ;;  %v745_v2 = vadd.f32 %v744_v62, %v7814_v56  ;;  %v673_v3 = vpop.f32.mrb[2].mxu1  ;;  %v746_v4 = vpop.f32.mrb[6].mxu0 }
 0x22f   : > { %v674_v5 = vadd.f32 %v673_v3, %v7808_v53  ;;  %v747_v6 = vadd.f32 %v746_v4, %v7810_v54  ;;  %v675_v7 = vpop.f32.mrb[3].mxu1  ;;  %v748_v8 = vpop.f32.mrb[7].mxu0  ;;  %v781_v11 = vmax.f32 %v670_v59, 0.0  ;;  %v783_v12 = vmax.f32 %v743_v60, 0.0  ;;  %v7863_v3 = vld [vmem:[%s7743_s17 + $0x10] sm:$0xff]  }
 0x230   : > { %v676_v9 = vadd.f32 %v675_v7, %v7812_v55  ;;  %v749_v10 = vadd.f32 %v748_v8, %v7814_v56  ;;  %v782_v16 = vmax.f32 %v672_v63, 0.0  ;;  %v784_v17 = vmax.f32 %v745_v2, 0.0  ;;  %v7855_v63 = vld [vmem:[%s7743_s17] sm:$0xff]   ;;  %v7866_v4 = vld [vmem:[%s7743_s17 + $0x30] sm:$0xff]   ;;  %v7876_v7 = vld [vmem:[%s7743_s17 + $0x58] sm:$0xff]  }
 0x231   : > { %v785_v14 = vmax.f32 %v674_v5, 0.0  ;;  %v787_v15 = vmax.f32 %v747_v6, 0.0  ;;  %v7860_v2 = vld [vmem:[%s7743_s17 + $0x20] sm:$0xff]   ;;  %v7870_v5 = vld [vmem:[%s7743_s17 + $0x48] sm:$0xff]   ;;  %v7879_v8 = vld [vmem:[%s7743_s17 + $0x78] sm:$0xff]  }
 0x232   : > { %v786_v18 = vmax.f32 %v676_v9, 0.0  ;;  %v788_v20 = vmax.f32 %v749_v10, 0.0  ;;  %v7873_v6 = vld [vmem:[%s7743_s17 + $0x68] sm:$0xff]   ;;  %v861_v9 = vpack.c.bf16 %v7860_v2, %v7855_v63  ;;  %v863_v10 = vpack.c.bf16 %v7866_v4, %v7863_v3 }
 0x233   : > { %v7824_v21 = vpack.c.bf16 %v785_v14, %v781_v11  ;;  %v7826_v22 = vpack.c.bf16 %v787_v15, %v783_v12  ;;  %v866_v11 = vpack.c.bf16 %v7873_v6, %v7870_v5  ;;  %v868_v12 = vpack.c.bf16 %v7879_v8, %v7876_v7  ;;  %v7890_v14 = vld [vmem:[%s7743_s17 + $0x40] sm:$0xff]   ;;  %10456 = vst [vmem:[#allocation41_spill] sm:$0xff] %v7873_v6 }
 0x234   : > { %v7828_v23 = vpack.c.bf16 %v786_v18, %v782_v16  ;;  %v7830_v24 = vpack.c.bf16 %v788_v20, %v784_v17  ;;  %v679_v25 = vpop.f32.mrb[4].mxu1  ;;  %v752_v26 = vpop.f32.mrb[8].mxu0  ;;  %v7894_v15 = vld [vmem:[%s7743_s17 + $0x60] sm:$0xff]   ;;  %v7897_v16 = vld [vmem:[%s7743_s17 + $0x50] sm:$0xff]   ;;  %v7904_v18 = vld [vmem:[%s7743_s17 + $0x88] sm:$0xff]  }
 0x235   : > { %10440 = vst [vmem:[#allocation25_spill] sm:$0xff] %v7824_v21  ;;  %10441 = vst [vmem:[#allocation26_spill] sm:$0xff] %v7826_v22  ;;  %v680_v27 = vadd.f32 %v679_v25, %v7808_v53  ;;  %v753_v28 = vadd.f32 %v752_v26, %v7810_v54  ;;  %v681_v29 = vpop.f32.mrb[5].mxu1  ;;  %v754_v30 = vpop.f32.mrb[9].mxu0  ;;  %v7900_v17 = vld [vmem:[%s7743_s17 + $0x70] sm:$0xff]   ;;  %v7907_v20 = vld [vmem:[%s7743_s17 + $0xa8] sm:$0xff]  }
 0x236   : > { %10442 = vst [vmem:[#allocation27_spill] sm:$0xff] %v7828_v23  ;;  %10443 = vst [vmem:[#allocation28_spill] sm:$0xff] %v7830_v24  ;;  %v682_v31 = vadd.f32 %v681_v29, %v7812_v55  ;;  %v755_v33 = vadd.f32 %v754_v30, %v7814_v56  ;;  %v683_v34 = vpop.f32.mrb[6].mxu1  ;;  %v756_v35 = vpop.f32.mrb[10].mxu0  ;;  %877 = vmatprep.subr.bf16.mxu1 %v7828_v23  ;;  %942 = vmatprep.subr.bf16.mxu0 %v7830_v24  ;;  %v7910_v25 = vld [vmem:[%s7743_s17 + $0x98] sm:$0xff]  }
 0x237   : > { %v684_v37 = vadd.f32 %v683_v34, %v7808_v53  ;;  %v757_v38 = vadd.f32 %v756_v35, %v7810_v54  ;;  %v685_v39 = vpop.f32.mrb[7].mxu1  ;;  %878 = vmatpush1.bf16.xpose.msra.mxu1 %v7824_v21  ;;  %v758_v43 = vpop.f32.mrb[11].mxu0  ;;  %943 = vmatpush1.bf16.xpose.msra.mxu0 %v7826_v22  ;;  %v789_v47 = vmax.f32 %v680_v27, 0.0  ;;  %v791_v48 = vmax.f32 %v753_v28, 0.0  ;;  %v7913_v26 = vld [vmem:[%s7743_s17 + $0xb8] sm:$0xff]   ;;  %v7931_v34 = vld [vmem:[%s7743_s17 + $0x90] sm:$0xff]  }
 0x238   : > { %v686_v45 = vadd.f32 %v685_v39, %v7812_v55  ;;  %v759_v46 = vadd.f32 %v758_v43, %v7814_v56  ;;  %v790_v51 = vmax.f32 %v682_v31, 0.0  ;;  %v792_v52 = vmax.f32 %v755_v33, 0.0  ;;  %v7924_v31 = vld [vmem:[%s7743_s17 + $0x80] sm:$0xff]   ;;  %v7934_v35 = vld [vmem:[%s7743_s17 + $0xb0] sm:$0xff]  }
 0x239   : > { %v793_v49 = vmax.f32 %v684_v37, 0.0  ;;  %v795_v50 = vmax.f32 %v757_v38, 0.0  ;;  %v865_v27 = vpack.c.bf16 %v7894_v15, %v7890_v14  ;;  %v867_v28 = vpack.c.bf16 %v7900_v17, %v7897_v16  ;;  %v7928_v33 = vld [vmem:[%s7743_s17 + $0xa0] sm:$0xff]   ;;  %v7937_v37 = vld [vmem:[%s7743_s17 + $0xc8] sm:$0xff]  }
 0x23a   : > { %v794_v57 = vmax.f32 %v686_v45, 0.0  ;;  %v796_v58 = vmax.f32 %v759_v46, 0.0  ;;  %v870_v29 = vpack.c.bf16 %v7907_v20, %v7904_v18  ;;  %v872_v30 = vpack.c.bf16 %v7913_v26, %v7910_v25  ;;  %v7940_v38 = vld [vmem:[%s7743_s17 + $0xe8] sm:$0xff]   ;;  %v7949_v46 = vld [vmem:[%s7743_s17 + $0xc0] sm:$0xff]  }
 0x23b   : > { %v7844_v59 = vpack.c.bf16 %v793_v49, %v789_v47  ;;  %v7846_v60 = vpack.c.bf16 %v795_v50, %v791_v48  ;;  %v869_v39 = vpack.c.bf16 %v7928_v33, %v7924_v31  ;;  %v871_v43 = vpack.c.bf16 %v7934_v35, %v7931_v34  ;;  %v7952_v47 = vld [vmem:[%s7743_s17 + $0xe0] sm:$0xff]   ;;  %v7955_v48 = vld [vmem:[%s7743_s17 + $0xd8] sm:$0xff]  }
 0x23c   : > { %v7848_v61 = vpack.c.bf16 %v794_v57, %v790_v51  ;;  %v7850_v62 = vpack.c.bf16 %v796_v58, %v792_v52  ;;  %v874_v45 = vpack.c.bf16 %v7940_v38, %v7937_v37  ;;  %v7958_v49 = vld [vmem:[%s7743_s17 + $0xf8] sm:$0xff]   ;;  %v873_v50 = vpack.c.bf16 %v7952_v47, %v7949_v46  ;;  %v7965_v52 = vld [vmem:[%s7743_s17 + $0xd0] sm:$0xff]  }
 0x23d   : > { %10444 = vst [vmem:[#allocation29_spill] sm:$0xff] %v7844_v59  ;;  %10445 = vst [vmem:[#allocation30_spill] sm:$0xff] %v7846_v60  ;;  %v876_v51 = vpack.c.bf16 %v7958_v49, %v7955_v48  ;;  %v7968_v57 = vld [vmem:[%s7743_s17 + $0xf0] sm:$0xff]  }
 0x23e   : > { %10446 = vst [vmem:[#allocation31_spill] sm:$0xff] %v7848_v61  ;;  %10447 = vst [vmem:[#allocation32_spill] sm:$0xff] %v7850_v62  ;;  %879 = vmatprep.subr.bf16.mxu1 %v7848_v61  ;;  %944 = vmatprep.subr.bf16.mxu0 %v7850_v62  ;;  %v875_v58 = vpack.c.bf16 %v7968_v57, %v7965_v52 }
 0x23f   : > { %880 = vmatpush1.bf16.xpose.msra.mxu1 %v7844_v59  ;;  %945 = vmatpush1.bf16.xpose.msra.mxu0 %v7846_v60 }
 0x240   : > { %5296 = vmatprep.subr.bf16.mxu1 %v7830_v24 }
 0x246   : > { %910 = vmatmul.mubr.bf16.vlgmr.msra.gmra.mrb[16].mxu1 %v861_v9  ;;  %975 = vmatmul.mubr.bf16.vlgmr.msra.gmra.mrb[20].mxu0 %v863_v10  ;;  %v689_v9 = vpop.f32.mrb[8].mxu1  ;;  %v762_v10 = vpop.f32.mrb[12].mxu0 }
 0x247   : > { %5298 = vmatpush1.bf16.xpose.msra.mxu1 %v7826_v22  ;;  %917 = vmatprep.mubr.bf16.mxu1 %v866_v11  ;;  %v690_v11 = vadd.f32 %v689_v9, %v7808_v53 }
 0x248   : > { %5297 = vmatprep.subr.bf16.mxu1 %v7850_v62  ;;  %982 = vmatprep.mubr.bf16.mxu0 %v868_v12  ;;  %v763_v12 = vadd.f32 %v762_v10, %v7810_v54 }
 0x24e   : > { %918 = vmatmul.mubr.bf16.gmra.mrb[20].mxu1 %v865_v27  ;;  %983 = vmatmul.mubr.bf16.gmra.mrb[24].mxu0 %v867_v28  ;;  %v691_v27 = vpop.f32.mrb[9].mxu1  ;;  %v764_v28 = vpop.f32.mrb[13].mxu0 }
 0x24f   : > { %5299 = vmatpush1.bf16.xpose.msra.mxu1 %v7846_v60  ;;  %925 = vmatprep.mubr.bf16.mxu1 %v870_v29  ;;  %v692_v29 = vadd.f32 %v691_v27, %v7812_v55 }
 0x250   : > { %990 = vmatprep.mubr.bf16.mxu0 %v872_v30  ;;  %v765_v30 = vadd.f32 %v764_v28, %v7814_v56 }
 0x251   : > { %v798_v36 = vmax.f32 %v692_v29, 0.0 }
 0x252   : > { %v800_v9 = vmax.f32 %v765_v30, 0.0 }
 0x256   : > { %926 = vmatmul.mubr.bf16.gmra.mrb[24].mxu1 %v869_v39  ;;  %991 = vmatmul.mubr.bf16.gmra.mrb[28].mxu0 %v871_v43  ;;  %v693_v39 = vpop.f32.mrb[10].mxu1  ;;  %v766_v43 = vpop.f32.mrb[14].mxu0 }
 0x257   : > { %933 = vmatprep.mubr.bf16.mxu1 %v874_v45  ;;  %v797_v45 = vmax.f32 %v690_v11, 0.0  ;;  %v695_v0 = vpop.f32.mrb[11].mxu1  ;;  %v768_v19 = vpop.f32.mrb[15].mxu0 }
 0x258   : > { %v696_v10 = vadd.f32 %v695_v0, %v7812_v55  ;;  %v769_v32 = vadd.f32 %v768_v19, %v7814_v56  ;;  %v772_v62 = vpop.f32.mrb[16].mxu0 }
 0x259   : > { %v773_v0 = vadd.f32 %v772_v62, %v7810_v54  ;;  %v774_v19 = vpop.f32.mrb[17].mxu0 }
 0x25a   : > { %v802_v1 = vmax.f32 %v696_v10, 0.0  ;;  %v804_v28 = vmax.f32 %v769_v32, 0.0  ;;  %v775_v32 = vadd.f32 %v774_v19, %v7814_v56 }
 0x25e   : > { %934 = vmatmul.mubr.bf16.gmra.mrb[28].mxu1 %v873_v50  ;;  %v799_v50 = vmax.f32 %v763_v12, 0.0  ;;  %v7984_v12 = vpack.c.bf16 %v802_v1, %v798_v36 }
 0x25f   : > { %998 = vmatprep.mubr.bf16.mxu1 %v876_v51  ;;  %v694_v51 = vadd.f32 %v693_v39, %v7808_v53  ;;  %v7986_v39 = vpack.c.bf16 %v804_v28, %v800_v9  ;;  %v808_v28 = vmax.f32 %v775_v32, 0.0 }
 0x260   : > { %10450 = vst [vmem:[#allocation35_spill] sm:$0xff] %v7984_v12 }
 0x261   : > { %v801_v13 = vmax.f32 %v694_v51, 0.0  ;;  %10451 = vst [vmem:[#allocation36_spill] sm:$0xff] %v7986_v39 }
 0x263   : > { %v7980_v60 = vpack.c.bf16 %v801_v13, %v797_v45  ;;  %v776_v45 = vpop.f32.mrb[18].mxu0 }
 0x264   : > { %v777_v36 = vadd.f32 %v776_v45, %v7810_v54  ;;  %v778_v10 = vpop.f32.mrb[19].mxu0 }
 0x265   : > { %10448 = vst [vmem:[#allocation33_spill] sm:$0xff] %v7980_v60 }
 0x26a   : > { %999 = vmatmul.mubr.bf16.vlgmr.msra.gmra.mrb[28].mxu1 %v875_v58  ;;  %v767_v58 = vadd.f32 %v766_v43, %v7810_v54  ;;  %v699_v43 = vpop.f32.mrb[12].mxu1 }
 0x26b   : > { %v700_v29 = vadd.f32 %v699_v43, %v7808_v53  ;;  %v701_v30 = vpop.f32.mrb[13].mxu1  ;;  %v779_v43 = vadd.f32 %v778_v10, %v7814_v56 }
 0x26c   : > { %v803_v27 = vmax.f32 %v767_v58, 0.0  ;;  %v702_v51 = vadd.f32 %v701_v30, %v7812_v55  ;;  %v703_v13 = vpop.f32.mrb[14].mxu1  ;;  %v807_v58 = vmax.f32 %v773_v0, 0.0  ;;  %v811_v30 = vmax.f32 %v777_v36, 0.0 }
 0x26d   : > { %v704_v1 = vadd.f32 %v703_v13, %v7808_v53  ;;  %v705_v9 = vpop.f32.mrb[15].mxu1  ;;  %v812_v19 = vmax.f32 %v779_v43, 0.0 }
 0x26e   : > { %v7982_v11 = vpack.c.bf16 %v803_v27, %v799_v50  ;;  %v805_v50 = vmax.f32 %v700_v29, 0.0  ;;  %v806_v27 = vmax.f32 %v702_v51, 0.0  ;;  %v706_v62 = vadd.f32 %v705_v9, %v7812_v55 }
 0x26f   : > { %v7998_v29 = vpack.c.bf16 %v811_v30, %v807_v58  ;;  %v8002_v53 = vpack.c.bf16 %v812_v19, %v808_v28 }
 0x270   : > { %10449 = vst [vmem:[#allocation34_spill] sm:$0xff] %v7982_v11  ;;  %v809_v11 = vmax.f32 %v704_v1, 0.0  ;;  %v810_v39 = vmax.f32 %v706_v62, 0.0 }
 0x271   : > { %10453 = vst [vmem:[#allocation38_spill] sm:$0xff] %v7998_v29  ;;  %10455 = vst [vmem:[#allocation40_spill] sm:$0xff] %v8002_v53 }
 0x272   : > { %v7996_v60 = vpack.c.bf16 %v809_v11, %v805_v50  ;;  %v8000_v0 = vpack.c.bf16 %v810_v39, %v806_v27 }
 0x274   : > { %10452 = vst [vmem:[#allocation37_spill] sm:$0xff] %v7996_v60  ;;  %10454 = vst [vmem:[#allocation39_spill] sm:$0xff] %v8000_v0 }
 0x319   : > { %v911_v54 = vpop.f32.mrb[16].mxu1  ;;  %v976_v13 = vpop.f32.mrb[20].mxu0 }
 0x31a   : > { %v977_v51 = vadd.f32 %v976_v13, %v911_v54  ;;  %v913_v32 = vpop.f32.mrb[17].mxu1  ;;  %v978_v45 = vpop.f32.mrb[21].mxu0 }
 0x31b   : > { %v914_v55 = vpop.f32.mrb[18].mxu1  ;;  %v979_v9 = vpop.f32.mrb[22].mxu0 }
 0x31c   : > { %v980_v56 = vadd.f32 %v979_v9, %v914_v55  ;;  %v916_v1 = vpop.f32.mrb[19].mxu1  ;;  %v981_v36 = vpop.f32.mrb[23].mxu0  ;;  %v1007_v55 = vsel %vm466_vm2, %v977_v51, -inf }
 0x321   : > { %v919_v10 = vpop.f32.mrb[20].mxu1  ;;  %v984_v62 = vpop.f32.mrb[24].mxu0 }
 0x322   : > { %v985_v11 = vadd.f32 %v984_v62, %v919_v10  ;;  %v921_v50 = vpop.f32.mrb[21].mxu1  ;;  %v986_v58 = vpop.f32.mrb[25].mxu0 }
 0x323   : > { %v922_v43 = vpop.f32.mrb[22].mxu1  ;;  %v987_v39 = vpop.f32.mrb[26].mxu0  ;;  %v1008_v50 = vsel %vm466_vm2, %v980_v56, -inf }
 0x324   : > { %v988_v27 = vadd.f32 %v987_v39, %v922_v43  ;;  %v924_v28 = vpop.f32.mrb[23].mxu1  ;;  %v989_v30 = vpop.f32.mrb[27].mxu0 }
 0x326   : > { %v1010_v60 = vsel %vm466_vm2, %v988_v27, -inf }
 0x329   : > { %v927_v19 = vpop.f32.mrb[24].mxu1  ;;  %v992_v29 = vpop.f32.mrb[28].mxu0 }
 0x32a   : > { %v993_v54 = vadd.f32 %v992_v29, %v927_v19  ;;  %v929_v13 = vpop.f32.mrb[25].mxu1  ;;  %v994_v32 = vpop.f32.mrb[29].mxu0  ;;  %v1009_v29 = vsel %vm466_vm2, %v985_v11, -inf }
 0x32b   : > { %v930_v45 = vpop.f32.mrb[26].mxu1  ;;  %v995_v53 = vpop.f32.mrb[30].mxu0 }
 0x32c   : > { %v1011_v9 = vsel %vm466_vm2, %v993_v54, -inf  ;;  %v996_v1 = vadd.f32 %v995_v53, %v930_v45  ;;  %v932_v36 = vpop.f32.mrb[27].mxu1  ;;  %v997_v10 = vpop.f32.mrb[31].mxu0 }
 0x32d   : > { %v1012_v62 = vmax.f32 %v1007_v55, %v1011_v9 }
 0x32e   : > { %v1013_v58 = vsel %vm466_vm2, %v996_v1, -inf }
 0x32f   : > { %v1014_v43 = vmax.f32 %v1008_v50, %v1013_v58 }
 0x331   : > { %v1019_v39 = vmax.f32 %v1012_v62, %v1014_v43 }
 0x33d   : > { %v1000_v28 = vpop.f32.mrb[28].mxu1 }
 0x33e   : > { %v1015_v30 = vsel %vm466_vm2, %v1000_v28, -inf  ;;  %v1002_v19 = vpop.f32.mrb[29].mxu1 }
 0x33f   : > { %v1016_v13 = vmax.f32 %v1009_v29, %v1015_v30  ;;  %v1003_v32 = vpop.f32.mrb[30].mxu1 }
 0x340   : > { %v1017_v53 = vsel %vm466_vm2, %v1003_v32, -inf  ;;  %v1005_v45 = vpop.f32.mrb[31].mxu1 }
 0x341   : > { %v1018_v55 = vmax.f32 %v1010_v60, %v1017_v53 }
 0x343   : > { %v1020_v9 = vmax.f32 %v1016_v13, %v1018_v55 }
 0x345   : > { %v1021_v36 = vmax.f32 %v1019_v39, %v1020_v9 }
 0x347   : > { %v1022_v10 = vrot.slane %v1021_v36, 4 }
 0x349   : > { %v1023_v0 = vmax.f32 %v1021_v36, %v1022_v10 }
 0x34b   : > { %v1024_v50 = vrot.slane %v1023_v0, 2 }
 0x34d   : > { %v1025_v62 = vmax.f32 %v1023_v0, %v1024_v50 }
 0x34f   : > { %v1026_v58 = vrot.slane %v1025_v62, 1 }
 0x351   : > { %v1027_v43 = vmax.f32 %v1025_v62, %v1026_v58 }
 0x353   : > { %v1028_v12 = vsub.f32 %v977_v51, %v1027_v43  ;;  %v1029_v22 = vsub.f32 %v980_v56, %v1027_v43  ;;  %v1030_v24 = vsub.f32 %v985_v11, %v1027_v43  ;;  %v1031_v19 = vsub.f32 %v988_v27, %v1027_v43 }
 0x354   : > { %v1032_v29 = vsub.f32 %v993_v54, %v1027_v43  ;;  %v1033_v30 = vsub.f32 %v996_v1, %v1027_v43  ;;  %v1034_v59 = vsub.f32 %v1000_v28, %v1027_v43  ;;  %v1035_v61 = vsub.f32 %v1003_v32, %v1027_v43 }
 0x355   : > { %v1036_v21 = vmul.f32 1.442695, %v1028_v12  ;;  %v1038_v23 = vmul.f32 1.442695, %v1029_v22  ;;  %v1040_v45 = vmul.f32 1.442695, %v1030_v24 }
 0x356   : > { %v1042_v60 = vmul.f32 1.442695, %v1031_v19  ;;  %v1044_v39 = vmul.f32 1.442695, %v1032_v29  ;;  %v1046_v0 = vmul.f32 1.442695, %v1033_v30 }
 0x357   : > { %6241 = vpow2.f32 %v1036_v21  ;;  %v1048_v13 = vmul.f32 1.442695, %v1034_v59  ;;  %v1050_v51 = vmul.f32 1.442695, %v1035_v61 }
 0x358   : > { %6243 = vpow2.f32 %v1038_v23 }
 0x359   : > { %6245 = vpow2.f32 %v1040_v45 }
 0x35a   : > { %6247 = vpow2.f32 %v1042_v60 }
 0x35b   : > { %6249 = vpow2.f32 %v1044_v39 }
 0x35c   : > { %6251 = vpow2.f32 %v1046_v0 }
 0x35d   : > { %6253 = vpow2.f32 %v1048_v13 }
 0x35e   : > { %6255 = vpow2.f32 %v1050_v51 }
 0x361   : > { %v6242_v56 = vpop.eup %6241 }
 0x362   : > { %v6244_v11 = vpop.eup %6243  ;;  %v1052_v27 = vsel %vm466_vm2, %v6242_v56, 0.0 }
 0x363   : > { %v6246_v12 = vpop.eup %6245  ;;  %v1053_v22 = vsel %vm466_vm2, %v6244_v11, 0.0 }
 0x364   : > { %v6248_v24 = vpop.eup %6247  ;;  %v1054_v21 = vadd.f32 %v1053_v22, %v1052_v27  ;;  %v1055_v23 = vsel %vm466_vm2, %v6246_v12, 0.0 }
 0x365   : > { %v6250_v54 = vpop.eup %6249  ;;  %v1057_v28 = vsel %vm466_vm2, %v6248_v24, 0.0 }
 0x366   : > { %v1056_v1 = vadd.f32 %v1055_v23, %v1054_v21  ;;  %v6252_v59 = vpop.eup %6251  ;;  %v1059_v61 = vsel %vm466_vm2, %v6250_v54, 0.0 }
 0x367   : > { %v6254_v53 = vpop.eup %6253  ;;  %v1061_v9 = vsel %vm466_vm2, %v6252_v59, 0.0 }
 0x368   : > { %v1058_v32 = vadd.f32 %v1057_v28, %v1056_v1  ;;  %v6256_v36 = vpop.eup %6255  ;;  %v1063_v50 = vsel %vm466_vm2, %v6254_v53, 0.0 }
 0x369   : > { %v1065_v58 = vsel %vm466_vm2, %v6256_v36, 0.0 }
 0x36a   : > { %v1060_v55 = vadd.f32 %v1059_v61, %v1058_v32 }
 0x36c   : > { %v1062_v10 = vadd.f32 %v1061_v9, %v1060_v55 }
 0x36e   : > { %v1064_v62 = vadd.f32 %v1063_v50, %v1062_v10 }
 0x370   : > { %v1066_v43 = vadd.f32 %v1065_v58, %v1064_v62 }
 0x372   : > { %v1067_v19 = vrot.slane %v1066_v43, 4 }
 0x374   : > { %v1068_v29 = vadd.f32 %v1067_v19, %v1066_v43 }
 0x376   : > { %v1069_v30 = vrot.slane %v1068_v29, 2 }
 0x378   : > { %v1070_v45 = vadd.f32 %v1069_v30, %v1068_v29 }
 0x37a   : > { %v1071_v60 = vrot.slane %v1070_v45, 1 }
 0x37c   : > { %v1072_v39 = vadd.f32 %v1071_v60, %v1070_v45 }
 0x37e   : > { %6257 = vrcp.f32 %v1072_v39 }
 0x388   : > { %v6258_v0 = vpop.eup %6257 }
 0x389   : > { %v1074_v13 = vmul.f32 %v6258_v0, %v6242_v56   ;;  %v1075_v51 = vmul.f32 %v6258_v0, %v6244_v11   ;;  %v1076_v27 = vmul.f32 %v6258_v0, %v6246_v12   ;;  %v1077_v22 = vmul.f32 %v6258_v0, %v6248_v24  }
 0x38a   : > { %v1078_v21 = vmul.f32 %v6258_v0, %v6250_v54   ;;  %v1079_v23 = vmul.f32 %v6258_v0, %v6252_v59   ;;  %v1080_v1 = vmul.f32 %v6258_v0, %v6254_v53   ;;  %v1081_v28 = vmul.f32 %v6258_v0, %v6256_v36  }
 0x38b LB: >> { %10458 = vst [vmem:[#allocation42_spill] sm:$0xff] %v7067_v49  ;;  %10459 = vst [vmem:[#allocation43_spill] sm:$0xff] %v7071_v57  ;;  %v10476_v6 = vld [vmem:[#allocation41_spill] sm:$0xff]  ;;  %v10478_v56 = vld [vmem:[#allocation27_spill] sm:$0xff]  ;;  %v8265_v12 = vpack.c.bf16 %v7171_v41, %v7187_v40  ;;  %v8269_v24 = vpack.c.bf16 %v7175_v2, %v7191_v63  ;;  %v8283_v32 = vpack.c.bf16 %v7143_v15, %v7159_v14  ;;  %vm1420_vm4 = vcmask 523264   ;;  %s1087_s24 = sadd.s32 1, %s7227_s21   ;;  %s7227_s21 = sphi %s8136_s21, %s10617_s21   ;;  %v7223_v13 = vphi %v1074_v13, %v10616_v13   ;;  %v7219_v51 = vphi %v1075_v51, %v10615_v51   ;;  %v7215_v27 = vphi %v1076_v27, %v10614_v27   ;;  %v7211_v22 = vphi %v1077_v22, %v10613_v22   ;;  %v7207_v21 = vphi %v1078_v21, %v10612_v21   ;;  %v7203_v23 = vphi %v1079_v23, %v10611_v23   ;;  %v7199_v1 = vphi %v1080_v1, %v10610_v1   ;;  %v7195_v28 = vphi %v1081_v28, %v10609_v28   ;;  %v7191_v63 = vphi %v7855_v63, %v10608_v63   ;;  %v7187_v40 = vphi %v7790_v40, %v10607_v40   ;;  %v7183_v3 = vphi %v7863_v3, %v10606_v3   ;;  %v7179_v42 = vphi %v7796_v42, %v10605_v42   ;;  %v7175_v2 = vphi %v7860_v2, %v10604_v2   ;;  %v7171_v41 = vphi %v7793_v41, %v10603_v41   ;;  %v7167_v4 = vphi %v7866_v4, %v10602_v4   ;;  %v7163_v44 = vphi %v7801_v44, %v10601_v44   ;;  %v7159_v14 = vphi %v7890_v14, %v10600_v14   ;;  %v7155_v5 = vphi %v7870_v5, %v10599_v5   ;;  %v7151_v16 = vphi %v7897_v16, %v10598_v16   ;;  %v7147_v7 = vphi %v7876_v7, %v10597_v7   ;;  %v7143_v15 = vphi %v7894_v15, %v10596_v15   ;;  %v7135_v17 = vphi %v7900_v17, %v10594_v17   ;;  %v7131_v8 = vphi %v7879_v8, %v10593_v8   ;;  %v7127_v31 = vphi %v7924_v31, %v10592_v31   ;;  %v7123_v18 = vphi %v7904_v18, %v10591_v18   ;;  %v7119_v34 = vphi %v7931_v34, %v10590_v34   ;;  %v7115_v25 = vphi %v7910_v25, %v10589_v25   ;;  %v7111_v33 = vphi %v7928_v33, %v10588_v33   ;;  %v7107_v20 = vphi %v7907_v20, %v10587_v20   ;;  %v7103_v35 = vphi %v7934_v35, %v10586_v35   ;;  %v7099_v26 = vphi %v7913_v26, %v10585_v26   ;;  %v7095_v46 = vphi %v7949_v46, %v10584_v46   ;;  %v7091_v37 = vphi %v7937_v37, %v10582_v37   ;;  %v7087_v52 = vphi %v7965_v52, %v10581_v52   ;;  %v7083_v48 = vphi %v7955_v48, %v10580_v48   ;;  %v7079_v47 = vphi %v7952_v47, %v10578_v47   ;;  %v7075_v38 = vphi %v7940_v38, %v10576_v38   ;;  %v7071_v57 = vphi %v7968_v57, %v10574_v57   ;;  %v7067_v49 = vphi %v7958_v49, %v10573_v49  }
 0x38c   : >> { %10460 = vst [vmem:[#allocation44_spill] sm:$0xff] %v7075_v38  ;;  %10461 = vst [vmem:[#allocation45_spill] sm:$0xff] %v7079_v47  ;;  %1144 = vmatprep.subr.bf16.mxu0 %v10478_v56  ;;  %v10479_v11 = vld [vmem:[#allocation25_spill] sm:$0xff]  ;;  %v10480_v54 = vld [vmem:[#allocation31_spill] sm:$0xff]  ;;  %v8275_v59 = vpack.c.bf16 %v10476_v6, %v7155_v5  ;;  %v8288_v53 = vpack.c.bf16 %v7107_v20, %v7123_v18  ;;  %v8296_v9 = vpack.c.bf16 %v7111_v33, %v7127_v31  ;;  %p8734_p2 = scmp.ge.s32.totalorder %s1087_s24, 6   ;;  %s10617_s21 = smov %s1087_s24 }
 0x38d   : >> { %10462 = vst [vmem:[#allocation46_spill] sm:$0xff] %v7083_v48  ;;  %10463 = vst [vmem:[#allocation47_spill] sm:$0xff] %v7087_v52  ;;  %1145 = vmatpush1.bf16.xpose.msra.mxu0 %v10479_v11  ;;  %1274 = vmatprep.subr.bf16.mxu1 %v8265_v12  ;;  %v10481_v61 = vld [vmem:[#allocation29_spill] sm:$0xff]  ;;  %v10482_v55 = vld [vmem:[#allocation28_spill] sm:$0xff]  ;;  %v8302_v10 = vpack.c.bf16 %v7075_v38, %v7091_v37  ;;  %v1408_v62 = vpack.c.bf16 %v7219_v51, %v7223_v13  ;;  %s9304_s18 = smov (%p8734_p2), 0  }
 0x38e   : >> { %10464 = vst [vmem:[#allocation48_spill] sm:$0xff] %v7091_v37  ;;  %10465 = vst [vmem:[#allocation49_spill] sm:$0xff] %v7095_v46  ;;  %1146 = vmatprep.subr.bf16.mxu0 %v10480_v54  ;;  %1306 = vmatprep.mubr.bf16.mxu1 %v8265_v12  ;;  %v10483_v36 = vld [vmem:[#allocation26_spill] sm:$0xff]  ;;  %v10484_v50 = vld [vmem:[#allocation32_spill] sm:$0xff]  ;;  %v8312_v58 = vpack.c.bf16 %v7079_v47, %v7095_v46  ;;  %v8318_v19 = vpack.c.bf16 %v7163_v44, %v7179_v42 }
 0x38f   : >> { %10466 = vst [vmem:[#allocation50_spill] sm:$0xff] %v7099_v26  ;;  %10467 = vst [vmem:[#allocation51_spill] sm:$0xff] %v7103_v35  ;;  %1275 = vmatpush1.bf16.xpose.msra.mxu1 %v8269_v24  ;;  %1176 = vmatprep.mubr.bf16.mxu0 %v8265_v12  ;;  %v10485_v43 = vld [vmem:[#allocation30_spill] sm:$0xff]  ;;  %v8325_v29 = vpack.c.bf16 %v7167_v4, %v7183_v3  ;;  %v8330_v30 = vpack.c.bf16 %v7131_v8, %v7147_v7 }
 0x390   : >> { %10468 = vst [vmem:[#allocation52_spill] sm:$0xff] %v7107_v20  ;;  %10469 = vst [vmem:[#allocation53_spill] sm:$0xff] %v7111_v33  ;;  %1276 = vmatprep.subr.bf16.mxu1 %v8275_v59  ;;  %v8339_v45 = vpack.c.bf16 %v7135_v17, %v7151_v16  ;;  %v8344_v60 = vpack.c.bf16 %v7099_v26, %v7115_v25  ;;  %v1409_v39 = vpack.c.bf16 %v7211_v22, %v7215_v27 }
 0x391   : >> { %10470 = vst [vmem:[#allocation54_spill] sm:$0xff] %v7115_v25  ;;  %10471 = vst [vmem:[#allocation55_spill] sm:$0xff] %v7119_v34  ;;  %v8355_v0 = vpack.c.bf16 %v7103_v35, %v7119_v34  ;;  %v8360_v38 = vpack.c.bf16 %v7067_v49, %v7083_v48  ;;  %v1410_v47 = vpack.c.bf16 %v7203_v23, %v7207_v21 }
 0x392   : >> { %10472 = vst [vmem:[#allocation56_spill] sm:$0xff] %v7123_v18  ;;  %10473 = vst [vmem:[#allocation57_spill] sm:$0xff] %v7127_v31  ;;  %v8371_v49 = vpack.c.bf16 %v7071_v57, %v7087_v52  ;;  %v1411_v57 = vpack.c.bf16 %v7195_v28, %v7199_v1 }
 0x393   : >> { %10474 = vst [vmem:[#allocation58_spill] sm:$0xff] %v7131_v8  ;;  %10475 = vst [vmem:[#allocation59_spill] sm:$0xff] %v7135_v17 }
 0x394   : >> { %10477 = vst [vmem:[#allocation41_spill] sm:$0xff] %v10476_v6 }
 0x395   : >> { %1147 = vmatpush1.bf16.xpose.msra.mxu0 %v10481_v61 }
 0x396   : >> { %1209 = vmatprep.subr.bf16.mxu0 %v10482_v55 }
 0x397   : >> { %1277 = vmatpush1.bf16.xpose.msra.mxu1 %v8283_v32 }
 0x398   : >> { %1278 = vmatprep.subr.bf16.mxu1 %v8288_v53 }
 0x39c   : >> { %1177 = vmatmul.mubr.bf16.vlgmr.msra.gmra.mrb[0].mxu0 %v8269_v24 }
 0x39d   : >> { %1184 = vmatprep.mubr.bf16.mxu0 %v8275_v59  ;;  %1210 = vmatpush1.bf16.xpose.msra.mxu0 %v10483_v36 }
 0x39e   : >> { %1211 = vmatprep.subr.bf16.mxu0 %v10484_v50 }
 0x39f   : >> { %1279 = vmatpush1.bf16.xpose.msra.mxu1 %v8296_v9 }
 0x3a0   : >> { %1280 = vmatprep.subr.bf16.mxu1 %v8302_v10 }
 0x3a4   : >> { %1185 = vmatmul.mubr.bf16.gmra.mrb[4].mxu0 %v8283_v32 }
 0x3a5   : >> { %1192 = vmatprep.mubr.bf16.mxu0 %v8288_v53  ;;  %1212 = vmatpush1.bf16.xpose.msra.mxu0 %v10485_v43 }
 0x3a6   : >> { %5192 = vmatprep.subr.bf16.mxu0 %v1408_v62 }
 0x3a7   : >> { %1281 = vmatpush1.bf16.xpose.msra.mxu1 %v8312_v58 }
 0x3a8   : >> { %1339 = vmatprep.subr.bf16.mxu1 %v8318_v19 }
 0x3ac   : >> { %1193 = vmatmul.mubr.bf16.gmra.mrb[8].mxu0 %v8296_v9 }
 0x3ad   : >> { %1200 = vmatprep.mubr.bf16.mxu0 %v8302_v10 }
 0x3ae   : >> { %1307 = vmatmul.mubr.bf16.vlgmr.msra.gmra.mrb[0].mxu1 %v8269_v24 }
 0x3af   : >> { %1340 = vmatpush1.bf16.xpose.msra.mxu1 %v8325_v29  ;;  %1314 = vmatprep.mubr.bf16.mxu1 %v8275_v59 }
 0x3b0   : >> { %1341 = vmatprep.subr.bf16.mxu1 %v8330_v30 }
 0x3b4   : >> { %1201 = vmatmul.mubr.bf16.gmra.mrb[12].mxu0 %v8312_v58 }
 0x3b5   : >> { %1241 = vmatprep.mubr.bf16.mxu0 %v8318_v19 }
 0x3b6   : >> { %1315 = vmatmul.mubr.bf16.gmra.mrb[4].mxu1 %v8283_v32 }
 0x3b7   : >> { %1342 = vmatpush1.bf16.xpose.msra.mxu1 %v8339_v45  ;;  %1322 = vmatprep.mubr.bf16.mxu1 %v8288_v53 }
 0x3b8   : >> { %1343 = vmatprep.subr.bf16.mxu1 %v8344_v60 }
 0x3bc   : >> { %1242 = vmatmul.mubr.bf16.vlgmr.msra.gmra.mrb[0].mxu0 %v8325_v29 }
 0x3bd   : >> { %1249 = vmatprep.mubr.bf16.mxu0 %v8330_v30  ;;  %5193 = vmatpush3.bf16.msra.mxu0 %v1408_v62 }
 0x3be   : >> { %5194 = vmatprep.subr.bf16.mxu0 %v1409_v39  ;;  %1323 = vmatmul.mubr.bf16.gmra.mrb[8].mxu1 %v8296_v9 }
 0x3bf   : >> { %1344 = vmatpush1.bf16.xpose.msra.mxu1 %v8355_v0  ;;  %1330 = vmatprep.mubr.bf16.mxu1 %v8302_v10 }
 0x3c0   : >> { %1345 = vmatprep.subr.bf16.mxu1 %v8360_v38 }
 0x3c1   : >> { %5195 = vmatpush3.bf16.msra.mxu0 %v1409_v39 }
 0x3c2   : >> { %5196 = vmatprep.subr.bf16.mxu0 %v1410_v47 }
 0x3c4   : >> { %1250 = vmatmul.mubr.bf16.gmra.mrb[4].mxu0 %v8339_v45 }
 0x3c5   : >> { %1257 = vmatprep.mubr.bf16.mxu0 %v8344_v60  ;;  %5197 = vmatpush3.bf16.msra.mxu0 %v1410_v47 }
 0x3c6   : >> { %1331 = vmatmul.mubr.bf16.gmra.mrb[12].mxu1 %v8312_v58  ;;  %5198 = vmatprep.subr.bf16.mxu0 %v1411_v57 }
 0x3c7   : >> { %1346 = vmatpush1.bf16.xpose.msra.mxu1 %v8371_v49  ;;  %1371 = vmatprep.mubr.bf16.mxu1 %v8318_v19 }
 0x3c8   : >> { %5310 = vmatprep.subr.bf16.mxu1 %v1408_v62 }
 0x3c9   : >> { %5199 = vmatpush3.bf16.msra.mxu0 %v1411_v57 }
 0x3ca   : >> { %1530 = vmatprep.subr.bf16.mxu0 %v10478_v56 }
 0x3cc   : >> { %1258 = vmatmul.mubr.bf16.gmra.mrb[8].mxu0 %v8355_v0 }
 0x3cd   : >> { %1265 = vmatprep.mubr.bf16.mxu0 %v8360_v38 }
 0x3ce   : >> { %1372 = vmatmul.mubr.bf16.vlgmr.msra.gmra.mrb[0].mxu1 %v8325_v29 }
 0x3cf   : >> { %1379 = vmatprep.mubr.bf16.mxu1 %v8330_v30  ;;  %5314 = vmatpush3.bf16.msra.mxu1 %v1408_v62 }
 0x3d0   : >> { %5311 = vmatprep.subr.bf16.mxu1 %v1409_v39 }
 0x3d3   : >> { %5315 = vmatpush3.bf16.msra.mxu1 %v1409_v39 }
 0x3d4   : >> { %1266 = vmatmul.mubr.bf16.gmra.mrb[12].mxu0 %v8371_v49  ;;  %5312 = vmatprep.subr.bf16.mxu1 %v1410_v47 }
 0x3d6   : >> { %1380 = vmatmul.mubr.bf16.gmra.mrb[4].mxu1 %v8339_v45 }
 0x3d7   : >> { %1387 = vmatprep.mubr.bf16.mxu1 %v8344_v60  ;;  %5316 = vmatpush3.bf16.msra.mxu1 %v1410_v47 }
 0x3d8   : >> { %5313 = vmatprep.subr.bf16.mxu1 %v1411_v57 }
 0x3db   : >> { %5317 = vmatpush3.bf16.msra.mxu1 %v1411_v57 }
 0x3dc   : >> { %1603 = vmatprep.subr.bf16.mxu1 %v10482_v55 }
 0x3de   : >> { %1388 = vmatmul.mubr.bf16.gmra.mrb[8].mxu1 %v8355_v0 }
 0x3df   : >> { %1395 = vmatprep.mubr.bf16.mxu1 %v8360_v38 }
 0x3e6   : >> { %1396 = vmatmul.mubr.bf16.gmra.mrb[12].mxu1 %v8371_v49 }
 0x48f   : >> { %v8391_v62 = vpop.f32.mrb[0].mxu0 }
 0x490   : >> { %v1245_v47 = vpop.f32.mrb[1].mxu0 }
 0x491   : >> { %v8393_v39 = vpop.f32.mrb[2].mxu0 }
 0x492   : >> { %v1248_v48 = vpop.f32.mrb[3].mxu0 }
 0x497   : >> { %v1251_v37 = vpop.f32.mrb[4].mxu0 }
 0x498   : >> { %v1253_v52 = vpop.f32.mrb[5].mxu0 }
 0x499   : >> { %v1254_v46 = vpop.f32.mrb[6].mxu0 }
 0x49a   : >> { %v1256_v26 = vpop.f32.mrb[7].mxu0 }
 0x49f   : >> { %v8395_v20 = vpop.f32.mrb[8].mxu0 }
 0x4a0   : >> { %v1261_v35 = vpop.f32.mrb[9].mxu0 }
 0x4a1   : >> { %v8397_v33 = vpop.f32.mrb[10].mxu0  ;;  %v1373_v25 = vpop.f32.mrb[0].mxu1 }
 0x4a2   : >> { %v1264_v57 = vpop.f32.mrb[11].mxu0  ;;  %v1375_v56 = vpop.f32.mrb[1].mxu1 }
 0x4a3   : >> { %v1376_v18 = vpop.f32.mrb[2].mxu1 }
 0x4a4   : >> { %v1404_v55 = vpack.c.bf16 %v1376_v18, %v1373_v25  ;;  %v1378_v34 = vpop.f32.mrb[3].mxu1 }
 0x4a6   : >> { %5200 = vmatprep.mubr.msk.bf16.mxu0 %vm1420_vm4, %v1404_v55 }
 0x4a7   : >> { %v8399_v47 = vpop.f32.mrb[12].mxu0 }
 0x4a8   : >> { %v1269_v48 = vpop.f32.mrb[13].mxu0 }
 0x4a9   : >> { %v8402_v52 = vpop.f32.mrb[14].mxu0  ;;  %v1381_v31 = vpop.f32.mrb[4].mxu1 }
 0x4aa   : >> { %v1272_v26 = vpop.f32.mrb[15].mxu0  ;;  %v1383_v8 = vpop.f32.mrb[5].mxu1 }
 0x4ab   : >> { %v1384_v35 = vpop.f32.mrb[6].mxu1 }
 0x4ac   : >> { %v1405_v6 = vpack.c.bf16 %v1384_v35, %v1381_v31  ;;  %v1386_v17 = vpop.f32.mrb[7].mxu1 }
 0x4ae   : >> { %5201 = vmatmul.mubr.msk.bf16.vlgmr.msra.gmra.mrb[16].mxu0 %vm1420_vm4, %v1405_v6  ;;  %v10336_v6 = vmov 0  }
 0x4af   : >> { %1531 = vmatpush1.bf16.msra.mxu0 %v10479_v11  ;;  %1562 = vmatprep.mubr.bf16.mxu0 %v10336_v6 }
 0x4b0   : >> { %1532 = vmatprep.subr.bf16.mxu0 %v10480_v54 }
 0x4b1   : >> { %v1389_v18 = vpop.f32.mrb[8].mxu1 }
 0x4b2   : >> { %v1391_v25 = vpop.f32.mrb[9].mxu1 }
 0x4b3   : >> { %v1392_v34 = vpop.f32.mrb[10].mxu1  ;;  %1533 = vmatpush1.bf16.msra.mxu0 %v10481_v61 }
 0x4b4   : >> { %v1406_v57 = vpack.c.bf16 %v1392_v34, %v1389_v18  ;;  %v1394_v56 = vpop.f32.mrb[11].mxu1 }
 0x4b6   : >> { %5204 = vmatprep.mubr.msk.bf16.mxu1 %vm1420_vm4, %v1406_v57  ;;  %v1415_v57 = vmul.f32 %v7211_v22, %v1254_v46 }
 0x4b9   : >> { %v1397_v55 = vpop.f32.mrb[12].mxu1 }
 0x4ba   : >> { %v1399_v8 = vpop.f32.mrb[13].mxu1 }
 0x4bb   : >> { %v1400_v48 = vpop.f32.mrb[14].mxu1  ;;  %v1413_v8 = vmul.f32 %v7219_v51, %v8393_v39 }
 0x4bc   : >> { %v1407_v31 = vpack.c.bf16 %v1400_v48, %v1397_v55  ;;  %v1402_v17 = vpop.f32.mrb[15].mxu1 }
 0x4be   : >> { %5205 = vmatmul.mubr.msk.bf16.vlgmr.msra.gmra.mrb[16].mxu1 %vm1420_vm4, %v1407_v31 }
 0x4bf   : >> { %1604 = vmatpush1.bf16.msra.mxu1 %v10483_v36  ;;  %1635 = vmatprep.mubr.bf16.mxu1 %v10336_v6 }
 0x4c0   : >> { %1605 = vmatprep.subr.bf16.mxu1 %v10484_v50  ;;  %v1414_v50 = vmul.f32 %v7215_v27, %v1251_v37 }
 0x4c3   : >> { %1606 = vmatpush1.bf16.msra.mxu1 %v10485_v43  ;;  %v1412_v43 = vmul.f32 %v7223_v13, %v8391_v62 }
 0x4c4   : >> { %1789 = vmatprep.subr.bf16.mxu1 %v8265_v12 }
 0x581   : >> { %v5202_v11 = vpop.f32.mrb[16].mxu0 }
 0x582   : >> { %v1476_v54 = vadd.f32 1e-06, %v5202_v11  ;;  %v1467_v61 = vpop.f32.mrb[17].mxu0 }
 0x583   : >> { %v1468_v26 = vadd.f32 1e-06, %v1467_v61  ;;  %v5203_v35 = vpop.f32.mrb[18].mxu0 }
 0x584   : >> { %6259 = vrcp.f32 %v1476_v54  ;;  %v1479_v18 = vadd.f32 1e-06, %v5203_v35  ;;  %v1470_v25 = vpop.f32.mrb[19].mxu0 }
 0x585   : >> { %6261 = vrcp.f32 %v1468_v26  ;;  %v1471_v36 = vadd.f32 1e-06, %v1470_v25 }
 0x586   : >> { %6263 = vrcp.f32 %v1479_v18  ;;  %v1418_v18 = vmul.f32 %v7199_v1, %v8399_v47 }
 0x587   : >> { %6265 = vrcp.f32 %v1471_v36 }
 0x58e   : >> { %v6260_v12 = vpop.eup %6259 }
 0x58f   : >> { %v6262_v34 = vpop.eup %6261  ;;  %v8420_v27 = vmul.f32 %v6260_v12, %v1414_v50   ;;  %v1416_v50 = vmul.f32 %v7207_v21, %v8395_v20  ;;  %v1417_v21 = vmul.f32 %v7203_v23, %v8397_v33 }
 0x590   : >> { %v6264_v55 = vpop.eup %6263  ;;  %v8424_v13 = vmul.f32 %v6262_v34, %v1412_v43  }
 0x591   : >> { %10486 = vst [vmem:[#allocation60_spill] sm:$0xff] %v8420_v27  ;;  %v10487_v56 = vmov %v8420_v27  ;;  %v6266_v48 = vpop.eup %6265  ;;  %v8426_v22 = vmul.f32 %v6264_v55, %v1415_v57   ;;  %v5206_v31 = vpop.f32.mrb[16].mxu1 }
 0x592   : >> { %10488 = vst [vmem:[#allocation61_spill] sm:$0xff] %v8424_v13  ;;  %v10489_v11 = vmov %v8424_v13  ;;  %v8428_v51 = vmul.f32 %v6266_v48, %v1413_v8   ;;  %v1492_v37 = vadd.f32 1e-06, %v5206_v31  ;;  %v1483_v17 = vpop.f32.mrb[17].mxu1 }
 0x593   : >> { %10490 = vst [vmem:[#allocation62_spill] sm:$0xff] %v8426_v22  ;;  %v10491_v54 = vmov %v8426_v22  ;;  %v1484_v62 = vadd.f32 1e-06, %v1483_v17  ;;  %v5207_v26 = vpop.f32.mrb[18].mxu1 }
 0x594   : >> { %10492 = vst [vmem:[#allocation63_spill] sm:$0xff] %v8428_v51  ;;  %v10493_v61 = vmov %v8428_v51  ;;  %v8432_v46 = vpack.c.bf16 %v10491_v54, %v10487_v56  ;;  %6267 = vrcp.f32 %v1492_v37  ;;  %v1495_v27 = vadd.f32 1e-06, %v5207_v26  ;;  %v1486_v35 = vpop.f32.mrb[19].mxu1 }
 0x595   : >> { %v8436_v13 = vpack.c.bf16 %v10493_v61, %v10489_v11  ;;  %6269 = vrcp.f32 %v1484_v62  ;;  %v1487_v22 = vadd.f32 1e-06, %v1486_v35 }
 0x596   : >> { %10494 = vst [vmem:[#allocation64_spill] sm:$0xff] %v8432_v46  ;;  %v10495_v36 = vmov %v8432_v46  ;;  %6271 = vrcp.f32 %v1495_v27 }
 0x597   : >> { %10496 = vst [vmem:[#allocation65_spill] sm:$0xff] %v8436_v13  ;;  %v10497_v39 = vmov %v8436_v13  ;;  %6273 = vrcp.f32 %v1487_v22  ;;  %v1522_v47 = vsel %vm466_vm2, %v10495_v36, 0 }
 0x598   : >> { %5027 = vmatmul.mubr.msk.bf16.vlgmr.msra.gmra.mrb[20].mxu0 %vm466_vm2, %v10497_v39  ;;  %5031 = vmatmul.mubr.msk.bf16.vlgmr.msra.gmra.mrb[20].mxu1 %vm466_vm2, %v10497_v39  ;;  %v1519_v51 = vsel %vm466_vm2, %v10497_v39, 0 }
 0x599   : >> { %5472 = vmatprep.subr.msk.bf16.mxu0 %vm466_vm2, %v10497_v39  ;;  %1572 = vmatprep.mubr.bf16.mxu0 %v10336_v6 }
 0x59a   : >> { %5209 = vmatpush3.bf16.xpose.msra.mxu0 %v1519_v51  ;;  %1645 = vmatprep.mubr.bf16.mxu1 %v10336_v6 }
 0x59b   : >> { %5473 = vmatprep.subr.msk.bf16.mxu0 %vm466_vm2, %v10495_v36  ;;  %1790 = vmatpush1.bf16.msra.mxu1 %v8269_v24  ;;  %v1419_v24 = vmul.f32 %v7195_v28, %v8402_v52 }
 0x59c   : >> { %1791 = vmatprep.subr.bf16.mxu1 %v8275_v59 }
 0x59e   : >> { %v6268_v25 = vpop.eup %6267 }
 0x59f   : >> { %1792 = vmatpush1.bf16.msra.mxu1 %v8283_v32  ;;  %v6270_v12 = vpop.eup %6269  ;;  %v8463_v1 = vmul.f32 %v6268_v25, %v1418_v18  }
 0x5a0   : >> { %5028 = vmatmul.mubr.msk.bf16.gmra.mrb[24].mxu0 %vm466_vm2, %v10495_v36  ;;  %5032 = vmatmul.mubr.msk.bf16.gmra.mrb[24].mxu1 %vm466_vm2, %v10495_v36  ;;  %v6272_v20 = vpop.eup %6271  ;;  %v8471_v32 = vmul.f32 %v6270_v12, %v1416_v50  }
 0x5a1   : >> { %10498 = vst [vmem:[#allocation66_spill] sm:$0xff] %v8463_v1  ;;  %v10499_v59 = vmov %v8463_v1  ;;  %1582 = vmatprep.mubr.bf16.mxu0 %v10336_v6  ;;  %1655 = vmatprep.mubr.bf16.mxu1 %v10336_v6  ;;  %v6274_v43 = vpop.eup %6273  ;;  %v8474_v28 = vmul.f32 %v6272_v20, %v1419_v24  }
 0x5a2   : >> { %10500 = vst [vmem:[#allocation67_spill] sm:$0xff] %v8471_v32  ;;  %5211 = vmatpush3.bf16.xpose.msra.mxu0 %v1522_v47  ;;  %1793 = vmatprep.subr.bf16.mxu1 %v8288_v53  ;;  %v8477_v23 = vmul.f32 %v6274_v43, %v1417_v21  }
 0x5a3   : >> { %10501 = vst [vmem:[#allocation68_spill] sm:$0xff] %v8474_v28  ;;  %v10502_v55 = vmov %v8474_v28  ;;  %1794 = vmatpush1.bf16.msra.mxu1 %v8296_v9  ;;  %v10509_v28 = vmov 0  }
 0x5a4   : >> { %10503 = vst [vmem:[#allocation69_spill] sm:$0xff] %v8477_v23  ;;  %v10504_v62 = vmov %v8477_v23  ;;  %1795 = vmatprep.subr.bf16.mxu1 %v8302_v10  ;;  %v8482_v1 = vpack.c.bf16 %v10502_v55, %v10499_v59 }
 0x5a5   : >> { %v8486_v33 = vpack.c.bf16 %v10504_v62, %v8471_v32 }
 0x5a6   : >> { %10505 = vst [vmem:[#allocation70_spill] sm:$0xff] %v8482_v1  ;;  %v10506_v6 = vmov %v8482_v1 }
 0x5a7   : >> { %10507 = vst [vmem:[#allocation71_spill] sm:$0xff] %v8486_v33  ;;  %v10508_v50 = vmov %v8486_v33  ;;  %1796 = vmatpush1.bf16.msra.mxu1 %v8312_v58  ;;  %v1528_v53 = vsel %vm466_vm2, %v10506_v6, 0 }
 0x5a8   : >> { %5029 = vmatmul.mubr.msk.bf16.gmra.mrb[28].mxu0 %vm466_vm2, %v10508_v50  ;;  %5033 = vmatmul.mubr.msk.bf16.gmra.mrb[28].mxu1 %vm466_vm2, %v10508_v50  ;;  %v1525_v23 = vsel %vm466_vm2, %v10508_v50, 0 }
 0x5a9   : >> { %5474 = vmatprep.subr.msk.bf16.mxu0 %vm466_vm2, %v10508_v50  ;;  %1592 = vmatprep.mubr.bf16.mxu0 %v10509_v28 }
 0x5aa   : >> { %5213 = vmatpush3.bf16.xpose.msra.mxu0 %v1525_v23  ;;  %1665 = vmatprep.mubr.bf16.mxu1 %v10509_v28 }
 0x5ab   : >> { %5475 = vmatprep.subr.msk.bf16.mxu0 %vm466_vm2, %v10506_v6 }
 0x5b0   : >> { %5030 = vmatmul.mubr.msk.bf16.gmra.mrb[32].mxu0 %vm466_vm2, %v10506_v6  ;;  %5034 = vmatmul.mubr.msk.bf16.gmra.mrb[32].mxu1 %vm466_vm2, %v10506_v6 }
 0x5b1   : >> { %5216 = vmatprep.mubr.msk.bf16.mxu0 %vm466_vm2, %v10497_v39  ;;  %1821 = vmatprep.mubr.bf16.mxu1 %v10509_v28 }
 0x5b2   : >> { %5215 = vmatpush3.bf16.xpose.msra.mxu0 %v1528_v53 }
 0x5b3   : >> { %1862 = vmatprep.subr.bf16.mxu0 %v8318_v19 }
 0x5b9   : >> { %5217 = vmatmul.mubr.msk.bf16.vlgmr.msra.gmra.mrb[36].mxu0 %vm466_vm2, %v10495_v36 }
 0x5ba   : >> { %5220 = vmatprep.mubr.msk.bf16.mxu0 %vm466_vm2, %v10508_v50  ;;  %1863 = vmatpush1.bf16.msra.mxu0 %v8325_v29 }
 0x5bb   : >> { %1864 = vmatprep.subr.bf16.mxu0 %v8330_v30 }
 0x5be   : >> { %1865 = vmatpush1.bf16.msra.mxu0 %v8339_v45 }
 0x5bf   : >> { %1866 = vmatprep.subr.bf16.mxu0 %v8344_v60 }
 0x5c1   : >> { %5221 = vmatmul.mubr.msk.bf16.gmra.mrb[40].mxu0 %vm466_vm2, %v10506_v6 }
 0x5c2   : >> { %1867 = vmatpush1.bf16.msra.mxu0 %v8355_v0  ;;  %1894 = vmatprep.mubr.bf16.mxu0 %v10509_v28 }
 0x5c3   : >> { %1868 = vmatprep.subr.bf16.mxu0 %v8360_v38 }
 0x5c6   : >> { %1869 = vmatpush1.bf16.msra.mxu0 %v8371_v49 }
 0x66b   : >> { %v8525_v9 = vpop.f32.mrb[20].mxu0  ;;  %v8527_v10 = vpop.f32.mrb[20].mxu1 }
 0x66c   : >> { %v8529_v58 = vpop.f32.mrb[21].mxu0  ;;  %v8531_v19 = vpop.f32.mrb[21].mxu1 }
 0x66d   : >> { %v8533_v29 = vpop.f32.mrb[22].mxu0  ;;  %v8535_v30 = vpop.f32.mrb[22].mxu1 }
 0x66e   : >> { %v8537_v45 = vpop.f32.mrb[23].mxu0  ;;  %v8539_v60 = vpop.f32.mrb[23].mxu1 }
 0x673   : >> { %v8541_v0 = vpop.f32.mrb[24].mxu0  ;;  %v8543_v38 = vpop.f32.mrb[24].mxu1 }
 0x674   : >> { %v8545_v49 = vpop.f32.mrb[25].mxu0  ;;  %v8547_v52 = vpop.f32.mrb[25].mxu1 }
 0x675   : >> { %v8549_v34 = vpop.f32.mrb[26].mxu0  ;;  %v8551_v57 = vpop.f32.mrb[26].mxu1 }
 0x676   : >> { %v8553_v8 = vpop.f32.mrb[27].mxu0  ;;  %v8555_v48 = vpop.f32.mrb[27].mxu1 }
 0x67b   : >> { %v8557_v31 = vpop.f32.mrb[28].mxu0  ;;  %v8559_v37 = vpop.f32.mrb[28].mxu1 }
 0x67c   : >> { %v8561_v17 = vpop.f32.mrb[29].mxu0  ;;  %v8563_v26 = vpop.f32.mrb[29].mxu1 }
 0x67d   : >> { %v8565_v46 = vpop.f32.mrb[30].mxu0  ;;  %v8567_v27 = vpop.f32.mrb[30].mxu1 }
 0x67e   : >> { %v8569_v35 = vpop.f32.mrb[31].mxu0  ;;  %v8571_v13 = vpop.f32.mrb[31].mxu1 }
 0x683   : >> { %v8573_v22 = vpop.f32.mrb[32].mxu0  ;;  %v8575_v51 = vpop.f32.mrb[32].mxu1 }
 0x684   : >> { %v8577_v18 = vpop.f32.mrb[33].mxu0  ;;  %v8579_v25 = vpop.f32.mrb[33].mxu1 }
 0x685   : >> { %v8581_v12 = vpop.f32.mrb[34].mxu0  ;;  %v8583_v24 = vpop.f32.mrb[34].mxu1 }
 0x686   : >> { %v8585_v47 = vpop.f32.mrb[35].mxu0  ;;  %v8587_v20 = vpop.f32.mrb[35].mxu1 }
 0x687   : >> { %10510 = vst [vmem:[#allocation72_spill] sm:$0xff] %v8587_v20 }
 0x68c   : >> { %v5218_v21 = vpop.f32.mrb[36].mxu0 }
 0x68d   : >> { %v1710_v43 = vpop.f32.mrb[37].mxu0 }
 0x68e   : >> { %v5219_v1 = vpop.f32.mrb[38].mxu0 }
 0x68f   : >> { %v1742_v33 = vpack.c.bf16 %v5219_v1, %v5218_v21  ;;  %v1713_v23 = vpop.f32.mrb[39].mxu0 }
 0x690   : >> { %v1741_v53 = vpack.c.bf16 %v1713_v23, %v1710_v43 }
 0x692   : >> { %5039 = vmatmul.mubr.msk.bf16.vlgmr.msra.gmra.mrb[36].mxu1 %vm1420_vm4, %v1741_v53  ;;  %5043 = vmatmul.mubr.msk.bf16.vlgmr.msra.gmra.mrb[44].mxu0 %vm1420_vm4, %v1741_v53 }
 0x693   : >> { %1831 = vmatprep.mubr.bf16.mxu1 %v10509_v28  ;;  %1904 = vmatprep.mubr.bf16.mxu0 %v10509_v28 }
 0x694   : >> { %v5222_v6 = vpop.f32.mrb[40].mxu0 }
 0x695   : >> { %v1726_v50 = vpop.f32.mrb[41].mxu0 }
 0x696   : >> { %v5223_v36 = vpop.f32.mrb[42].mxu0 }
 0x697   : >> { %v1744_v39 = vpack.c.bf16 %v5223_v36, %v5222_v6  ;;  %v1729_v11 = vpop.f32.mrb[43].mxu0 }
 0x698   : >> { %v1743_v61 = vpack.c.bf16 %v1729_v11, %v1726_v50 }
 0x69a   : >> { %5040 = vmatmul.mubr.msk.bf16.gmra.mrb[40].mxu1 %vm1420_vm4, %v1742_v33  ;;  %5044 = vmatmul.mubr.msk.bf16.gmra.mrb[48].mxu0 %vm1420_vm4, %v1742_v33 }
 0x69b   : >> { %1841 = vmatprep.mubr.bf16.mxu1 %v10509_v28  ;;  %1914 = vmatprep.mubr.bf16.mxu0 %v10509_v28 }
 0x6a2   : >> { %5041 = vmatmul.mubr.msk.bf16.gmra.mrb[44].mxu1 %vm1420_vm4, %v1743_v61  ;;  %5045 = vmatmul.mubr.msk.bf16.gmra.mrb[52].mxu0 %vm1420_vm4, %v1743_v61 }
 0x6a3   : >> { %1851 = vmatprep.mubr.bf16.mxu1 %v10509_v28  ;;  %1924 = vmatprep.mubr.bf16.mxu0 %v10509_v28 }
 0x6aa   : >> { %5042 = vmatmul.mubr.msk.bf16.gmra.mrb[48].mxu1 %vm1420_vm4, %v1744_v39  ;;  %5046 = vmatmul.mubr.msk.bf16.gmra.mrb[56].mxu0 %vm1420_vm4, %v1744_v39 }
 0x765   : >> { %v1823_v6 = vpop.f32.mrb[36].mxu1  ;;  %v1896_v11 = vpop.f32.mrb[44].mxu0 }
 0x766   : >> { %v1824_v36 = vadd.f32 1e-06, %v1823_v6  ;;  %v1897_v50 = vadd.f32 1e-06, %v1896_v11  ;;  %v1825_v21 = vpop.f32.mrb[37].mxu1  ;;  %v1898_v43 = vpop.f32.mrb[45].mxu0 }
 0x767   : >> { %v1826_v1 = vadd.f32 1e-06, %v1825_v21  ;;  %v1899_v33 = vadd.f32 1e-06, %v1898_v43  ;;  %v1827_v23 = vpop.f32.mrb[38].mxu1  ;;  %v1900_v53 = vpop.f32.mrb[46].mxu0 }
 0x768   : >> { %6275 = vrcp.f32 %v1824_v36  ;;  %v1828_v61 = vadd.f32 1e-06, %v1827_v23  ;;  %v1829_v56 = vpop.f32.mrb[39].mxu1  ;;  %v1902_v54 = vpop.f32.mrb[47].mxu0  ;;  %v1901_v28 = vadd.f32 1e-06, %v1900_v53 }
 0x769   : >> { %6277 = vrcp.f32 %v1897_v50  ;;  %v1830_v32 = vadd.f32 1e-06, %v1829_v56  ;;  %v1903_v39 = vadd.f32 1e-06, %v1902_v54  ;;  %v1745_v54 = vmul.f32 %v7191_v63, %v8525_v9 }
 0x76a   : >> { %6279 = vrcp.f32 %v1826_v1  ;;  %v1748_v9 = vmul.f32 %v7179_v42, %v8531_v19 }
 0x76b   : >> { %6281 = vrcp.f32 %v1899_v33 }
 0x76c   : >> { %6283 = vrcp.f32 %v1828_v61 }
 0x76d   : >> { %6285 = vrcp.f32 %v1901_v28  ;;  %v1833_v6 = vpop.f32.mrb[40].mxu1  ;;  %v1906_v11 = vpop.f32.mrb[48].mxu0 }
 0x76e   : >> { %6287 = vrcp.f32 %v1830_v32  ;;  %v1834_v62 = vadd.f32 1e-06, %v1833_v6  ;;  %v1907_v21 = vadd.f32 1e-06, %v1906_v11  ;;  %v1835_v43 = vpop.f32.mrb[41].mxu1  ;;  %v1908_v59 = vpop.f32.mrb[49].mxu0  ;;  %v1747_v32 = vmul.f32 %v7183_v3, %v8527_v10 }
 0x76f   : >> { %6289 = vrcp.f32 %v1903_v39  ;;  %v1836_v36 = vadd.f32 1e-06, %v1835_v43  ;;  %v1909_v23 = vadd.f32 1e-06, %v1908_v59  ;;  %v1837_v55 = vpop.f32.mrb[42].mxu1  ;;  %v1910_v20 = vpop.f32.mrb[50].mxu0  ;;  %v1746_v59 = vmul.f32 %v7187_v40, %v8529_v58 }
 0x770   : >> { %6291 = vrcp.f32 %v1834_v62  ;;  %v1838_v50 = vadd.f32 1e-06, %v1837_v55  ;;  %v1839_v1 = vpop.f32.mrb[43].mxu1  ;;  %v1912_v56 = vpop.f32.mrb[51].mxu0  ;;  %v1911_v33 = vadd.f32 1e-06, %v1910_v20  ;;  %v1749_v20 = vmul.f32 %v7175_v2, %v8533_v29 }
 0x771   : >> { %6293 = vrcp.f32 %v1907_v21  ;;  %v1840_v61 = vadd.f32 1e-06, %v1839_v1  ;;  %v1913_v55 = vadd.f32 1e-06, %v1912_v56  ;;  %v1751_v11 = vmul.f32 %v7167_v4, %v8535_v30 }
 0x772   : >> { %v6276_v53 = vpop.eup %6275  ;;  %6295 = vrcp.f32 %v1836_v36  ;;  %v1750_v40 = vmul.f32 %v7171_v41, %v8537_v45 }
 0x773   : >> { %v6278_v28 = vpop.eup %6277  ;;  %v8609_v63 = vmul.f32 %v6276_v53, %v1745_v54   ;;  %6297 = vrcp.f32 %v1909_v23 }
 0x774   : >> { %v6280_v39 = vpop.eup %6279  ;;  %v8615_v3 = vmul.f32 %v6278_v28, %v1747_v32   ;;  %6299 = vrcp.f32 %v1838_v50 }
 0x775   : >> { %10511 = vst [vmem:[#allocation73_spill] sm:$0xff] %v8609_v63  ;;  %v6282_v10 = vpop.eup %6281  ;;  %v8621_v63 = vmul.f32 %v6280_v39, %v1746_v59   ;;  %6301 = vrcp.f32 %v1911_v33  ;;  %v1843_v21 = vpop.f32.mrb[44].mxu1  ;;  %v1752_v33 = vmul.f32 %v7163_v44, %v8539_v60  ;;  %v1753_v59 = vmul.f32 %v7159_v14, %v8541_v0 }
 0x776   : >> { %10512 = vst [vmem:[#allocation74_spill] sm:$0xff] %v8615_v3  ;;  %v1916_v43 = vpop.f32.mrb[52].mxu0  ;;  %v6284_v36 = vpop.eup %6283  ;;  %v8623_v42 = vmul.f32 %v6282_v10, %v1748_v9   ;;  %6303 = vrcp.f32 %v1840_v61  ;;  %v1844_v2 = vadd.f32 1e-06, %v1843_v21  ;;  %v1756_v21 = vmul.f32 %v7147_v7, %v8547_v52 }
 0x777   : >> { %10513 = vst [vmem:[#allocation75_spill] sm:$0xff] %v8621_v63  ;;  %v1917_v29 = vadd.f32 1e-06, %v1916_v43  ;;  %v1845_v3 = vpop.f32.mrb[45].mxu1  ;;  %v1918_v23 = vpop.f32.mrb[53].mxu0  ;;  %v8625_v1 = vmul.f32 %v6284_v36, %v1749_v20   ;;  %6305 = vrcp.f32 %v1913_v55  ;;  %v1755_v20 = vmul.f32 %v7151_v16, %v8543_v38  ;;  %v10521_v38 = vld [vmem:[#allocation59_spill] sm:$0xff] }
 0x778   : >> { %10514 = vst [vmem:[#allocation76_spill] sm:$0xff] %v8623_v42  ;;  %v6286_v50 = vpop.eup %6285  ;;  %v1846_v4 = vadd.f32 1e-06, %v1845_v3  ;;  %v1919_v30 = vadd.f32 1e-06, %v1918_v23  ;;  %v1847_v41 = vpop.f32.mrb[46].mxu1  ;;  %6307 = vrcp.f32 %v1844_v2  ;;  %v1754_v63 = vmul.f32 %v7155_v5, %v8545_v49 }
 0x779   : >> { %10515 = vst [vmem:[#allocation77_spill] sm:$0xff] %v8625_v1  ;;  %v1920_v45 = vpop.f32.mrb[54].mxu0  ;;  %v6288_v54 = vpop.eup %6287  ;;  %v8629_v53 = vmul.f32 %v6286_v50, %v1751_v11   ;;  %v1848_v42 = vadd.f32 1e-06, %v1847_v41  ;;  %6309 = vrcp.f32 %v1917_v29  ;;  %v1757_v36 = vmul.f32 %v7143_v15, %v8549_v34  ;;  %v10522_v5 = vld [vmem:[#allocation41_spill] sm:$0xff] }
 0x77a   : >> { %v1849_v32 = vpop.f32.mrb[47].mxu1  ;;  %v1922_v61 = vpop.f32.mrb[55].mxu0  ;;  %v8633_v41 = vmul.f32 %v6288_v54, %v1750_v40   ;;  %v1921_v39 = vadd.f32 1e-06, %v1920_v45  ;;  %6311 = vrcp.f32 %v1846_v4  ;;  %v1759_v2 = vmul.f32 %v10521_v38, %v8551_v57 }
 0x77b   : >> { %10516 = vst [vmem:[#allocation78_spill] sm:$0xff] %v8629_v53  ;;  %v6290_v28 = vpop.eup %6289  ;;  %v1850_v10 = vadd.f32 1e-06, %v1849_v32  ;;  %6313 = vrcp.f32 %v1919_v30  ;;  %v1923_v0 = vadd.f32 1e-06, %v1922_v61  ;;  %v1758_v49 = vmul.f32 %v10522_v5, %v8553_v8 }
 0x77c   : >> { %10517 = vst [vmem:[#allocation79_spill] sm:$0xff] %v8633_v41  ;;  %v6292_v9 = vpop.eup %6291  ;;  %v8637_v44 = vmul.f32 %v6290_v28, %v1752_v33   ;;  %6315 = vrcp.f32 %v1848_v42  ;;  %v10526_v42 = vld [vmem:[#allocation58_spill] sm:$0xff] }
 0x77d   : >> { %v6294_v11 = vpop.eup %6293  ;;  %v8641_v14 = vmul.f32 %v6292_v9, %v1753_v59   ;;  %6317 = vrcp.f32 %v1921_v39  ;;  %v1926_v3 = vpop.f32.mrb[56].mxu0  ;;  %v1760_v32 = vmul.f32 %v10526_v42, %v8555_v48  ;;  %v10527_v9 = vld [vmem:[#allocation57_spill] sm:$0xff] }
 0x77e   : >> { %10518 = vst [vmem:[#allocation80_spill] sm:$0xff] %v8637_v44  ;;  %v6296_v40 = vpop.eup %6295  ;;  %v8647_v16 = vmul.f32 %v6294_v11, %v1755_v20   ;;  %6319 = vrcp.f32 %v1850_v10  ;;  %v1927_v52 = vadd.f32 1e-06, %v1926_v3  ;;  %v1928_v34 = vpop.f32.mrb[57].mxu0  ;;  %v1761_v20 = vmul.f32 %v10527_v9, %v8557_v31  ;;  %v10535_v3 = vld [vmem:[#allocation53_spill] sm:$0xff] }
 0x77f   : >> { %v10519_v43 = vmov %v8641_v14  ;;  %v6298_v44 = vpop.eup %6297  ;;  %v8653_v5 = vmul.f32 %v6296_v40, %v1754_v63   ;;  %v1853_v14 = vpop.f32.mrb[48].mxu1  ;;  %6321 = vrcp.f32 %v1923_v0  ;;  %v1929_v41 = vadd.f32 1e-06, %v1928_v34  ;;  %v10528_v0 = vld [vmem:[#allocation55_spill] sm:$0xff] }
 0x780   : >> { %v10520_v29 = vmov %v8647_v16  ;;  %v6300_v23 = vpop.eup %6299  ;;  %v8655_v7 = vmul.f32 %v6298_v44, %v1756_v21   ;;  %v1854_v15 = vadd.f32 1e-06, %v1853_v14  ;;  %v1855_v16 = vpop.f32.mrb[49].mxu1  ;;  %v1763_v40 = vmul.f32 %v10528_v0, %v8559_v37  ;;  %v10530_v44 = vld [vmem:[#allocation56_spill] sm:$0xff] }
 0x781   : >> { %v10523_v50 = vmov %v8653_v5  ;;  %v6302_v1 = vpop.eup %6301  ;;  %v8657_v4 = vmul.f32 %v6300_v23, %v1757_v36   ;;  %v1856_v57 = vadd.f32 1e-06, %v1855_v16  ;;  %v1857_v8 = vpop.f32.mrb[50].mxu1  ;;  %v1762_v38 = vmul.f32 %v10530_v44, %v8561_v17  ;;  %v10537_v17 = vld [vmem:[#allocation51_spill] sm:$0xff] }
 0x782   : >> { %v10524_v30 = vmov %v8655_v7  ;;  %v1930_v54 = vpop.f32.mrb[58].mxu0  ;;  %v6304_v33 = vpop.eup %6303  ;;  %v8661_v61 = vmul.f32 %v6302_v1, %v1759_v2   ;;  %6323 = vrcp.f32 %v1854_v15  ;;  %v1858_v7 = vadd.f32 1e-06, %v1857_v8  ;;  %v10557_v44 = vld [vmem:[#allocation43_spill] sm:$0xff] }
 0x783   : >> { %v10525_v45 = vmov %v8657_v4  ;;  %v1859_v28 = vpop.f32.mrb[51].mxu1  ;;  %v1932_v59 = vpop.f32.mrb[59].mxu0  ;;  %v8665_v10 = vmul.f32 %v6304_v33, %v1758_v49   ;;  %6325 = vrcp.f32 %v1927_v52  ;;  %v1931_v11 = vadd.f32 1e-06, %v1930_v54  ;;  %v10532_v49 = vld [vmem:[#allocation54_spill] sm:$0xff] }
 0x784   : >> { %v6306_v39 = vpop.eup %6305  ;;  %6327 = vrcp.f32 %v1856_v57  ;;  %v1860_v48 = vadd.f32 1e-06, %v1859_v28  ;;  %v1933_v2 = vadd.f32 1e-06, %v1932_v59  ;;  %v1764_v14 = vmul.f32 %v10532_v49, %v8563_v26  ;;  %v10539_v26 = vld [vmem:[#allocation52_spill] sm:$0xff] }
 0x785   : >> { %v6308_v63 = vpop.eup %6307  ;;  %v8669_v8 = vmul.f32 %v6306_v39, %v1760_v32   ;;  %6329 = vrcp.f32 %v1929_v41  ;;  %v1765_v23 = vmul.f32 %v10535_v3, %v8565_v46  ;;  %v1766_v4 = vmul.f32 %v10539_v26, %v8569_v35  ;;  %v10541_v46 = vld [vmem:[#allocation50_spill] sm:$0xff]  ;;  %v10563_v49 = vld [vmem:[#allocation72_spill] sm:$0xff]  ;;  %10595 = vst [vmem:[#allocation41_spill] sm:$0xff] %v8665_v10 }
 0x786   : >> { %v6310_v21 = vpop.eup %6309  ;;  %v8673_v31 = vmul.f32 %v6308_v63, %v1761_v20   ;;  %6331 = vrcp.f32 %v1858_v7  ;;  %v1768_v57 = vmul.f32 %v10541_v46, %v8571_v13  ;;  %v10546_v7 = vld [vmem:[#allocation47_spill] sm:$0xff]  ;;  %v10548_v63 = vld [vmem:[#allocation48_spill] sm:$0xff] }
 0x787   : >> { %v10529_v36 = vmov %v8669_v8  ;;  %v6312_v5 = vpop.eup %6311  ;;  %v8677_v34 = vmul.f32 %v6310_v21, %v1763_v40   ;;  %6333 = vrcp.f32 %v1931_v11  ;;  %v10544_v8 = vld [vmem:[#allocation49_spill] sm:$0xff]  ;;  %v1771_v28 = vmul.f32 %v10546_v7, %v8575_v51 }
 0x788   : >> { %v10531_v62 = vmov %v8673_v31  ;;  %v6314_v37 = vpop.eup %6313  ;;  %v8681_v15 = vmul.f32 %v6312_v5, %v1762_v38   ;;  %v1767_v31 = vmul.f32 %v10537_v17, %v8567_v27  ;;  %6335 = vrcp.f32 %v1860_v48 }
 0x789   : >> { %10533 = vst [vmem:[#allocation81_spill] sm:$0xff] %v8677_v34  ;;  %v10534_v54 = vmov %v8677_v34  ;;  %v6316_v52 = vpop.eup %6315  ;;  %v8685_v16 = vmul.f32 %v6314_v37, %v1764_v14   ;;  %6337 = vrcp.f32 %v1933_v2  ;;  %v1769_v27 = vmul.f32 %v10544_v8, %v8573_v22  ;;  %v10560_v2 = vld [vmem:[#allocation44_spill] sm:$0xff]  ;;  %v10564_v14 = vld [vmem:[#allocation42_spill] sm:$0xff] }
 0x78a   : >> { %v10536_v32 = vmov %v8681_v15  ;;  %v6318_v1 = vpop.eup %6317  ;;  %v8689_v33 = vmul.f32 %v6316_v52, %v1765_v23   ;;  %v1770_v40 = vmul.f32 %v10548_v63, %v8577_v18  ;;  %v1775_v38 = vmul.f32 %v10557_v44, %v8583_v24  ;;  %v10601_v44 = vld [vmem:[#allocation80_spill] sm:$0xff]  ;;  %v10608_v63 = vld [vmem:[#allocation73_spill] sm:$0xff]  ;;  %v10618_v24 = vld [vmem:[#allocation27_spill] sm:$0xff] (%p8734_p2) }
 0x78b   : >> { %v10538_v59 = vmov %v8685_v16  ;;  %v6320_v34 = vpop.eup %6319  ;;  %v8693_v35 = vmul.f32 %v6318_v1, %v1767_v31   ;;  %v1774_v5 = vmul.f32 %v10560_v2, %v8585_v47  ;;  %v1776_v3 = vmul.f32 %v10564_v14, %v10563_v49  ;;  %v10604_v2 = vld [vmem:[#allocation77_spill] sm:$0xff]  ;;  %v10610_v1 = vld [vmem:[#allocation66_spill] sm:$0xff]  ;;  %2015 = vmatprep.subr.bf16.mxu1 (%p8734_p2), %v10618_v24 }
 0x78c   : >> { %v10540_v39 = vmov %v8689_v33  ;;  %v6322_v41 = vpop.eup %6321  ;;  %v8697_v20 = vmul.f32 %v6320_v34, %v1766_v4   ;;  %v10590_v34 = vmov %v10534_v54  ;;  %v10592_v31 = vmov %v10531_v62  ;;  %v10602_v4 = vld [vmem:[#allocation78_spill] sm:$0xff]  ;;  %v10627_v54 = vld [vmem:[#allocation32_spill] sm:$0xff] (%p8734_p2) }
 0x78d   : >> { %10542 = vst [vmem:[#allocation82_spill] sm:$0xff] %v8693_v35  ;;  %v10543_v9 = vmov %v8693_v35  ;;  %v6324_v42 = vpop.eup %6323  ;;  %v8701_v26 = vmul.f32 %v6322_v41, %v1768_v57   ;;  %v10551_v35 = vld [vmem:[#allocation46_spill] sm:$0xff]  ;;  %v10593_v8 = vmov %v10529_v36  ;;  %v10594_v17 = vmov %v8661_v61 }
 0x78e   : >> { %v10545_v11 = vmov %v8697_v20  ;;  %v6326_v33 = vpop.eup %6325  ;;  %v8705_v46 = vmul.f32 %v6324_v42, %v1769_v27   ;;  %v1772_v48 = vmul.f32 %v10551_v35, %v8579_v25  ;;  %v10554_v20 = vld [vmem:[#allocation45_spill] sm:$0xff]  ;;  %v10586_v35 = vmov %v10543_v9  ;;  %v10603_v41 = vld [vmem:[#allocation79_spill] sm:$0xff]  ;;  %v10605_v42 = vld [vmem:[#allocation76_spill] sm:$0xff] }
 0x78f   : >> { %v10547_v0 = vmov %v8701_v26  ;;  %v6328_v13 = vpop.eup %6327  ;;  %v8709_v52 = vmul.f32 %v6326_v33, %v1771_v28   ;;  %v1773_v21 = vmul.f32 %v10554_v20, %v8581_v12  ;;  %v10587_v20 = vmov %v10545_v11  ;;  %v10609_v28 = vld [vmem:[#allocation68_spill] sm:$0xff] }
 0x790   : >> { %10549 = vst [vmem:[#allocation83_spill] sm:$0xff] %v8705_v46  ;;  %v6330_v22 = vpop.eup %6329  ;;  %v8713_v37 = vmul.f32 %v6328_v13, %v1770_v40   ;;  %v10583_v58 = vmov %v8705_v46  ;;  %v10585_v26 = vmov %v10547_v0  ;;  %v10588_v33 = vmov %v10540_v39  ;;  %v10607_v40 = vld [vmem:[#allocation75_spill] sm:$0xff]  ;;  %v10614_v27 = vld [vmem:[#allocation60_spill] sm:$0xff]  ;;  %v10616_v13 = vld [vmem:[#allocation61_spill] sm:$0xff] }
 0x791   : >> { %10552 = vst [vmem:[#allocation84_spill] sm:$0xff] %v8709_v52  ;;  %v10553_v6 = vmov %v8709_v52  ;;  %v6332_v51 = vpop.eup %6331  ;;  %v8717_v48 = vmul.f32 %v6330_v22, %v1772_v48   ;;  %v10584_v46 = vmov %v10583_v58  ;;  %v10596_v15 = vmov %v10525_v45  ;;  %v10613_v22 = vld [vmem:[#allocation62_spill] sm:$0xff]  ;;  %v10625_v9 = vld [vmem:[#allocation26_spill] sm:$0xff] (%p8734_p2)  ;;  %v10626_v13 = vld [vmem:[#allocation31_spill] sm:$0xff] (%p8734_p2) }
 0x792   : >> { %10555 = vst [vmem:[#allocation85_spill] sm:$0xff] %v8713_v37  ;;  %v10556_v19 = vmov %v8713_v37  ;;  %v6334_v18 = vpop.eup %6333  ;;  %v8721_v47 = vmul.f32 %v6332_v51, %v1773_v21   ;;  %v10581_v52 = vmov %v10553_v6  ;;  %v10597_v7 = vmov %v10524_v30  ;;  %v10612_v21 = vld [vmem:[#allocation67_spill] sm:$0xff]  ;;  %1086 = sbr.rel (!%p8734_p2) target bundleno = 907 (0x38b), region = 145  ;;  %v10620_v6 = vld [vmem:[#allocation75_spill] sm:$0xff] (%p8734_p2)  ;;  %v10634_v15 = vld [vmem:[#allocation78_spill] sm:$0xff] (%p8734_p2) }
 0x793   : >> { %10558 = vst [vmem:[#allocation86_spill] sm:$0xff] %v8717_v48  ;;  %v6336_v25 = vpop.eup %6335  ;;  %v8725_v57 = vmul.f32 %v6334_v18, %v1775_v38   ;;  %v10579_v56 = vmov %v8717_v48  ;;  %v10582_v37 = vmov %v10556_v19  ;;  %v10591_v18 = vmov %v10536_v32  ;;  %v10615_v51 = vld [vmem:[#allocation63_spill] sm:$0xff]  ;;  %v10641_v26 = vld [vmem:[#allocation70_spill] sm:$0xff] (%p8734_p2) }
 0x794   : >> { %10561 = vst [vmem:[#allocation87_spill] sm:$0xff] %v8721_v47  ;;  %v6338_v23 = vpop.eup %6337  ;;  %v8727_v38 = vmul.f32 %v6336_v25, %v1774_v5   ;;  %v10577_v55 = vmov %v8721_v47  ;;  %v10580_v48 = vmov %v10579_v56  ;;  %v10589_v25 = vmov %v10538_v59  ;;  %v10623_v56 = vld [vmem:[#allocation80_spill] sm:$0xff] (%p8734_p2)  ;;  %v10629_v37 = vld [vmem:[#allocation30_spill] sm:$0xff] (%p8734_p2) }
 0x795   : >> { %10565 = vst [vmem:[#allocation88_spill] sm:$0xff] %v8725_v57  ;;  %v10566_v12 = vmov %v8725_v57  ;;  %v8729_v49 = vmul.f32 %v6338_v23, %v1776_v3   ;;  %v10578_v47 = vmov %v10577_v55  ;;  %v10598_v16 = vmov %v10520_v29  ;;  %v10606_v3 = vld [vmem:[#allocation74_spill] sm:$0xff]  ;;  %v10621_v55 = vld [vmem:[#allocation79_spill] sm:$0xff] (%p8734_p2)  ;;  %v10624_v19 = vld [vmem:[#allocation25_spill] sm:$0xff] (%p8734_p2) }
 0x796   : >> { %10567 = vst [vmem:[#allocation89_spill] sm:$0xff] %v8727_v38  ;;  %v10574_v57 = vmov %v10566_v12  ;;  %v10575_v53 = vmov %v8727_v38  ;;  %v10599_v5 = vmov %v10523_v50  ;;  %v10600_v14 = vmov %v10519_v43  ;;  %v10611_v23 = vld [vmem:[#allocation69_spill] sm:$0xff]  ;;  %v10619_v12 = vld [vmem:[#allocation28_spill] sm:$0xff] (%p8734_p2)  ;;  %2016 = vmatpush1.bf16.xpose.msra.mxu1 (%p8734_p2), %v10624_v19  ;;  %v10628_v47 = vld [vmem:[#allocation29_spill] sm:$0xff] (%p8734_p2) }
 0x797   : >> { %10569 = vst [vmem:[#allocation90_spill] sm:$0xff] %v8729_v49  ;;  %v10572_v60 = vmov %v8729_v49  ;;  %v10576_v38 = vmov %v10575_v53  ;;  %2080 = vmatprep.subr.bf16.mxu0 (%p8734_p2), %v10619_v12  ;;  %v2000_v58 = vpack.c.bf16 (%p8734_p2), %v10621_v55, %v10620_v6  ;;  %2017 = vmatprep.subr.bf16.mxu1 (%p8734_p2), %v10626_v13  ;;  %v10630_v6 = vld [vmem:[#allocation65_spill] sm:$0xff] (%p8734_p2)  ;;  %v10632_v55 = vld [vmem:[#allocation77_spill] sm:$0xff] (%p8734_p2)  ;;  %v2006_v17 = vpack.c.bf16 (%p8734_p2), %v10529_v36, %v10524_v30 }
 0x798   : >> { %v10573_v49 = vmov %v10572_v60  ;;  %v10622_v60 = vld [vmem:[#allocation76_spill] sm:$0xff] (%p8734_p2)  ;;  %2081 = vmatpush1.bf16.xpose.msra.mxu0 (%p8734_p2), %v10625_v9  ;;  %v10633_v19 = vld [vmem:[#allocation74_spill] sm:$0xff] (%p8734_p2)  ;;  %v8899_v31 = vpack.c.bf16 (%p8734_p2), %v10525_v45, %v10519_v43  ;;  %v10635_v30 = vld [vmem:[#allocation64_spill] sm:$0xff] (%p8734_p2)  ;;  %v2010_v36 = vpack.c.bf16 (%p8734_p2), %v10547_v0, %v10538_v59  ;;  %v10649_v27 = vmov (%p8734_p2), 0  }
 0x799   : > { %v8870_v53 = vpack.c.bf16 %v10623_v56, %v10622_v60  ;;  %2082 = vmatprep.subr.bf16.mxu0 %v10627_v54  ;;  %2047 = vmatprep.mubr.bf16.mxu1 %v2000_v58  ;;  %v10631_v56 = vld [vmem:[#allocation73_spill] sm:$0xff]  ;;  %v2001_v52 = vpack.c.bf16 %v10634_v15, %v10633_v19  ;;  %v8888_v54 = vpack.c.bf16 %v8665_v10, %v10523_v50  ;;  %v10636_v43 = vld [vmem:[#allocation71_spill] sm:$0xff] }
 0x79a   : > { %v8882_v60 = vpack.c.bf16 %v10632_v55, %v10631_v56  ;;  %v2005_v50 = vpack.c.bf16 %v8661_v61, %v10520_v29  ;;  %v8906_v10 = vpack.c.bf16 %v10545_v11, %v10536_v32  ;;  %v8918_v29 = vpack.c.bf16 %v10540_v39, %v10531_v62  ;;  %v10637_v45 = vld [vmem:[#allocation81_spill] sm:$0xff]  ;;  %v10638_v61 = vld [vmem:[#allocation82_spill] sm:$0xff]  ;;  %v10644_v62 = vld [vmem:[#allocation83_spill] sm:$0xff] }
 0x79b   : > { %2112 = vmatprep.mubr.bf16.mxu0 %v8870_v53  ;;  %v2009_v32 = vpack.c.bf16 %v10638_v61, %v10637_v45  ;;  %v10639_v16 = vld [vmem:[#allocation85_spill] sm:$0xff]  ;;  %v10642_v4 = vld [vmem:[#allocation86_spill] sm:$0xff]  ;;  %v10645_v39 = vld [vmem:[#allocation87_spill] sm:$0xff] }
 0x79c   : > { %v8937_v57 = vpack.c.bf16 %v10645_v39, %v10644_v62  ;;  %v10646_v9 = vld [vmem:[#allocation84_spill] sm:$0xff] }
 0x79d   : > { %v10640_v59 = vld [vmem:[#allocation89_spill] sm:$0xff]  ;;  %v10647_v41 = vld [vmem:[#allocation88_spill] sm:$0xff] }
 0x79e   : > { %2018 = vmatpush1.bf16.xpose.msra.mxu1 %v10628_v47  ;;  %v8925_v1 = vpack.c.bf16 %v10640_v59, %v10639_v16  ;;  %v10643_v34 = vld [vmem:[#allocation90_spill] sm:$0xff]  ;;  %v2013_v8 = vpack.c.bf16 %v10647_v41, %v10646_v9 }
 0x79f   : > { %2145 = vmatprep.subr.bf16.mxu1 %v2000_v58  ;;  %v2014_v46 = vpack.c.bf16 %v10643_v34, %v10642_v4 }
 0x7a0   : > { %2083 = vmatpush1.bf16.xpose.msra.mxu0 %v10629_v37 }
 0x7a1   : > { %5224 = vmatprep.subr.bf16.mxu0 %v10630_v6 }
 0x7a5   : > { %2048 = vmatmul.mubr.bf16.vlgmr.msra.gmra.mrb[0].mxu1 %v8882_v60 }
 0x7a6   : > { %2146 = vmatpush1.bf16.xpose.msra.mxu1 %v8882_v60  ;;  %2055 = vmatprep.mubr.bf16.mxu1 %v8888_v54 }
 0x7a7   : > { %2113 = vmatmul.mubr.bf16.vlgmr.msra.gmra.mrb[0].mxu0 %v2001_v52  ;;  %2147 = vmatprep.subr.bf16.mxu1 %v8888_v54 }
 0x7a8   : > { %2120 = vmatprep.mubr.bf16.mxu0 %v2006_v17  ;;  %5225 = vmatpush3.bf16.msra.mxu0 %v10630_v6 }
 0x7a9   : > { %5226 = vmatprep.subr.bf16.mxu0 %v10635_v30 }
 0x7ac   : > { %5227 = vmatpush3.bf16.msra.mxu0 %v10635_v30 }
 0x7ad   : > { %2056 = vmatmul.mubr.bf16.gmra.mrb[4].mxu1 %v8899_v31  ;;  %5228 = vmatprep.subr.bf16.mxu0 %v10636_v43 }
 0x7ae   : > { %2148 = vmatpush1.bf16.xpose.msra.mxu1 %v8899_v31  ;;  %2063 = vmatprep.mubr.bf16.mxu1 %v8906_v10 }
 0x7af   : > { %2121 = vmatmul.mubr.bf16.gmra.mrb[4].mxu0 %v2005_v50  ;;  %2149 = vmatprep.subr.bf16.mxu1 %v8906_v10 }
 0x7b0   : > { %2128 = vmatprep.mubr.bf16.mxu0 %v2010_v36  ;;  %5229 = vmatpush3.bf16.msra.mxu0 %v10636_v43 }
 0x7b1   : > { %5230 = vmatprep.subr.bf16.mxu0 %v10641_v26 }
 0x7b4   : > { %5231 = vmatpush3.bf16.msra.mxu0 %v10641_v26 }
 0x7b5   : > { %2064 = vmatmul.mubr.bf16.gmra.mrb[8].mxu1 %v8918_v29  ;;  %2425 = vmatprep.subr.bf16.mxu0 %v2000_v58 }
 0x7b6   : > { %2150 = vmatpush1.bf16.xpose.msra.mxu1 %v8918_v29  ;;  %2071 = vmatprep.mubr.bf16.mxu1 %v8925_v1 }
 0x7b7   : > { %2129 = vmatmul.mubr.bf16.gmra.mrb[8].mxu0 %v2009_v32  ;;  %2151 = vmatprep.subr.bf16.mxu1 %v8925_v1 }
 0x7b8   : > { %2136 = vmatprep.mubr.bf16.mxu0 %v2014_v46 }
 0x7bd   : > { %2072 = vmatmul.mubr.bf16.gmra.mrb[12].mxu1 %v8937_v57 }
 0x7be   : > { %2152 = vmatpush1.bf16.xpose.msra.mxu1 %v8937_v57  ;;  %2177 = vmatprep.mubr.bf16.mxu1 %v2000_v58  ;;  %v10648_v58 = vld [vmem:[#allocation35_spill] sm:$0xff] }
 0x7bf   : > { %2137 = vmatmul.mubr.bf16.gmra.mrb[12].mxu0 %v2013_v8  ;;  %2210 = vmatprep.subr.bf16.mxu1 %v8870_v53 }
 0x7c5   : > { %2178 = vmatmul.mubr.bf16.vlgmr.msra.gmra.mrb[16].mxu1 %v8882_v60 }
 0x7c6   : > { %2211 = vmatpush1.bf16.xpose.msra.mxu1 %v2001_v52  ;;  %2185 = vmatprep.mubr.bf16.mxu1 %v8888_v54 }
 0x7c7   : > { %2212 = vmatprep.subr.bf16.mxu1 %v2006_v17 }
 0x7cd   : > { %2186 = vmatmul.mubr.bf16.gmra.mrb[20].mxu1 %v8899_v31 }
 0x7ce   : > { %2213 = vmatpush1.bf16.xpose.msra.mxu1 %v2005_v50  ;;  %2193 = vmatprep.mubr.bf16.mxu1 %v8906_v10 }
 0x7cf   : > { %2214 = vmatprep.subr.bf16.mxu1 %v2010_v36 }
 0x7d5   : > { %2194 = vmatmul.mubr.bf16.gmra.mrb[24].mxu1 %v8918_v29 }
 0x7d6   : > { %2215 = vmatpush1.bf16.xpose.msra.mxu1 %v2009_v32  ;;  %2201 = vmatprep.mubr.bf16.mxu1 %v8925_v1 }
 0x7d7   : > { %2216 = vmatprep.subr.bf16.mxu1 %v2014_v46 }
 0x7dd   : > { %2202 = vmatmul.mubr.bf16.gmra.mrb[28].mxu1 %v8937_v57 }
 0x7de   : > { %2217 = vmatpush1.bf16.xpose.msra.mxu1 %v2013_v8  ;;  %2242 = vmatprep.mubr.bf16.mxu1 %v8870_v53 }
 0x7df   : > { %2478 = vmatprep.subr.bf16.mxu1 %v8870_v53 }
 0x7e5   : > { %2243 = vmatmul.mubr.bf16.vlgmr.msra.gmra.mrb[16].mxu1 %v2001_v52 }
 0x7e6   : > { %2250 = vmatprep.mubr.bf16.mxu1 %v2006_v17  ;;  %2479 = vmatpush1.bf16.msra.mxu1 %v2001_v52 }
 0x7e7   : > { %2480 = vmatprep.subr.bf16.mxu1 %v2006_v17 }
 0x7ea   : > { %2481 = vmatpush1.bf16.msra.mxu1 %v2005_v50 }
 0x7eb   : > { %2482 = vmatprep.subr.bf16.mxu1 %v2010_v36 }
 0x7ed   : > { %2251 = vmatmul.mubr.bf16.gmra.mrb[20].mxu1 %v2005_v50 }
 0x7ee   : > { %2258 = vmatprep.mubr.bf16.mxu1 %v2010_v36  ;;  %2483 = vmatpush1.bf16.msra.mxu1 %v2009_v32 }
 0x7ef   : > { %2484 = vmatprep.subr.bf16.mxu1 %v2014_v46 }
 0x7f2   : > { %2485 = vmatpush1.bf16.msra.mxu1 %v2013_v8 }
 0x7f3   : > { %5350 = vmatprep.subr.bf16.mxu1 %v10648_v58 }
 0x7f5   : > { %2259 = vmatmul.mubr.bf16.gmra.mrb[24].mxu1 %v2009_v32 }
 0x7f6   : > { %2266 = vmatprep.mubr.bf16.mxu1 %v2014_v46 }
 0x7fd   : > { %2267 = vmatmul.mubr.bf16.gmra.mrb[28].mxu1 %v2013_v8 }
 0x7fe   : > { %2510 = vmatprep.mubr.bf16.mxu1 %v10649_v27 }
 0x878   : > { %v2049_v11 = vpop.f32.mrb[0].mxu1 }
 0x879   : > { %v2051_v7 = vpop.f32.mrb[1].mxu1 }
 0x87a   : > { %v2114_v53 = vpop.f32.mrb[0].mxu0  ;;  %v2052_v0 = vpop.f32.mrb[2].mxu1 }
 0x87b   : > { %v8955_v42 = vadd.f32 %v2114_v53, %v2049_v11  ;;  %v2116_v28 = vpop.f32.mrb[1].mxu0  ;;  %v2054_v40 = vpop.f32.mrb[3].mxu1 }
 0x87c   : > { %v2117_v33 = vpop.f32.mrb[2].mxu0 }
 0x87d   : > { %v8957_v63 = vadd.f32 %v2117_v33, %v2052_v0  ;;  %v2119_v35 = vpop.f32.mrb[3].mxu0 }
 0x880   : > { %v2057_v48 = vpop.f32.mrb[4].mxu1 }
 0x881   : > { %v2059_v21 = vpop.f32.mrb[5].mxu1 }
 0x882   : > { %v2122_v22 = vpop.f32.mrb[4].mxu0  ;;  %v2060_v44 = vpop.f32.mrb[6].mxu1 }
 0x883   : > { %v8959_v20 = vadd.f32 %v2122_v22, %v2057_v48  ;;  %v2124_v51 = vpop.f32.mrb[5].mxu0  ;;  %v2062_v2 = vpop.f32.mrb[7].mxu1  ;;  %v10651_v48 = vld [vmem:[#allocation61_spill] sm:$0xff] }
 0x884   : > { %v2125_v38 = vpop.f32.mrb[6].mxu0  ;;  %v2283_v22 = vmul.f32 %v8955_v42, %v10651_v48  ;;  %v10652_v51 = vld [vmem:[#allocation62_spill] sm:$0xff]  ;;  %v9058_v48 = vld [vmem:[%s7743_s17 + $0x160] sm:$0xff]  }
 0x885   : > { %v8961_v18 = vadd.f32 %v2125_v38, %v2060_v44  ;;  %v2127_v5 = vpop.f32.mrb[7].mxu0 }
 0x886   : > { %v10653_v5 = vld [vmem:[#allocation63_spill] sm:$0xff] }
 0x887   : > { %v2286_v44 = vmul.f32 %v8961_v18, %v10652_v51  ;;  %v9065_v51 = vld [vmem:[%s7743_s17 + $0x1a8] sm:$0xff]  }
 0x888   : > { %v2065_v25 = vpop.f32.mrb[8].mxu1 }
 0x889   : > { %v2067_v3 = vpop.f32.mrb[9].mxu1 }
 0x88a   : > { %v2130_v49 = vpop.f32.mrb[8].mxu0  ;;  %v2068_v23 = vpop.f32.mrb[10].mxu1 }
 0x88b   : > { %v8963_v14 = vadd.f32 %v2130_v49, %v2065_v25  ;;  %v2132_v12 = vpop.f32.mrb[9].mxu0  ;;  %v2070_v47 = vpop.f32.mrb[11].mxu1  ;;  %v2284_v25 = vmul.f32 %v8957_v63, %v10653_v5  ;;  %v10654_v63 = vld [vmem:[#allocation66_spill] sm:$0xff]  ;;  %v9073_v5 = vld [vmem:[%s7743_s17 + $0x180] sm:$0xff]  }
 0x88c   : > { %v2133_v24 = vpop.f32.mrb[10].mxu0 }
 0x88d   : > { %v8965_v13 = vadd.f32 %v2133_v24, %v2068_v23  ;;  %v2135_v37 = vpop.f32.mrb[11].mxu0 }
 0x890   : > { %v2073_v6 = vpop.f32.mrb[12].mxu1 }
 0x891   : > { %v2075_v19 = vpop.f32.mrb[13].mxu1 }
 0x892   : > { %v2138_v56 = vpop.f32.mrb[12].mxu0  ;;  %v2076_v52 = vpop.f32.mrb[14].mxu1 }
 0x893   : > { %v8967_v55 = vadd.f32 %v2138_v56, %v2073_v6  ;;  %v2140_v15 = vpop.f32.mrb[13].mxu0  ;;  %v2078_v30 = vpop.f32.mrb[15].mxu1 }
 0x894   : > { %v2141_v17 = vpop.f32.mrb[14].mxu0 }
 0x895   : > { %v8969_v50 = vadd.f32 %v2141_v17, %v2076_v52  ;;  %v2143_v36 = vpop.f32.mrb[15].mxu0  ;;  %v2289_v19 = vmul.f32 %v8967_v55, %v10654_v63  ;;  %v10655_v52 = vld [vmem:[#allocation67_spill] sm:$0xff]  ;;  %v9111_v63 = vld [vmem:[%s7743_s17 + $0x198] sm:$0xff]  }
 0x896   : > { %v2287_v17 = vmul.f32 %v8963_v14, %v10655_v52  ;;  %v10656_v36 = vld [vmem:[#allocation68_spill] sm:$0xff] }
 0x8b8   : > { %v2244_v43 = vpop.f32.mrb[16].mxu1 }
 0x8b9   : > { %v2246_v45 = vpop.f32.mrb[17].mxu1 }
 0x8ba   : > { %v2247_v61 = vpop.f32.mrb[18].mxu1 }
 0x8bb   : > { %v2275_v32 = vpack.c.bf16 %v2247_v61, %v2244_v43  ;;  %v2249_v16 = vpop.f32.mrb[19].mxu1  ;;  %v2290_v43 = vmul.f32 %v8969_v50, %v10656_v36  ;;  %v9127_v36 = vld [vmem:[%s7743_s17 + $0x1d8] sm:$0xff]  }
 0x8bd   : > { %5232 = vmatprep.mubr.msk.bf16.mxu0 %vm1420_vm4, %v2275_v32  ;;  %v10657_v32 = vld [vmem:[#allocation69_spill] sm:$0xff] }
 0x8be   : > { %v2288_v16 = vmul.f32 %v8965_v13, %v10657_v32  ;;  %v10658_v13 = vld [vmem:[#allocation33_spill] sm:$0xff]  ;;  %v9137_v32 = vld [vmem:[%s7743_s17 + $0x1d0] sm:$0xff]  }
 0x8c0   : > { %v2252_v59 = vpop.f32.mrb[20].mxu1 }
 0x8c1   : > { %v2254_v26 = vpop.f32.mrb[21].mxu1 }
 0x8c2   : > { %v2255_v4 = vpop.f32.mrb[22].mxu1 }
 0x8c3   : > { %v2276_v34 = vpack.c.bf16 %v2255_v4, %v2252_v59  ;;  %v2257_v46 = vpop.f32.mrb[23].mxu1 }
 0x8c5   : > { %5233 = vmatmul.mubr.msk.bf16.vlgmr.msra.gmra.mrb[16].mxu0 %vm1420_vm4, %v2276_v34 }
 0x8c6   : > { %2426 = vmatpush1.bf16.msra.mxu0 %v8882_v60 }
 0x8c7   : > { %2427 = vmatprep.subr.bf16.mxu0 %v8888_v54 }
 0x8c8   : > { %v2260_v62 = vpop.f32.mrb[24].mxu1 }
 0x8c9   : > { %v2262_v39 = vpop.f32.mrb[25].mxu1 }
 0x8ca   : > { %v2263_v9 = vpop.f32.mrb[26].mxu1  ;;  %2428 = vmatpush1.bf16.msra.mxu0 %v8899_v31  ;;  %v9007_v39 = vld [vmem:[%s7743_s17 + $0x108] sm:$0xff]  }
 0x8cb   : > { %v2277_v41 = vpack.c.bf16 %v2263_v9, %v2260_v62  ;;  %v2265_v8 = vpop.f32.mrb[27].mxu1  ;;  %2429 = vmatprep.subr.bf16.mxu0 %v8906_v10  ;;  %v10659_v62 = vld [vmem:[#allocation39_spill] sm:$0xff]  ;;  %v9010_v9 = vld [vmem:[%s7743_s17 + $0x128] sm:$0xff]  }
 0x8cc   : > { %v9017_v8 = vld [vmem:[%s7743_s17 + $0x1e8] sm:$0xff]  }
 0x8cd   : > { %5236 = vmatprep.mubr.msk.bf16.mxu0 %vm1420_vm4, %v2277_v41  ;;  %v9014_v41 = vld [vmem:[%s7743_s17 + $0x1c8] sm:$0xff]  }
 0x8ce   : > { %2430 = vmatpush1.bf16.msra.mxu0 %v8918_v29 }
 0x8cf   : > { %2431 = vmatprep.subr.bf16.mxu0 %v8925_v1 }
 0x8d0   : > { %v2268_v11 = vpop.f32.mrb[28].mxu1 }
 0x8d1   : > { %v2270_v53 = vpop.f32.mrb[29].mxu1 }
 0x8d2   : > { %v2271_v60 = vpop.f32.mrb[30].mxu1  ;;  %2432 = vmatpush1.bf16.msra.mxu0 %v8937_v57  ;;  %v10650_v57 = vld [vmem:[#allocation60_spill] sm:$0xff] }
 0x8d3   : > { %v2278_v54 = vpack.c.bf16 %v2271_v60, %v2268_v11  ;;  %v2273_v7 = vpop.f32.mrb[31].mxu1  ;;  %2580 = vmatprep.subr.bf16.mxu0 %v10648_v58  ;;  %v2285_v35 = vmul.f32 %v8959_v20, %v10650_v57  ;;  %v2565_v11 = vpack.c.bf16 %v9010_v9, %v9007_v39  ;;  %v2577_v60 = vpack.c.bf16 %v9017_v8, %v9014_v41 }
 0x8d4   : > { %v9028_v7 = vld [vmem:[%s7743_s17 + $0x100] sm:$0xff]  }
 0x8d5   : > { %5237 = vmatmul.mubr.msk.bf16.gmra.mrb[20].mxu0 %vm1420_vm4, %v2278_v54  ;;  %v10660_v54 = vld [vmem:[#allocation37_spill] sm:$0xff] }
 0x8d6   : > { %2457 = vmatprep.mubr.bf16.mxu0 %v10649_v27 }
 0x998   : > { %v5234_v31 = vpop.f32.mrb[16].mxu0 }
 0x999   : > { %v2347_v10 = vadd.f32 1e-06, %v5234_v31  ;;  %v2338_v28 = vpop.f32.mrb[17].mxu0  ;;  %v9031_v31 = vld [vmem:[%s7743_s17 + $0x120] sm:$0xff]  }
 0x99a   : > { %v2339_v0 = vadd.f32 1e-06, %v2338_v28  ;;  %v5235_v29 = vpop.f32.mrb[18].mxu0  ;;  %v9035_v28 = vld [vmem:[%s7743_s17 + $0x148] sm:$0xff]  }
 0x99b   : > { %6339 = vrcp.f32 %v2347_v10  ;;  %v2350_v1 = vadd.f32 1e-06, %v5235_v29  ;;  %v2341_v33 = vpop.f32.mrb[19].mxu0  ;;  %v10661_v10 = vld [vmem:[#allocation36_spill] sm:$0xff]  ;;  %v9042_v29 = vld [vmem:[%s7743_s17 + $0x1c0] sm:$0xff]  }
 0x99c   : > { %6341 = vrcp.f32 %v2339_v0  ;;  %v2342_v40 = vadd.f32 1e-06, %v2341_v33  ;;  %v9038_v0 = vld [vmem:[%s7743_s17 + $0x168] sm:$0xff]   ;;  %v2564_v33 = vpack.c.bf16 %v9031_v31, %v9028_v7 }
 0x99d   : > { %6343 = vrcp.f32 %v2350_v1  ;;  %v9045_v1 = vld [vmem:[%s7743_s17 + $0x1e0] sm:$0xff]  }
 0x99e   : > { %6345 = vrcp.f32 %v2342_v40  ;;  %v2569_v40 = vpack.c.bf16 %v9038_v0, %v9035_v28  ;;  %v2576_v57 = vpack.c.bf16 %v9045_v1, %v9042_v29 }
 0x9a5   : > { %v6340_v58 = vpop.eup %6339 }
 0x9a6   : > { %v6342_v21 = vpop.eup %6341  ;;  %v2374_v38 = vmul.f32 %v6340_v58, %v2285_v35  ;;  %v10662_v35 = vld [vmem:[#allocation34_spill] sm:$0xff]  ;;  %v9055_v58 = vld [vmem:[%s7743_s17 + $0x140] sm:$0xff]  }
 0x9a7   : > { %v6344_v2 = vpop.eup %6343  ;;  %v2370_v49 = vmul.f32 %v6342_v21, %v2283_v22  ;;  %v10663_v22 = vld [vmem:[#allocation40_spill] sm:$0xff]  ;;  %v9062_v21 = vld [vmem:[%s7743_s17 + $0x188] sm:$0xff]  }
 0x9a8   : > { %v6346_v3 = vpop.eup %6345  ;;  %v5238_v12 = vpop.f32.mrb[20].mxu0  ;;  %v2376_v23 = vmul.f32 %v6344_v2, %v2286_v44  ;;  %v2568_v44 = vpack.c.bf16 %v9058_v48, %v9055_v58  ;;  %v10664_v2 = vld [vmem:[#allocation38_spill] sm:$0xff] }
 0x9a9   : > { %v2363_v24 = vadd.f32 1e-06, %v5238_v12  ;;  %2385 = vxpose.xlu0.b32.start [1/8] (short) (narrow) %v2370_v49, 32  ;;  %v2354_v20 = vpop.f32.mrb[21].mxu0  ;;  %v2372_v47 = vmul.f32 %v6346_v3, %v2284_v25  ;;  %v9076_v25 = vld [vmem:[%s7743_s17 + $0x1a0] sm:$0xff]   ;;  %v9079_v49 = vld [vmem:[%s7743_s17 + $0x118] sm:$0xff]  }
 0x9aa   : > { %v2355_v37 = vadd.f32 1e-06, %v2354_v20  ;;  %v5239_v6 = vpop.f32.mrb[22].mxu0  ;;  %v9082_v3 = vld [vmem:[%s7743_s17 + $0x138] sm:$0xff]   ;;  %v2572_v12 = vpack.c.bf16 %v9076_v25, %v9073_v5  ;;  %v9092_v20 = vld [vmem:[%s7743_s17 + $0x130] sm:$0xff]  }
 0x9ab   : > { %6347 = vrcp.f32 %v2363_v24  ;;  %v2366_v42 = vadd.f32 1e-06, %v5239_v6  ;;  %v2357_v56 = vpop.f32.mrb[23].mxu0  ;;  %v9089_v24 = vld [vmem:[%s7743_s17 + $0x110] sm:$0xff]  }
 0x9ac   : > { %6349 = vrcp.f32 %v2355_v37  ;;  %v2358_v18 = vadd.f32 1e-06, %v2357_v56  ;;  %v9098_v37 = vld [vmem:[%s7743_s17 + $0x178] sm:$0xff]   ;;  %v2566_v6 = vpack.c.bf16 %v9092_v20, %v9089_v24  ;;  %v9105_v56 = vld [vmem:[%s7743_s17 + $0x150] sm:$0xff]  }
 0x9ad   : > { %6351 = vrcp.f32 %v2366_v42  ;;  %2386 = vxpose.xlu0.b32.cont [2/8] (short) (narrow) %v2372_v47, 32  ;;  %v9095_v47 = vld [vmem:[%s7743_s17 + $0x158] sm:$0xff]  }
 0x9ae   : > { %6353 = vrcp.f32 %v2358_v18  ;;  %v2571_v42 = vpack.c.bf16 %v9098_v37, %v9095_v47  ;;  %v9108_v18 = vld [vmem:[%s7743_s17 + $0x170] sm:$0xff]  }
 0x9b1   : > { %2387 = vxpose.xlu0.b32.cont [3/8] (short) (narrow) %v2374_v38, 32  ;;  %v2573_v38 = vpack.c.bf16 %v9065_v51, %v9062_v21 }
 0x9b5   : > { %v6348_v15 = vpop.eup %6347  ;;  %2388 = vxpose.xlu0.b32.cont [4/8] (short) (narrow) %v2376_v23, 32  ;;  %v2567_v23 = vpack.c.bf16 %v9082_v3, %v9079_v49 }
 0x9b6   : > { %v6350_v30 = vpop.eup %6349  ;;  %v2382_v45 = vmul.f32 %v6348_v15, %v2289_v19  ;;  %v9114_v19 = vld [vmem:[%s7743_s17 + $0x1b8] sm:$0xff]   ;;  %v2570_v15 = vpack.c.bf16 %v9108_v18, %v9105_v56 }
 0x9b7   : > { %v6352_v61 = vpop.eup %6351  ;;  %v2378_v59 = vmul.f32 %v6350_v30, %v2287_v17  ;;  %v2575_v52 = vpack.c.bf16 %v9114_v19, %v9111_v63  ;;  %v9121_v17 = vld [vmem:[%s7743_s17 + $0x190] sm:$0xff]  }
 0x9b8   : > { %v6354_v26 = vpop.eup %6353  ;;  %v2384_v4 = vmul.f32 %v6352_v61, %v2290_v43  ;;  %v9124_v30 = vld [vmem:[%s7743_s17 + $0x1b0] sm:$0xff]   ;;  %v9130_v43 = vld [vmem:[%s7743_s17 + $0x1f8] sm:$0xff]  }
 0x9b9   : > { %2389 = vxpose.xlu0.b32.cont [5/8] (short) (narrow) %v2378_v59, 32  ;;  %v2380_v55 = vmul.f32 %v6354_v26, %v2288_v16  ;;  %v2579_v61 = vpack.c.bf16 %v9130_v43, %v9127_v36  ;;  %v9140_v16 = vld [vmem:[%s7743_s17 + $0x1f0] sm:$0xff]  }
 0x9ba   : > { %v2578_v59 = vpack.c.bf16 %v9140_v16, %v9137_v32 }
 0x9bd   : > { %2390 = vxpose.xlu0.b32.cont [6/8] (short) (narrow) %v2380_v55, 32 }
 0x9c1   : > { %2391 = vxpose.xlu0.b32.cont [7/8] (short) (narrow) %v2382_v45, 32  ;;  %v2574_v45 = vpack.c.bf16 %v9124_v30, %v9121_v17 }
 0x9c5   : > { %2392 = vxpose.xlu0.b32.end [8/8] (short) (narrow) %v2384_v4, 32 }
 0xa29   : > { %v2401_v14 = vpop.trf.xlu0 }
 0xa2d   : > { %v2402_v34 = vpop.trf.xlu0 }
 0xa2e   : > { %v2417_v50 = vpack.c.bf16 %v2402_v34, %v2401_v14 }
 0xa30   : > { %5051 = vmatmul.mubr.msk.bf16.vlgmr.msra.gmra.mrb[24].mxu0 %vm1420_vm4, %v2417_v50  ;;  %5053 = vmatmul.mubr.msk.bf16.vlgmr.msra.gmra.mrb[32].mxu1 %vm1420_vm4, %v2417_v50 }
 0xa31   : > { %2581 = vmatpush1.bf16.xpose.msra.mxu0 %v10658_v13  ;;  %v2403_v46 = vpop.trf.xlu0  ;;  %2467 = vmatprep.mubr.bf16.mxu0 %v10649_v27 }
 0xa32   : > { %2520 = vmatprep.mubr.bf16.mxu1 %v10649_v27  ;;  %2582 = vmatprep.subr.bf16.mxu0 %v10659_v62 }
 0xa33   : > { %5352 = vmatpush1.bf16.xpose.msra.mxu1 %v10658_v13 }
 0xa34   : > { %5351 = vmatprep.subr.bf16.mxu1 %v10659_v62 }
 0xa35   : > { %v2404_v27 = vpop.trf.xlu0 }
 0xa36   : > { %v2418_v53 = vpack.c.bf16 %v2404_v27, %v2403_v46 }
 0xa38   : > { %5052 = vmatmul.mubr.msk.bf16.gmra.mrb[28].mxu0 %vm1420_vm4, %v2418_v53  ;;  %5054 = vmatmul.mubr.msk.bf16.gmra.mrb[36].mxu1 %vm1420_vm4, %v2418_v53 }
 0xa39   : > { %2583 = vmatpush1.bf16.xpose.msra.mxu0 %v10660_v54  ;;  %2612 = vmatprep.mubr.bf16.mxu0 %v2565_v11 }
 0xa3a   : > { %2645 = vmatprep.subr.bf16.mxu0 %v10661_v10  ;;  %2636 = vmatprep.mubr.bf16.mxu1 %v2577_v60 }
 0xa3b   : > { %5353 = vmatpush1.bf16.xpose.msra.mxu1 %v10660_v54 }
 0xa40   : > { %2613 = vmatmul.mubr.bf16.vlgmr.msra.gmra.mrb[32].mxu0 %v2564_v33 }
 0xa41   : > { %2646 = vmatpush1.bf16.xpose.msra.mxu0 %v10662_v35  ;;  %2620 = vmatprep.mubr.bf16.mxu0 %v2569_v40 }
 0xa42   : > { %2647 = vmatprep.subr.bf16.mxu0 %v10663_v22  ;;  %2637 = vmatmul.mubr.bf16.vlgmr.msra.gmra.mrb[40].mxu1 %v2576_v57 }
 0xa48   : > { %2621 = vmatmul.mubr.bf16.gmra.mrb[36].mxu0 %v2568_v44 }
 0xa49   : > { %2648 = vmatpush1.bf16.xpose.msra.mxu0 %v10664_v2  ;;  %2628 = vmatprep.mubr.bf16.mxu0 %v2573_v38 }
 0xa50   : > { %2629 = vmatmul.mubr.bf16.gmra.mrb[40].mxu0 %v2572_v12 }
 0xa51   : > { %2677 = vmatprep.mubr.bf16.mxu0 %v2567_v23 }
 0xa58   : > { %2678 = vmatmul.mubr.bf16.vlgmr.msra.gmra.mrb[32].mxu0 %v2566_v6 }
 0xa59   : > { %2685 = vmatprep.mubr.bf16.mxu0 %v2571_v42 }
 0xa60   : > { %2686 = vmatmul.mubr.bf16.gmra.mrb[36].mxu0 %v2570_v15 }
 0xa61   : > { %2693 = vmatprep.mubr.bf16.mxu0 %v2575_v52 }
 0xa68   : > { %2694 = vmatmul.mubr.bf16.gmra.mrb[40].mxu0 %v2574_v45 }
 0xa69   : > { %2701 = vmatprep.mubr.bf16.mxu0 %v2579_v61 }
 0xa70   : > { %2702 = vmatmul.mubr.bf16.gmra.mrb[44].mxu0 %v2578_v59 }
 0xb03   : > { %v9144_v26 = vpop.f32.mrb[24].mxu0  ;;  %v9146_v4 = vpop.f32.mrb[32].mxu1 }
 0xb04   : > { %10665 = vst [vmem:[#allocation27_spill] sm:$0xff] %v9144_v26  ;;  %10666 = vst [vmem:[#allocation41_spill] sm:$0xff] %v9146_v4  ;;  %v9148_v55 = vpop.f32.mrb[25].mxu0  ;;  %v9150_v14 = vpop.f32.mrb[33].mxu1 }
 0xb05   : > { %10667 = vst [vmem:[#allocation28_spill] sm:$0xff] %v9148_v55  ;;  %10668 = vst [vmem:[#allocation75_spill] sm:$0xff] %v9150_v14  ;;  %v9152_v34 = vpop.f32.mrb[26].mxu0  ;;  %v9154_v50 = vpop.f32.mrb[34].mxu1 }
 0xb06   : > { %10669 = vst [vmem:[#allocation79_spill] sm:$0xff] %v9152_v34  ;;  %10670 = vst [vmem:[#allocation76_spill] sm:$0xff] %v9154_v50  ;;  %v9156_v13 = vpop.f32.mrb[27].mxu0  ;;  %v9158_v46 = vpop.f32.mrb[35].mxu1 }
 0xb07   : > { %10671 = vst [vmem:[#allocation80_spill] sm:$0xff] %v9156_v13  ;;  %10672 = vst [vmem:[#allocation25_spill] sm:$0xff] %v9158_v46 }
 0xb0b   : > { %v9160_v62 = vpop.f32.mrb[28].mxu0  ;;  %v9162_v27 = vpop.f32.mrb[36].mxu1 }
 0xb0c   : > { %10673 = vst [vmem:[#allocation26_spill] sm:$0xff] %v9160_v62  ;;  %10674 = vst [vmem:[#allocation31_spill] sm:$0xff] %v9162_v27  ;;  %v9164_v11 = vpop.f32.mrb[29].mxu0  ;;  %v9166_v53 = vpop.f32.mrb[37].mxu1 }
 0xb0d   : > { %10675 = vst [vmem:[#allocation32_spill] sm:$0xff] %v9164_v11  ;;  %10676 = vst [vmem:[#allocation29_spill] sm:$0xff] %v9166_v53  ;;  %v9168_v60 = vpop.f32.mrb[30].mxu0  ;;  %v9170_v54 = vpop.f32.mrb[38].mxu1 }
 0xb0e   : > { %10677 = vst [vmem:[#allocation30_spill] sm:$0xff] %v9168_v60  ;;  %10678 = vst [vmem:[#allocation65_spill] sm:$0xff] %v9170_v54  ;;  %v9172_v10 = vpop.f32.mrb[31].mxu0  ;;  %v9174_v33 = vpop.f32.mrb[39].mxu1 }
 0xb0f   : > { %10679 = vst [vmem:[#allocation73_spill] sm:$0xff] %v9172_v10  ;;  %10680 = vst [vmem:[#allocation77_spill] sm:$0xff] %v9174_v33 }
 0xb15   : > { %v2638_v40 = vpop.f32.mrb[40].mxu1 }
 0xb16   : > { %v2640_v57 = vpop.f32.mrb[41].mxu1 }
 0xb17   : > { %v2641_v35 = vpop.f32.mrb[42].mxu1 }
 0xb18   : > { %v2643_v22 = vpop.f32.mrb[43].mxu1 }
 0xb2b   : > { %v2679_v44 = vpop.f32.mrb[32].mxu0 }
 0xb2c   : > { %v2681_v38 = vpop.f32.mrb[33].mxu0  ;;  %v2710_v45 = vsel %vm466_vm2, %v2679_v44, -inf }
 0xb2d   : > { %v2682_v2 = vpop.f32.mrb[34].mxu0 }
 0xb2e   : > { %v2684_v12 = vpop.f32.mrb[35].mxu0  ;;  %v2711_v57 = vsel %vm466_vm2, %v2682_v2, -inf }
 0xb33   : > { %v2687_v23 = vpop.f32.mrb[36].mxu0 }
 0xb34   : > { %v2689_v6 = vpop.f32.mrb[37].mxu0 }
 0xb35   : > { %v2690_v42 = vpop.f32.mrb[38].mxu0 }
 0xb36   : > { %v2692_v15 = vpop.f32.mrb[39].mxu0 }
 0xb37   : > { %v2712_v15 = vsel %vm466_vm2, %v2687_v23, -inf }
 0xb3b   : > { %v2695_v52 = vpop.f32.mrb[40].mxu0 }
 0xb3c   : > { %v2714_v61 = vsel %vm466_vm2, %v2695_v52, -inf  ;;  %v2697_v59 = vpop.f32.mrb[41].mxu0 }
 0xb3d   : > { %v2715_v54 = vmax.f32 %v2710_v45, %v2714_v61  ;;  %v2698_v27 = vpop.f32.mrb[42].mxu0  ;;  %v2713_v45 = vsel %vm466_vm2, %v2690_v42, -inf }
 0xb3e   : > { %v2716_v22 = vsel %vm466_vm2, %v2698_v27, -inf  ;;  %v2700_v33 = vpop.f32.mrb[43].mxu0 }
 0xb3f   : > { %v2717_v38 = vmax.f32 %v2711_v57, %v2716_v22 }
 0xb41   : > { %v2722_v53 = vmax.f32 %v2715_v54, %v2717_v38 }
 0xb43   : > { %v2703_v12 = vpop.f32.mrb[44].mxu0 }
 0xb44   : > { %v2704_v50 = vadd.f32 %v2703_v12, %v2638_v40  ;;  %v2705_v6 = vpop.f32.mrb[45].mxu0 }
 0xb45   : > { %v2706_v4 = vpop.f32.mrb[46].mxu0 }
 0xb46   : > { %v2718_v46 = vsel %vm466_vm2, %v2704_v50, -inf  ;;  %v2707_v14 = vadd.f32 %v2706_v4, %v2641_v35  ;;  %v2708_v60 = vpop.f32.mrb[47].mxu0 }
 0xb47   : > { %v2719_v59 = vmax.f32 %v2712_v15, %v2718_v46 }
 0xb48   : > { %v2720_v61 = vsel %vm466_vm2, %v2707_v14, -inf }
 0xb49   : > { %v2721_v62 = vmax.f32 %v2713_v45, %v2720_v61 }
 0xb4b   : > { %v2723_v10 = vmax.f32 %v2719_v59, %v2721_v62 }
 0xb4d   : > { %v2724_v33 = vmax.f32 %v2722_v53, %v2723_v10 }
 0xb4f   : > { %v2725_v57 = vrot.slane %v2724_v33, 4 }
 0xb51   : > { %v2726_v54 = vmax.f32 %v2724_v33, %v2725_v57 }
 0xb53   : > { %v2727_v22 = vrot.slane %v2726_v54, 2 }
 0xb55   : > { %v2728_v40 = vmax.f32 %v2726_v54, %v2727_v22 }
 0xb57   : > { %v2729_v38 = vrot.slane %v2728_v40, 1 }
 0xb59   : > { %v2730_v12 = vmax.f32 %v2728_v40, %v2729_v38 }
 0xb5b   : > { %v2731_v6 = vsub.f32 %v2679_v44, %v2730_v12  ;;  %v2732_v11 = vsub.f32 %v2682_v2, %v2730_v12  ;;  %v2733_v34 = vsub.f32 %v2687_v23, %v2730_v12  ;;  %v2734_v26 = vsub.f32 %v2690_v42, %v2730_v12 }
 0xb5c   : > { %v2735_v4 = vsub.f32 %v2695_v52, %v2730_v12  ;;  %v2736_v60 = vsub.f32 %v2698_v27, %v2730_v12  ;;  %v2737_v46 = vsub.f32 %v2704_v50, %v2730_v12  ;;  %v2738_v35 = vsub.f32 %v2707_v14, %v2730_v12 }
 0xb5d   : > { %v2739_v15 = vmul.f32 1.442695, %v2731_v6  ;;  %v2741_v13 = vmul.f32 1.442695, %v2732_v11  ;;  %v2743_v55 = vmul.f32 1.442695, %v2733_v34 }
 0xb5e   : > { %v2745_v45 = vmul.f32 1.442695, %v2734_v26  ;;  %v2747_v62 = vmul.f32 1.442695, %v2735_v4  ;;  %v2749_v53 = vmul.f32 1.442695, %v2736_v60 }
 0xb5f   : > { %6355 = vpow2.f32 %v2739_v15  ;;  %v2751_v10 = vmul.f32 1.442695, %v2737_v46  ;;  %v2753_v44 = vmul.f32 1.442695, %v2738_v35 }
 0xb60   : > { %6357 = vpow2.f32 %v2741_v13 }
 0xb61   : > { %6359 = vpow2.f32 %v2743_v55 }
 0xb62   : > { %6361 = vpow2.f32 %v2745_v45 }
 0xb63   : > { %6363 = vpow2.f32 %v2747_v62 }
 0xb64   : > { %6365 = vpow2.f32 %v2749_v53 }
 0xb65   : > { %6367 = vpow2.f32 %v2751_v10 }
 0xb66   : > { %6369 = vpow2.f32 %v2753_v44 }
 0xb69   : > { %v6356_v2 = vpop.eup %6355 }
 0xb6a   : > { %v6358_v23 = vpop.eup %6357  ;;  %v2755_v14 = vsel %vm466_vm2, %v6356_v2, 0.0 }
 0xb6b   : > { %v6360_v50 = vpop.eup %6359  ;;  %v2756_v34 = vsel %vm466_vm2, %v6358_v23, 0.0 }
 0xb6c   : > { %v6362_v26 = vpop.eup %6361  ;;  %v2757_v27 = vadd.f32 %v2756_v34, %v2755_v14  ;;  %v2758_v13 = vsel %vm466_vm2, %v6360_v50, 0.0 }
 0xb6d   : > { %v6364_v55 = vpop.eup %6363  ;;  %v2760_v42 = vsel %vm466_vm2, %v6362_v26, 0.0 }
 0xb6e   : > { %v2759_v11 = vadd.f32 %v2758_v13, %v2757_v27  ;;  %v6366_v52 = vpop.eup %6365  ;;  %v2762_v61 = vsel %vm466_vm2, %v6364_v55, 0.0 }
 0xb6f   : > { %v6368_v33 = vpop.eup %6367  ;;  %v2764_v54 = vsel %vm466_vm2, %v6366_v52, 0.0 }
 0xb70   : > { %v2761_v59 = vadd.f32 %v2760_v42, %v2759_v11  ;;  %v6370_v22 = vpop.eup %6369  ;;  %v2766_v38 = vsel %vm466_vm2, %v6368_v33, 0.0 }
 0xb71   : > { %v2768_v6 = vsel %vm466_vm2, %v6370_v22, 0.0 }
 0xb72   : > { %v2763_v57 = vadd.f32 %v2762_v61, %v2761_v59 }
 0xb74   : > { %v2765_v40 = vadd.f32 %v2764_v54, %v2763_v57 }
 0xb76   : > { %v2767_v12 = vadd.f32 %v2766_v38, %v2765_v40 }
 0xb78   : > { %v2769_v4 = vadd.f32 %v2768_v6, %v2767_v12 }
 0xb7a   : > { %v2770_v60 = vrot.slane %v2769_v4, 4 }
 0xb7c   : > { %v2771_v46 = vadd.f32 %v2770_v60, %v2769_v4 }
 0xb7e   : > { %v2772_v35 = vrot.slane %v2771_v46, 2 }
 0xb80   : > { %v2773_v15 = vadd.f32 %v2772_v35, %v2771_v46 }
 0xb82   : > { %v2774_v45 = vrot.slane %v2773_v15, 1 }
 0xb84   : > { %v2775_v62 = vadd.f32 %v2774_v45, %v2773_v15 }
 0xb86   : > { %6371 = vrcp.f32 %v2775_v62 }
 0xb90   : > { %v6372_v53 = vpop.eup %6371 }
 0xb91   : > { %v2777_v10 = vmul.f32 %v6372_v53, %v6356_v2   ;;  %v2778_v44 = vmul.f32 %v6372_v53, %v6358_v23   ;;  %v2779_v14 = vmul.f32 %v6372_v53, %v6360_v50   ;;  %v2780_v34 = vmul.f32 %v6372_v53, %v6362_v26  }
 0xb92   : > { %v2781_v27 = vmul.f32 %v6372_v53, %v6364_v55   ;;  %v2782_v13 = vmul.f32 %v6372_v53, %v6366_v52   ;;  %v2783_v11 = vmul.f32 %v6372_v53, %v6368_v33   ;;  %v2784_v42 = vmul.f32 %v6372_v53, %v6370_v22  }
 0xb93 LB: >> { %10681 = vst [vmem:[#allocation91_spill] sm:$0xff] %v7231_v43  ;;  %10682 = vst [vmem:[#allocation92_spill] sm:$0xff] %v7235_v16  ;;  %v10700_v2 = vld [vmem:[#allocation35_spill] sm:$0xff]  ;;  %v10701_v23 = vld [vmem:[#allocation33_spill] sm:$0xff]  ;;  %v9433_v50 = vpack.c.bf16 %v7335_v9, %v7351_v39  ;;  %v9437_v26 = vpack.c.bf16 %v7339_v31, %v7355_v7  ;;  %v9443_v52 = vpack.c.bf16 %v7303_v0, %v7319_v28  ;;  %s2790_s3 = sadd.s32 1, %s7391_s18   ;;  %s7391_s18 = sphi %s9304_s18, %s10841_s18   ;;  %v7387_v10 = vphi %v2777_v10, %v10840_v10   ;;  %v7383_v44 = vphi %v2778_v44, %v10839_v44   ;;  %v7379_v14 = vphi %v2779_v14, %v10838_v14   ;;  %v7375_v34 = vphi %v2780_v34, %v10837_v34   ;;  %v7371_v27 = vphi %v2781_v27, %v10836_v27   ;;  %v7367_v13 = vphi %v2782_v13, %v10835_v13   ;;  %v7363_v11 = vphi %v2783_v11, %v10834_v11   ;;  %v7359_v42 = vphi %v2784_v42, %v10833_v42   ;;  %v7355_v7 = vphi %v9028_v7, %v10832_v7   ;;  %v7351_v39 = vphi %v9007_v39, %v10831_v39   ;;  %v7347_v24 = vphi %v9089_v24, %v10830_v24   ;;  %v7343_v49 = vphi %v9079_v49, %v10829_v49   ;;  %v7339_v31 = vphi %v9031_v31, %v10828_v31   ;;  %v7335_v9 = vphi %v9010_v9, %v10827_v9   ;;  %v7331_v20 = vphi %v9092_v20, %v10826_v20   ;;  %v7327_v3 = vphi %v9082_v3, %v10825_v3   ;;  %v7323_v58 = vphi %v9055_v58, %v10824_v58   ;;  %v7319_v28 = vphi %v9035_v28, %v10823_v28   ;;  %v7315_v56 = vphi %v9105_v56, %v10822_v56   ;;  %v7311_v47 = vphi %v9095_v47, %v10821_v47   ;;  %v7307_v48 = vphi %v9058_v48, %v10820_v48   ;;  %v7303_v0 = vphi %v9038_v0, %v10819_v0   ;;  %v7299_v18 = vphi %v9108_v18, %v10818_v18   ;;  %v7295_v37 = vphi %v9098_v37, %v10817_v37   ;;  %v7291_v5 = vphi %v9073_v5, %v10816_v5   ;;  %v7287_v21 = vphi %v9062_v21, %v10815_v21   ;;  %v7283_v17 = vphi %v9121_v17, %v10814_v17   ;;  %v7279_v63 = vphi %v9111_v63, %v10813_v63   ;;  %v7275_v25 = vphi %v9076_v25, %v10812_v25   ;;  %v7271_v51 = vphi %v9065_v51, %v10811_v51   ;;  %v7267_v30 = vphi %v9124_v30, %v10810_v30   ;;  %v7263_v19 = vphi %v9114_v19, %v10808_v19   ;;  %v7259_v29 = vphi %v9042_v29, %v10807_v29   ;;  %v7255_v41 = vphi %v9014_v41, %v10806_v41   ;;  %v7251_v32 = vphi %v9137_v32, %v10805_v32   ;;  %v7247_v36 = vphi %v9127_v36, %v10803_v36   ;;  %v7243_v1 = vphi %v9045_v1, %v10801_v1   ;;  %v7239_v8 = vphi %v9017_v8, %v10799_v8   ;;  %v7235_v16 = vphi %v9140_v16, %v10797_v16   ;;  %v7231_v43 = vphi %v9130_v43, %v10795_v43  }
 0xb94   : >> { %10683 = vst [vmem:[#allocation93_spill] sm:$0xff] %v7239_v8  ;;  %10684 = vst [vmem:[#allocation94_spill] sm:$0xff] %v7243_v1  ;;  %2847 = vmatprep.subr.bf16.mxu0 %v10700_v2  ;;  %v10702_v55 = vld [vmem:[#allocation39_spill] sm:$0xff]  ;;  %v9451_v59 = vpack.c.bf16 %v7307_v48, %v7323_v58  ;;  %v10703_v61 = vld [vmem:[#allocation37_spill] sm:$0xff]  ;;  %v9456_v33 = vpack.c.bf16 %v7271_v51, %v7287_v21  ;;  %v9464_v54 = vpack.c.bf16 %v7275_v25, %v7291_v5  ;;  %p9902_p13 = scmp.ge.s32.totalorder %s2790_s3, 6   ;;  %s10841_s18 = smov %s2790_s3 }
 0xb95   : >> { %10685 = vst [vmem:[#allocation95_spill] sm:$0xff] %v7247_v36  ;;  %10686 = vst [vmem:[#allocation96_spill] sm:$0xff] %v7251_v32  ;;  %2848 = vmatpush1.bf16.xpose.msra.mxu0 %v10701_v23  ;;  %2977 = vmatprep.subr.bf16.mxu1 %v9433_v50  ;;  %v10704_v57 = vld [vmem:[#allocation36_spill] sm:$0xff]  ;;  %v10705_v22 = vld [vmem:[#allocation34_spill] sm:$0xff]  ;;  %v9470_v40 = vpack.c.bf16 %v7239_v8, %v7255_v41  ;;  %v3111_v12 = vpack.c.bf16 %v7383_v44, %v7387_v10  ;;  %s7408_s19 = smov (%p9902_p13), 32   ;;  %s7409_s22 = smov (%p9902_p13), 96  }
 0xb96   : >> { %10687 = vst [vmem:[#allocation97_spill] sm:$0xff] %v7255_v41  ;;  %10688 = vst [vmem:[#allocation98_spill] sm:$0xff] %v7259_v29  ;;  %2849 = vmatprep.subr.bf16.mxu0 %v10702_v55  ;;  %3009 = vmatprep.mubr.bf16.mxu1 %v9433_v50  ;;  %v10706_v38 = vld [vmem:[#allocation40_spill] sm:$0xff]  ;;  %v9480_v6 = vpack.c.bf16 %v7243_v1, %v7259_v29  ;;  %v10707_v4 = vld [vmem:[#allocation38_spill] sm:$0xff]  ;;  %v9486_v60 = vpack.c.bf16 %v7327_v3, %v7343_v49  ;;  %s5129_s1 = sshll.u32 (%p9902_p13), %s7484_s13, 8  ;;  %s4605_s17 = sshll.u32 (%p9902_p13), %s8022_s25, 4  ;;  %s10215_s17 = int_to_ptr.vmem [resolvable:$true] %s4605_s17 }
 0xb97   : >> { %10689 = vst [vmem:[#allocation99_spill] sm:$0xff] %v7263_v19  ;;  %10690 = vst [vmem:[#allocation100_spill] sm:$0xff] %v7267_v30  ;;  %2978 = vmatpush1.bf16.xpose.msra.mxu1 %v9437_v26  ;;  %2879 = vmatprep.mubr.bf16.mxu0 %v9433_v50  ;;  %v9493_v46 = vpack.c.bf16 %v7331_v20, %v7347_v24  ;;  %v9498_v35 = vpack.c.bf16 %v7295_v37, %v7311_v47  ;;  %s10903_s9 = sld [smem:[#allocation122_spill]] (%p9902_p13)  ;;  %s4592_s13 = scalar_lea.sflag (%p9902_p13), [#allocation4], %s7723_s26 }
 0xb98   : >> { %10691 = vst [vmem:[#allocation101_spill] sm:$0xff] %v7271_v51  ;;  %10692 = vst [vmem:[#allocation102_spill] sm:$0xff] %v7275_v25  ;;  %2979 = vmatprep.subr.bf16.mxu1 %v9443_v52  ;;  %v9507_v15 = vpack.c.bf16 %v7299_v18, %v7315_v56  ;;  %v9512_v45 = vpack.c.bf16 %v7263_v19, %v7279_v63  ;;  %v3112_v62 = vpack.c.bf16 %v7375_v34, %v7379_v14  ;;  %s6657_s21 = scalar_lea.vmem (%p9902_p13), %s10215_s17, 256  ;;  %s7410_s24 = smov (%p9902_p13), [#allocation13]  }
 0xb99   : >> { %10693 = vst [vmem:[#allocation103_spill] sm:$0xff] %v7279_v63  ;;  %10694 = vst [vmem:[#allocation104_spill] sm:$0xff] %v7283_v17  ;;  %v9523_v53 = vpack.c.bf16 %v7267_v30, %v7283_v17  ;;  %v9528_v8 = vpack.c.bf16 %v7231_v43, %v7247_v36  ;;  %v3113_v1 = vpack.c.bf16 %v7367_v13, %v7371_v27  ;;  %p6658_p0 = scmp.ne.s32.totalorder (%p9902_p13), %s10215_s17, %s6657_s21  ;;  %s6661_s20 = sshll.u32 (%p9902_p13), %s7410_s24, 4  ;;  %s6662_s20 = int_to_ptr.vmem [resolvable:$false] %s6661_s20 }
 0xb9a   : >> { %10695 = vst [vmem:[#allocation105_spill] sm:$0xff] %v7287_v21  ;;  %10696 = vst [vmem:[#allocation106_spill] sm:$0xff] %v7291_v5  ;;  %v9539_v43 = vpack.c.bf16 %v7235_v16, %v7251_v32  ;;  %v3114_v16 = vpack.c.bf16 %v7359_v42, %v7363_v11  ;;  %s6663_s18 = scalar_lea.vmem (%p9902_p13), %s6662_s20, 512  ;;  %p6664_p3 = scmp.lt.s32.totalorder (%p9902_p13), %s10215_s17, %s6662_s20 }
 0xb9b   : >> { %10697 = vst [vmem:[#allocation107_spill] sm:$0xff] %v7295_v37  ;;  %10698 = vst [vmem:[#allocation108_spill] sm:$0xff] %v7299_v18  ;;  %p6659_p6 = pnand (%p9902_p13), %p6658_p0, %p7628_p10  ;;  %p6665_p5 = scmp.lt.s32.totalorder (%p9902_p13), %s6663_s18, %s6657_s21 }
 0xb9c   : >> { %10699 = vst [vmem:[#allocation109_spill] sm:$0xff] %v7303_v0 }
 0xb9d   : >> { %2850 = vmatpush1.bf16.xpose.msra.mxu0 %v10703_v61  ;;  %s10213_s16 = scalar_lea.hbm (%p9902_p13), %s10903_s9, %s5129_s1  ;;  %p6660_p8 = pneg (%p9902_p13), %p6659_p6 }
 0xb9e   : >> { %2912 = vmatprep.subr.bf16.mxu0 %v10704_v57  ;;  %p6666_p9 = por (%p9902_p13), %p6665_p5, %p6664_p3 }
 0xb9f   : >> { %2980 = vmatpush1.bf16.xpose.msra.mxu1 %v9451_v59 }
 0xba0   : >> { %2981 = vmatprep.subr.bf16.mxu1 %v9456_v33  ;;  %p6667_p4 = pnand (%p9902_p13), %p6666_p9, %p6660_p8 }
 0xba4   : >> { %2880 = vmatmul.mubr.bf16.vlgmr.msra.gmra.mrb[0].mxu0 %v9437_v26 }
 0xba5   : >> { %2887 = vmatprep.mubr.bf16.mxu0 %v9443_v52  ;;  %2913 = vmatpush1.bf16.xpose.msra.mxu0 %v10705_v22 }
 0xba6   : >> { %2914 = vmatprep.subr.bf16.mxu0 %v10706_v38 }
 0xba7   : >> { %2982 = vmatpush1.bf16.xpose.msra.mxu1 %v9464_v54 }
 0xba8   : >> { %2983 = vmatprep.subr.bf16.mxu1 %v9470_v40 }
 0xbac   : >> { %2888 = vmatmul.mubr.bf16.gmra.mrb[4].mxu0 %v9451_v59 }
 0xbad   : >> { %2895 = vmatprep.mubr.bf16.mxu0 %v9456_v33  ;;  %2915 = vmatpush1.bf16.xpose.msra.mxu0 %v10707_v4 }
 0xbae   : >> { %5240 = vmatprep.subr.bf16.mxu0 %v3111_v12 }
 0xbaf   : >> { %2984 = vmatpush1.bf16.xpose.msra.mxu1 %v9480_v6 }
 0xbb0   : >> { %3042 = vmatprep.subr.bf16.mxu1 %v9486_v60 }
 0xbb4   : >> { %2896 = vmatmul.mubr.bf16.gmra.mrb[8].mxu0 %v9464_v54 }
 0xbb5   : >> { %2903 = vmatprep.mubr.bf16.mxu0 %v9470_v40 }
 0xbb6   : >> { %3010 = vmatmul.mubr.bf16.vlgmr.msra.gmra.mrb[0].mxu1 %v9437_v26 }
 0xbb7   : >> { %3043 = vmatpush1.bf16.xpose.msra.mxu1 %v9493_v46  ;;  %3017 = vmatprep.mubr.bf16.mxu1 %v9443_v52 }
 0xbb8   : >> { %3044 = vmatprep.subr.bf16.mxu1 %v9498_v35 }
 0xbbc   : >> { %2904 = vmatmul.mubr.bf16.gmra.mrb[12].mxu0 %v9480_v6 }
 0xbbd   : >> { %2944 = vmatprep.mubr.bf16.mxu0 %v9486_v60 }
 0xbbe   : >> { %3018 = vmatmul.mubr.bf16.gmra.mrb[4].mxu1 %v9451_v59 }
 0xbbf   : >> { %3045 = vmatpush1.bf16.xpose.msra.mxu1 %v9507_v15  ;;  %3025 = vmatprep.mubr.bf16.mxu1 %v9456_v33 }
 0xbc0   : >> { %3046 = vmatprep.subr.bf16.mxu1 %v9512_v45 }
 0xbc4   : >> { %2945 = vmatmul.mubr.bf16.vlgmr.msra.gmra.mrb[0].mxu0 %v9493_v46 }
 0xbc5   : >> { %2952 = vmatprep.mubr.bf16.mxu0 %v9498_v35  ;;  %5241 = vmatpush3.bf16.msra.mxu0 %v3111_v12 }
 0xbc6   : >> { %5242 = vmatprep.subr.bf16.mxu0 %v3112_v62  ;;  %3026 = vmatmul.mubr.bf16.gmra.mrb[8].mxu1 %v9464_v54 }
 0xbc7   : >> { %3047 = vmatpush1.bf16.xpose.msra.mxu1 %v9523_v53  ;;  %3033 = vmatprep.mubr.bf16.mxu1 %v9470_v40 }
 0xbc8   : >> { %3048 = vmatprep.subr.bf16.mxu1 %v9528_v8 }
 0xbc9   : >> { %5243 = vmatpush3.bf16.msra.mxu0 %v3112_v62 }
 0xbca   : >> { %5244 = vmatprep.subr.bf16.mxu0 %v3113_v1 }
 0xbcc   : >> { %2953 = vmatmul.mubr.bf16.gmra.mrb[4].mxu0 %v9507_v15 }
 0xbcd   : >> { %2960 = vmatprep.mubr.bf16.mxu0 %v9512_v45  ;;  %5245 = vmatpush3.bf16.msra.mxu0 %v3113_v1 }
 0xbce   : >> { %3034 = vmatmul.mubr.bf16.gmra.mrb[12].mxu1 %v9480_v6  ;;  %5246 = vmatprep.subr.bf16.mxu0 %v3114_v16 }
 0xbcf   : >> { %3049 = vmatpush1.bf16.xpose.msra.mxu1 %v9539_v43  ;;  %3074 = vmatprep.mubr.bf16.mxu1 %v9486_v60 }
 0xbd0   : >> { %5392 = vmatprep.subr.bf16.mxu1 %v3111_v12 }
 0xbd1   : >> { %5247 = vmatpush3.bf16.msra.mxu0 %v3114_v16 }
 0xbd2   : >> { %3232 = vmatprep.subr.bf16.mxu0 %v10700_v2 }
 0xbd4   : >> { %2961 = vmatmul.mubr.bf16.gmra.mrb[8].mxu0 %v9523_v53 }
 0xbd5   : >> { %2968 = vmatprep.mubr.bf16.mxu0 %v9528_v8 }
 0xbd6   : >> { %3075 = vmatmul.mubr.bf16.vlgmr.msra.gmra.mrb[0].mxu1 %v9493_v46 }
 0xbd7   : >> { %3082 = vmatprep.mubr.bf16.mxu1 %v9498_v35  ;;  %5396 = vmatpush3.bf16.msra.mxu1 %v3111_v12 }
 0xbd8   : >> { %5393 = vmatprep.subr.bf16.mxu1 %v3112_v62 }
 0xbdb   : >> { %5397 = vmatpush3.bf16.msra.mxu1 %v3112_v62 }
 0xbdc   : >> { %2969 = vmatmul.mubr.bf16.gmra.mrb[12].mxu0 %v9539_v43  ;;  %5394 = vmatprep.subr.bf16.mxu1 %v3113_v1 }
 0xbde   : >> { %3083 = vmatmul.mubr.bf16.gmra.mrb[4].mxu1 %v9507_v15 }
 0xbdf   : >> { %3090 = vmatprep.mubr.bf16.mxu1 %v9512_v45  ;;  %5398 = vmatpush3.bf16.msra.mxu1 %v3113_v1 }
 0xbe0   : >> { %5395 = vmatprep.subr.bf16.mxu1 %v3114_v16 }
 0xbe3   : >> { %5399 = vmatpush3.bf16.msra.mxu1 %v3114_v16 }
 0xbe4   : >> { %3305 = vmatprep.subr.bf16.mxu1 %v10704_v57 }
 0xbe6   : >> { %3091 = vmatmul.mubr.bf16.gmra.mrb[8].mxu1 %v9523_v53 }
 0xbe7   : >> { %3098 = vmatprep.mubr.bf16.mxu1 %v9528_v8 }
 0xbee   : >> { %3099 = vmatmul.mubr.bf16.gmra.mrb[12].mxu1 %v9539_v43 }
 0xc97   : >> { %v9559_v12 = vpop.f32.mrb[0].mxu0 }
 0xc98   : >> { %v2948_v1 = vpop.f32.mrb[1].mxu0 }
 0xc99   : >> { %v9561_v62 = vpop.f32.mrb[2].mxu0 }
 0xc9a   : >> { %v2951_v36 = vpop.f32.mrb[3].mxu0 }
 0xc9f   : >> { %v2954_v41 = vpop.f32.mrb[4].mxu0 }
 0xca0   : >> { %v2956_v32 = vpop.f32.mrb[5].mxu0 }
 0xca1   : >> { %v2957_v29 = vpop.f32.mrb[6].mxu0 }
 0xca2   : >> { %v2959_v19 = vpop.f32.mrb[7].mxu0 }
 0xca7   : >> { %v9563_v51 = vpop.f32.mrb[8].mxu0 }
 0xca8   : >> { %v2964_v30 = vpop.f32.mrb[9].mxu0 }
 0xca9   : >> { %v9565_v25 = vpop.f32.mrb[10].mxu0  ;;  %v3076_v63 = vpop.f32.mrb[0].mxu1 }
 0xcaa   : >> { %v2967_v16 = vpop.f32.mrb[11].mxu0  ;;  %v3078_v2 = vpop.f32.mrb[1].mxu1 }
 0xcab   : >> { %v3079_v21 = vpop.f32.mrb[2].mxu1 }
 0xcac   : >> { %v3107_v57 = vpack.c.bf16 %v3079_v21, %v3076_v63  ;;  %v3081_v17 = vpop.f32.mrb[3].mxu1 }
 0xcae   : >> { %5248 = vmatprep.mubr.msk.bf16.mxu0 %vm1420_vm4, %v3107_v57 }
 0xcaf   : >> { %v9567_v5 = vpop.f32.mrb[12].mxu0 }
 0xcb0   : >> { %v2972_v36 = vpop.f32.mrb[13].mxu0 }
 0xcb1   : >> { %v9570_v1 = vpop.f32.mrb[14].mxu0  ;;  %v3084_v19 = vpop.f32.mrb[4].mxu1 }
 0xcb2   : >> { %v2975_v32 = vpop.f32.mrb[15].mxu0  ;;  %v3086_v37 = vpop.f32.mrb[5].mxu1 }
 0xcb3   : >> { %v3087_v0 = vpop.f32.mrb[6].mxu1 }
 0xcb4   : >> { %v3108_v30 = vpack.c.bf16 %v3087_v0, %v3084_v19  ;;  %v3089_v18 = vpop.f32.mrb[7].mxu1 }
 0xcb6   : >> { %5249 = vmatmul.mubr.msk.bf16.vlgmr.msra.gmra.mrb[16].mxu0 %vm1420_vm4, %v3108_v30 }
 0xcb7   : >> { %3233 = vmatpush1.bf16.msra.mxu0 %v10701_v23  ;;  %v10383_v23 = vmov 0  }
 0xcb8   : >> { %3234 = vmatprep.subr.bf16.mxu0 %v10702_v55  ;;  %3264 = vmatprep.mubr.bf16.mxu0 %v10383_v23 }
 0xcb9   : >> { %v3092_v21 = vpop.f32.mrb[8].mxu1 }
 0xcba   : >> { %v3094_v63 = vpop.f32.mrb[9].mxu1 }
 0xcbb   : >> { %v3095_v17 = vpop.f32.mrb[10].mxu1  ;;  %3235 = vmatpush1.bf16.msra.mxu0 %v10703_v61 }
 0xcbc   : >> { %v3109_v16 = vpack.c.bf16 %v3095_v17, %v3092_v21  ;;  %v3097_v2 = vpop.f32.mrb[11].mxu1 }
 0xcbe   : >> { %5252 = vmatprep.mubr.msk.bf16.mxu1 %vm1420_vm4, %v3109_v16  ;;  %v3118_v16 = vmul.f32 %v7375_v34, %v2957_v29 }
 0xcc1   : >> { %v3100_v57 = vpop.f32.mrb[12].mxu1 }
 0xcc2   : >> { %v3102_v37 = vpop.f32.mrb[13].mxu1 }
 0xcc3   : >> { %v3103_v36 = vpop.f32.mrb[14].mxu1  ;;  %v3116_v37 = vmul.f32 %v7383_v44, %v9561_v62 }
 0xcc4   : >> { %v3110_v0 = vpack.c.bf16 %v3103_v36, %v3100_v57  ;;  %v3105_v18 = vpop.f32.mrb[15].mxu1 }
 0xcc6   : >> { %5253 = vmatmul.mubr.msk.bf16.vlgmr.msra.gmra.mrb[16].mxu1 %vm1420_vm4, %v3110_v0 }
 0xcc7   : >> { %3306 = vmatpush1.bf16.msra.mxu1 %v10705_v22  ;;  %3337 = vmatprep.mubr.bf16.mxu1 %v10383_v23 }
 0xcc8   : >> { %3307 = vmatprep.subr.bf16.mxu1 %v10706_v38  ;;  %v3117_v38 = vmul.f32 %v7379_v14, %v2954_v41 }
 0xccb   : >> { %3308 = vmatpush1.bf16.msra.mxu1 %v10707_v4  ;;  %v3115_v4 = vmul.f32 %v7387_v10, %v9559_v12 }
 0xccc   : >> { %3491 = vmatprep.subr.bf16.mxu1 %v9433_v50 }
 0xd89   : >> { %v5250_v55 = vpop.f32.mrb[16].mxu0 }
 0xd8a   : >> { %v3178_v61 = vadd.f32 1e-06, %v5250_v55  ;;  %v3169_v32 = vpop.f32.mrb[17].mxu0 }
 0xd8b   : >> { %v3170_v19 = vadd.f32 1e-06, %v3169_v32  ;;  %v5251_v30 = vpop.f32.mrb[18].mxu0 }
 0xd8c   : >> { %6373 = vrcp.f32 %v3178_v61  ;;  %v3181_v21 = vadd.f32 1e-06, %v5251_v30  ;;  %v3172_v63 = vpop.f32.mrb[19].mxu0  ;;  %v3121_v30 = vmul.f32 %v7363_v11, %v9567_v5 }
 0xd8d   : >> { %6375 = vrcp.f32 %v3170_v19  ;;  %v3173_v22 = vadd.f32 1e-06, %v3172_v63  ;;  %v3119_v63 = vmul.f32 %v7371_v27, %v9563_v51  ;;  %v3120_v27 = vmul.f32 %v7367_v13, %v9565_v25 }
 0xd8e   : >> { %6377 = vrcp.f32 %v3181_v21 }
 0xd8f   : >> { %6379 = vrcp.f32 %v3173_v22 }
 0xd96   : >> { %v6374_v50 = vpop.eup %6373 }
 0xd97   : >> { %v6376_v17 = vpop.eup %6375  ;;  %v9588_v14 = vmul.f32 %v6374_v50, %v3117_v38  }
 0xd98   : >> { %v6378_v57 = vpop.eup %6377  ;;  %v9592_v10 = vmul.f32 %v6376_v17, %v3115_v4  }
 0xd99   : >> { %10708 = vst [vmem:[#allocation74_spill] sm:$0xff] %v9588_v14  ;;  %v10709_v2 = vmov %v9588_v14  ;;  %v6380_v36 = vpop.eup %6379  ;;  %v9594_v34 = vmul.f32 %v6378_v57, %v3118_v16   ;;  %v5254_v0 = vpop.f32.mrb[16].mxu1 }
 0xd9a   : >> { %10710 = vst [vmem:[#allocation78_spill] sm:$0xff] %v9592_v10  ;;  %v10711_v55 = vmov %v9592_v10  ;;  %v9596_v44 = vmul.f32 %v6380_v36, %v3116_v37   ;;  %v3194_v41 = vadd.f32 1e-06, %v5254_v0  ;;  %v3185_v18 = vpop.f32.mrb[17].mxu1 }
 0xd9b   : >> { %10712 = vst [vmem:[#allocation64_spill] sm:$0xff] %v9594_v34  ;;  %v10713_v61 = vmov %v9594_v34  ;;  %v3186_v12 = vadd.f32 1e-06, %v3185_v18  ;;  %v5255_v32 = vpop.f32.mrb[18].mxu1 }
 0xd9c   : >> { %10714 = vst [vmem:[#allocation71_spill] sm:$0xff] %v9596_v44  ;;  %v10715_v22 = vmov %v9596_v44  ;;  %v9600_v29 = vpack.c.bf16 %v10713_v61, %v10709_v2  ;;  %6381 = vrcp.f32 %v3194_v41  ;;  %v3197_v14 = vadd.f32 1e-06, %v5255_v32  ;;  %v3188_v19 = vpop.f32.mrb[19].mxu1 }
 0xd9d   : >> { %v9604_v10 = vpack.c.bf16 %v10715_v22, %v10711_v55  ;;  %6383 = vrcp.f32 %v3186_v12  ;;  %v3189_v34 = vadd.f32 1e-06, %v3188_v19 }
 0xd9e   : >> { %10716 = vst [vmem:[#allocation81_spill] sm:$0xff] %v9600_v29  ;;  %v10717_v38 = vmov %v9600_v29  ;;  %6385 = vrcp.f32 %v3197_v14 }
 0xd9f   : >> { %10718 = vst [vmem:[#allocation82_spill] sm:$0xff] %v9604_v10  ;;  %v10719_v62 = vmov %v9604_v10  ;;  %6387 = vrcp.f32 %v3189_v34  ;;  %v3224_v5 = vsel %vm466_vm2, %v10717_v38, 0 }
 0xda0   : >> { %5091 = vmatmul.mubr.msk.bf16.vlgmr.msra.gmra.mrb[20].mxu0 %vm466_vm2, %v10719_v62  ;;  %5095 = vmatmul.mubr.msk.bf16.vlgmr.msra.gmra.mrb[20].mxu1 %vm466_vm2, %v10719_v62  ;;  %v3221_v44 = vsel %vm466_vm2, %v10719_v62, 0 }
 0xda1   : >> { %5476 = vmatprep.subr.msk.bf16.mxu0 %vm466_vm2, %v10719_v62  ;;  %3274 = vmatprep.mubr.bf16.mxu0 %v10383_v23 }
 0xda2   : >> { %5257 = vmatpush3.bf16.xpose.msra.mxu0 %v3221_v44  ;;  %3347 = vmatprep.mubr.bf16.mxu1 %v10383_v23 }
 0xda3   : >> { %5477 = vmatprep.subr.msk.bf16.mxu0 %vm466_vm2, %v10717_v38  ;;  %3492 = vmatpush1.bf16.msra.mxu1 %v9437_v26  ;;  %v3122_v26 = vmul.f32 %v7359_v42, %v9570_v1 }
 0xda4   : >> { %3493 = vmatprep.subr.bf16.mxu1 %v9443_v52 }
 0xda6   : >> { %v6382_v21 = vpop.eup %6381 }
 0xda7   : >> { %3494 = vmatpush1.bf16.msra.mxu1 %v9451_v59  ;;  %v6384_v50 = vpop.eup %6383  ;;  %v9631_v11 = vmul.f32 %v6382_v21, %v3121_v30  }
 0xda8   : >> { %5092 = vmatmul.mubr.msk.bf16.gmra.mrb[24].mxu0 %vm466_vm2, %v10717_v38  ;;  %5096 = vmatmul.mubr.msk.bf16.gmra.mrb[24].mxu1 %vm466_vm2, %v10717_v38  ;;  %v6386_v51 = vpop.eup %6385  ;;  %v9639_v59 = vmul.f32 %v6384_v50, %v3119_v63  }
 0xda9   : >> { %10720 = vst [vmem:[#allocation85_spill] sm:$0xff] %v9631_v11  ;;  %v10721_v52 = vmov %v9631_v11  ;;  %3284 = vmatprep.mubr.bf16.mxu0 %v10383_v23  ;;  %3357 = vmatprep.mubr.bf16.mxu1 %v10383_v23  ;;  %v6388_v4 = vpop.eup %6387  ;;  %v9642_v42 = vmul.f32 %v6386_v51, %v3122_v26  }
 0xdaa   : >> { %10722 = vst [vmem:[#allocation89_spill] sm:$0xff] %v9639_v59  ;;  %5259 = vmatpush3.bf16.xpose.msra.mxu0 %v3224_v5  ;;  %3495 = vmatprep.subr.bf16.mxu1 %v9456_v33  ;;  %v9645_v13 = vmul.f32 %v6388_v4, %v3120_v27  }
 0xdab   : >> { %10723 = vst [vmem:[#allocation70_spill] sm:$0xff] %v9642_v42  ;;  %v10724_v57 = vmov %v9642_v42  ;;  %3496 = vmatpush1.bf16.msra.mxu1 %v9464_v54  ;;  %v10731_v42 = vmov 0  }
 0xdac   : >> { %10725 = vst [vmem:[#allocation86_spill] sm:$0xff] %v9645_v13  ;;  %v10726_v12 = vmov %v9645_v13  ;;  %3497 = vmatprep.subr.bf16.mxu1 %v9470_v40  ;;  %v9650_v11 = vpack.c.bf16 %v10724_v57, %v10721_v52 }
 0xdad   : >> { %v9654_v25 = vpack.c.bf16 %v10726_v12, %v9639_v59 }
 0xdae   : >> { %10727 = vst [vmem:[#allocation90_spill] sm:$0xff] %v9650_v11  ;;  %v10728_v23 = vmov %v9650_v11 }
 0xdaf   : >> { %10729 = vst [vmem:[#allocation83_spill] sm:$0xff] %v9654_v25  ;;  %v10730_v50 = vmov %v9654_v25  ;;  %3498 = vmatpush1.bf16.msra.mxu1 %v9480_v6  ;;  %v3230_v33 = vsel %vm466_vm2, %v10728_v23, 0 }
 0xdb0   : >> { %5093 = vmatmul.mubr.msk.bf16.gmra.mrb[28].mxu0 %vm466_vm2, %v10730_v50  ;;  %5097 = vmatmul.mubr.msk.bf16.gmra.mrb[28].mxu1 %vm466_vm2, %v10730_v50  ;;  %v3227_v13 = vsel %vm466_vm2, %v10730_v50, 0 }
 0xdb1   : >> { %5478 = vmatprep.subr.msk.bf16.mxu0 %vm466_vm2, %v10730_v50  ;;  %3294 = vmatprep.mubr.bf16.mxu0 %v10731_v42 }
 0xdb2   : >> { %5261 = vmatpush3.bf16.xpose.msra.mxu0 %v3227_v13  ;;  %3367 = vmatprep.mubr.bf16.mxu1 %v10731_v42 }
 0xdb3   : >> { %5479 = vmatprep.subr.msk.bf16.mxu0 %vm466_vm2, %v10728_v23 }
 0xdb8   : >> { %5094 = vmatmul.mubr.msk.bf16.gmra.mrb[32].mxu0 %vm466_vm2, %v10728_v23  ;;  %5098 = vmatmul.mubr.msk.bf16.gmra.mrb[32].mxu1 %vm466_vm2, %v10728_v23 }
 0xdb9   : >> { %5264 = vmatprep.mubr.msk.bf16.mxu0 %vm466_vm2, %v10719_v62  ;;  %3523 = vmatprep.mubr.bf16.mxu1 %v10731_v42 }
 0xdba   : >> { %5263 = vmatpush3.bf16.xpose.msra.mxu0 %v3230_v33 }
 0xdbb   : >> { %3564 = vmatprep.subr.bf16.mxu0 %v9486_v60 }
 0xdc1   : >> { %5265 = vmatmul.mubr.msk.bf16.vlgmr.msra.gmra.mrb[36].mxu0 %vm466_vm2, %v10717_v38 }
 0xdc2   : >> { %5268 = vmatprep.mubr.msk.bf16.mxu0 %vm466_vm2, %v10730_v50  ;;  %3565 = vmatpush1.bf16.msra.mxu0 %v9493_v46 }
 0xdc3   : >> { %3566 = vmatprep.subr.bf16.mxu0 %v9498_v35 }
 0xdc6   : >> { %3567 = vmatpush1.bf16.msra.mxu0 %v9507_v15 }
 0xdc7   : >> { %3568 = vmatprep.subr.bf16.mxu0 %v9512_v45 }
 0xdc9   : >> { %5269 = vmatmul.mubr.msk.bf16.gmra.mrb[40].mxu0 %vm466_vm2, %v10728_v23 }
 0xdca   : >> { %3569 = vmatpush1.bf16.msra.mxu0 %v9523_v53  ;;  %3596 = vmatprep.mubr.bf16.mxu0 %v10731_v42 }
 0xdcb   : >> { %3570 = vmatprep.subr.bf16.mxu0 %v9528_v8 }
 0xdce   : >> { %3571 = vmatpush1.bf16.msra.mxu0 %v9539_v43 }
 0xe73   : >> { %v9693_v54 = vpop.f32.mrb[20].mxu0  ;;  %v9695_v40 = vpop.f32.mrb[20].mxu1 }
 0xe74   : >> { %v9697_v6 = vpop.f32.mrb[21].mxu0  ;;  %v9699_v60 = vpop.f32.mrb[21].mxu1 }
 0xe75   : >> { %v9701_v46 = vpop.f32.mrb[22].mxu0  ;;  %v9703_v35 = vpop.f32.mrb[22].mxu1 }
 0xe76   : >> { %v9705_v15 = vpop.f32.mrb[23].mxu0  ;;  %v9707_v45 = vpop.f32.mrb[23].mxu1 }
 0xe7b   : >> { %v9709_v53 = vpop.f32.mrb[24].mxu0  ;;  %v9711_v8 = vpop.f32.mrb[24].mxu1 }
 0xe7c   : >> { %v9713_v43 = vpop.f32.mrb[25].mxu0  ;;  %v9715_v1 = vpop.f32.mrb[25].mxu1 }
 0xe7d   : >> { %v9717_v17 = vpop.f32.mrb[26].mxu0  ;;  %v9719_v16 = vpop.f32.mrb[26].mxu1 }
 0xe7e   : >> { %v9721_v37 = vpop.f32.mrb[27].mxu0  ;;  %v9723_v36 = vpop.f32.mrb[27].mxu1 }
 0xe83   : >> { %v9725_v0 = vpop.f32.mrb[28].mxu0  ;;  %v9727_v41 = vpop.f32.mrb[28].mxu1 }
 0xe84   : >> { %v9729_v18 = vpop.f32.mrb[29].mxu0  ;;  %v9731_v32 = vpop.f32.mrb[29].mxu1 }
 0xe85   : >> { %v9733_v29 = vpop.f32.mrb[30].mxu0  ;;  %v9735_v14 = vpop.f32.mrb[30].mxu1 }
 0xe86   : >> { %v9737_v19 = vpop.f32.mrb[31].mxu0  ;;  %v9739_v10 = vpop.f32.mrb[31].mxu1 }
 0xe8b   : >> { %v9741_v34 = vpop.f32.mrb[32].mxu0  ;;  %v9743_v44 = vpop.f32.mrb[32].mxu1 }
 0xe8c   : >> { %v9745_v30 = vpop.f32.mrb[33].mxu0  ;;  %v9747_v21 = vpop.f32.mrb[33].mxu1 }
 0xe8d   : >> { %v9749_v63 = vpop.f32.mrb[34].mxu0  ;;  %v9751_v26 = vpop.f32.mrb[34].mxu1 }
 0xe8e   : >> { %v9753_v5 = vpop.f32.mrb[35].mxu0  ;;  %v9755_v51 = vpop.f32.mrb[35].mxu1 }
 0xe8f   : >> { %10732 = vst [vmem:[#allocation110_spill] sm:$0xff] %v9755_v51 }
 0xe94   : >> { %v5266_v27 = vpop.f32.mrb[36].mxu0 }
 0xe95   : >> { %v3412_v4 = vpop.f32.mrb[37].mxu0 }
 0xe96   : >> { %v5267_v11 = vpop.f32.mrb[38].mxu0 }
 0xe97   : >> { %v3444_v25 = vpack.c.bf16 %v5267_v11, %v5266_v27  ;;  %v3415_v13 = vpop.f32.mrb[39].mxu0 }
 0xe98   : >> { %v3443_v33 = vpack.c.bf16 %v3415_v13, %v3412_v4 }
 0xe9a   : >> { %5103 = vmatmul.mubr.msk.bf16.vlgmr.msra.gmra.mrb[36].mxu1 %vm1420_vm4, %v3443_v33  ;;  %5107 = vmatmul.mubr.msk.bf16.vlgmr.msra.gmra.mrb[44].mxu0 %vm1420_vm4, %v3443_v33 }
 0xe9b   : >> { %3533 = vmatprep.mubr.bf16.mxu1 %v10731_v42  ;;  %3606 = vmatprep.mubr.bf16.mxu0 %v10731_v42 }
 0xe9c   : >> { %v5270_v23 = vpop.f32.mrb[40].mxu0 }
 0xe9d   : >> { %v3428_v50 = vpop.f32.mrb[41].mxu0 }
 0xe9e   : >> { %v5271_v38 = vpop.f32.mrb[42].mxu0 }
 0xe9f   : >> { %v3446_v62 = vpack.c.bf16 %v5271_v38, %v5270_v23  ;;  %v3431_v55 = vpop.f32.mrb[43].mxu0 }
 0xea0   : >> { %v3445_v22 = vpack.c.bf16 %v3431_v55, %v3428_v50 }
 0xea2   : >> { %5104 = vmatmul.mubr.msk.bf16.gmra.mrb[40].mxu1 %vm1420_vm4, %v3444_v25  ;;  %5108 = vmatmul.mubr.msk.bf16.gmra.mrb[48].mxu0 %vm1420_vm4, %v3444_v25 }
 0xea3   : >> { %3543 = vmatprep.mubr.bf16.mxu1 %v10731_v42  ;;  %3616 = vmatprep.mubr.bf16.mxu0 %v10731_v42 }
 0xeaa   : >> { %5105 = vmatmul.mubr.msk.bf16.gmra.mrb[44].mxu1 %vm1420_vm4, %v3445_v22  ;;  %5109 = vmatmul.mubr.msk.bf16.gmra.mrb[52].mxu0 %vm1420_vm4, %v3445_v22 }
 0xeab   : >> { %3553 = vmatprep.mubr.bf16.mxu1 %v10731_v42  ;;  %3626 = vmatprep.mubr.bf16.mxu0 %v10731_v42 }
 0xeb2   : >> { %5106 = vmatmul.mubr.msk.bf16.gmra.mrb[48].mxu1 %vm1420_vm4, %v3446_v62  ;;  %5110 = vmatmul.mubr.msk.bf16.gmra.mrb[56].mxu0 %vm1420_vm4, %v3446_v62 }
 0xf6d   : >> { %v3525_v23 = vpop.f32.mrb[36].mxu1  ;;  %v3598_v55 = vpop.f32.mrb[44].mxu0 }
 0xf6e   : >> { %v3526_v38 = vadd.f32 1e-06, %v3525_v23  ;;  %v3599_v50 = vadd.f32 1e-06, %v3598_v55  ;;  %v3527_v27 = vpop.f32.mrb[37].mxu1  ;;  %v3600_v4 = vpop.f32.mrb[45].mxu0 }
 0xf6f   : >> { %v3528_v11 = vadd.f32 1e-06, %v3527_v27  ;;  %v3601_v25 = vadd.f32 1e-06, %v3600_v4  ;;  %v3529_v13 = vpop.f32.mrb[38].mxu1  ;;  %v3602_v33 = vpop.f32.mrb[46].mxu0 }
 0xf70   : >> { %6389 = vrcp.f32 %v3526_v38  ;;  %v3530_v22 = vadd.f32 1e-06, %v3529_v13  ;;  %v3531_v2 = vpop.f32.mrb[39].mxu1  ;;  %v3604_v61 = vpop.f32.mrb[47].mxu0  ;;  %v3603_v42 = vadd.f32 1e-06, %v3602_v33 }
 0xf71   : >> { %6391 = vrcp.f32 %v3599_v50  ;;  %v3532_v59 = vadd.f32 1e-06, %v3531_v2  ;;  %v3605_v62 = vadd.f32 1e-06, %v3604_v61  ;;  %v3447_v61 = vmul.f32 %v7355_v7, %v9693_v54 }
 0xf72   : >> { %6393 = vrcp.f32 %v3528_v11  ;;  %v3450_v54 = vmul.f32 %v7343_v49, %v9699_v60 }
 0xf73   : >> { %6395 = vrcp.f32 %v3601_v25 }
 0xf74   : >> { %6397 = vrcp.f32 %v3530_v22 }
 0xf75   : >> { %6399 = vrcp.f32 %v3603_v42  ;;  %v3535_v23 = vpop.f32.mrb[40].mxu1  ;;  %v3608_v55 = vpop.f32.mrb[48].mxu0 }
 0xf76   : >> { %6401 = vrcp.f32 %v3532_v59  ;;  %v3536_v12 = vadd.f32 1e-06, %v3535_v23  ;;  %v3609_v27 = vadd.f32 1e-06, %v3608_v55  ;;  %v3537_v4 = vpop.f32.mrb[41].mxu1  ;;  %v3610_v52 = vpop.f32.mrb[49].mxu0  ;;  %v3449_v59 = vmul.f32 %v7347_v24, %v9695_v40 }
 0xf77   : >> { %6403 = vrcp.f32 %v3605_v62  ;;  %v3538_v38 = vadd.f32 1e-06, %v3537_v4  ;;  %v3611_v13 = vadd.f32 1e-06, %v3610_v52  ;;  %v3539_v57 = vpop.f32.mrb[42].mxu1  ;;  %v3612_v51 = vpop.f32.mrb[50].mxu0  ;;  %v3448_v52 = vmul.f32 %v7351_v39, %v9697_v6 }
 0xf78   : >> { %6405 = vrcp.f32 %v3536_v12  ;;  %v3540_v50 = vadd.f32 1e-06, %v3539_v57  ;;  %v3541_v11 = vpop.f32.mrb[43].mxu1  ;;  %v3614_v2 = vpop.f32.mrb[51].mxu0  ;;  %v3613_v25 = vadd.f32 1e-06, %v3612_v51  ;;  %v3451_v51 = vmul.f32 %v7339_v31, %v9701_v46 }
 0xf79   : >> { %6407 = vrcp.f32 %v3609_v27  ;;  %v3542_v22 = vadd.f32 1e-06, %v3541_v11  ;;  %v3615_v57 = vadd.f32 1e-06, %v3614_v2  ;;  %v3453_v55 = vmul.f32 %v7331_v20, %v9703_v35 }
 0xf7a   : >> { %v6390_v33 = vpop.eup %6389  ;;  %6409 = vrcp.f32 %v3538_v38  ;;  %v3452_v39 = vmul.f32 %v7335_v9, %v9705_v15 }
 0xf7b   : >> { %v6392_v42 = vpop.eup %6391  ;;  %v9777_v7 = vmul.f32 %v6390_v33, %v3447_v61   ;;  %6411 = vrcp.f32 %v3611_v13 }
 0xf7c   : >> { %v6394_v62 = vpop.eup %6393  ;;  %v9783_v24 = vmul.f32 %v6392_v42, %v3449_v59   ;;  %6413 = vrcp.f32 %v3540_v50 }
 0xf7d   : >> { %10733 = vst [vmem:[#allocation87_spill] sm:$0xff] %v9777_v7  ;;  %v6396_v40 = vpop.eup %6395  ;;  %v9789_v7 = vmul.f32 %v6394_v62, %v3448_v52   ;;  %6415 = vrcp.f32 %v3613_v25  ;;  %v3545_v27 = vpop.f32.mrb[44].mxu1  ;;  %v3454_v25 = vmul.f32 %v7327_v3, %v9707_v45  ;;  %v3455_v52 = vmul.f32 %v7323_v58, %v9709_v53 }
 0xf7e   : >> { %10734 = vst [vmem:[#allocation84_spill] sm:$0xff] %v9783_v24  ;;  %v3618_v4 = vpop.f32.mrb[52].mxu0  ;;  %v6398_v38 = vpop.eup %6397  ;;  %v9791_v49 = vmul.f32 %v6396_v40, %v3450_v54   ;;  %6417 = vrcp.f32 %v3542_v22  ;;  %v3546_v31 = vadd.f32 1e-06, %v3545_v27  ;;  %v3458_v27 = vmul.f32 %v7311_v47, %v9715_v1 }
 0xf7f   : >> { %10735 = vst [vmem:[#allocation88_spill] sm:$0xff] %v9789_v7  ;;  %v3619_v46 = vadd.f32 1e-06, %v3618_v4  ;;  %v3547_v24 = vpop.f32.mrb[45].mxu1  ;;  %v3620_v13 = vpop.f32.mrb[53].mxu0  ;;  %v9793_v11 = vmul.f32 %v6398_v38, %v3451_v51   ;;  %6419 = vrcp.f32 %v3615_v57  ;;  %v3457_v51 = vmul.f32 %v7315_v56, %v9711_v8  ;;  %v10743_v8 = vld [vmem:[#allocation108_spill] sm:$0xff] }
 0xf80   : >> { %10736 = vst [vmem:[#allocation60_spill] sm:$0xff] %v9791_v49  ;;  %v6400_v50 = vpop.eup %6399  ;;  %v3548_v20 = vadd.f32 1e-06, %v3547_v24  ;;  %v3621_v35 = vadd.f32 1e-06, %v3620_v13  ;;  %v3549_v9 = vpop.f32.mrb[46].mxu1  ;;  %6421 = vrcp.f32 %v3546_v31  ;;  %v3456_v7 = vmul.f32 %v7319_v28, %v9713_v43 }
 0xf81   : >> { %10737 = vst [vmem:[#allocation61_spill] sm:$0xff] %v9793_v11  ;;  %v3622_v15 = vpop.f32.mrb[54].mxu0  ;;  %v6402_v61 = vpop.eup %6401  ;;  %v9797_v33 = vmul.f32 %v6400_v50, %v3453_v55   ;;  %v3550_v49 = vadd.f32 1e-06, %v3549_v9  ;;  %6423 = vrcp.f32 %v3619_v46  ;;  %v3459_v38 = vmul.f32 %v7307_v48, %v9717_v17  ;;  %v10744_v28 = vld [vmem:[#allocation109_spill] sm:$0xff] }
 0xf82   : >> { %v3551_v59 = vpop.f32.mrb[47].mxu1  ;;  %v3624_v22 = vpop.f32.mrb[55].mxu0  ;;  %v9801_v9 = vmul.f32 %v6402_v61, %v3452_v39   ;;  %v3623_v62 = vadd.f32 1e-06, %v3622_v15  ;;  %6425 = vrcp.f32 %v3548_v20  ;;  %v3461_v31 = vmul.f32 %v10743_v8, %v9719_v16 }
 0xf83   : >> { %10738 = vst [vmem:[#allocation62_spill] sm:$0xff] %v9797_v33  ;;  %v6404_v42 = vpop.eup %6403  ;;  %v3552_v40 = vadd.f32 1e-06, %v3551_v59  ;;  %6427 = vrcp.f32 %v3621_v35  ;;  %v3625_v53 = vadd.f32 1e-06, %v3624_v22  ;;  %v3460_v43 = vmul.f32 %v10744_v28, %v9721_v37 }
 0xf84   : >> { %10739 = vst [vmem:[#allocation63_spill] sm:$0xff] %v9801_v9  ;;  %v6406_v54 = vpop.eup %6405  ;;  %v9805_v3 = vmul.f32 %v6404_v42, %v3454_v25   ;;  %6429 = vrcp.f32 %v3550_v49  ;;  %v10748_v49 = vld [vmem:[#allocation107_spill] sm:$0xff] }
 0xf85   : >> { %v6408_v55 = vpop.eup %6407  ;;  %v9809_v58 = vmul.f32 %v6406_v54, %v3455_v52   ;;  %6431 = vrcp.f32 %v3623_v62  ;;  %v3628_v24 = vpop.f32.mrb[56].mxu0  ;;  %v3462_v59 = vmul.f32 %v10748_v49, %v9723_v36  ;;  %v10749_v54 = vld [vmem:[#allocation106_spill] sm:$0xff] }
 0xf86   : >> { %10740 = vst [vmem:[#allocation66_spill] sm:$0xff] %v9805_v3  ;;  %v6410_v39 = vpop.eup %6409  ;;  %v9815_v56 = vmul.f32 %v6408_v55, %v3457_v51   ;;  %6433 = vrcp.f32 %v3552_v40  ;;  %v3629_v1 = vadd.f32 1e-06, %v3628_v24  ;;  %v3630_v17 = vpop.f32.mrb[57].mxu0  ;;  %v3463_v51 = vmul.f32 %v10749_v54, %v9725_v0  ;;  %v10758_v24 = vld [vmem:[#allocation102_spill] sm:$0xff] }
 0xf87   : >> { %10741 = vst [vmem:[#allocation67_spill] sm:$0xff] %v9809_v58  ;;  %v6412_v3 = vpop.eup %6411  ;;  %v9821_v28 = vmul.f32 %v6410_v39, %v3456_v7   ;;  %v3555_v58 = vpop.f32.mrb[48].mxu1  ;;  %6435 = vrcp.f32 %v3625_v53  ;;  %v3631_v9 = vadd.f32 1e-06, %v3630_v17  ;;  %v10751_v53 = vld [vmem:[#allocation104_spill] sm:$0xff] }
 0xf88   : >> { %v10742_v46 = vmov %v9815_v56  ;;  %v6414_v13 = vpop.eup %6413  ;;  %v9823_v47 = vmul.f32 %v6412_v3, %v3458_v27   ;;  %v3556_v48 = vadd.f32 1e-06, %v3555_v58  ;;  %v3557_v56 = vpop.f32.mrb[49].mxu1  ;;  %v3465_v39 = vmul.f32 %v10751_v53, %v9727_v41  ;;  %v10753_v3 = vld [vmem:[#allocation105_spill] sm:$0xff] }
 0xf89   : >> { %v10745_v50 = vmov %v9821_v28  ;;  %v6416_v11 = vpop.eup %6415  ;;  %v9825_v20 = vmul.f32 %v6414_v13, %v3459_v38   ;;  %v3558_v16 = vadd.f32 1e-06, %v3557_v56  ;;  %v3559_v37 = vpop.f32.mrb[50].mxu1  ;;  %v3464_v8 = vmul.f32 %v10753_v3, %v9729_v18  ;;  %v10760_v18 = vld [vmem:[#allocation100_spill] sm:$0xff] }
 0xf8a   : >> { %v10746_v35 = vmov %v9823_v47  ;;  %v3632_v61 = vpop.f32.mrb[58].mxu0  ;;  %v6418_v25 = vpop.eup %6417  ;;  %v9829_v22 = vmul.f32 %v6416_v11, %v3461_v31   ;;  %6437 = vrcp.f32 %v3556_v48  ;;  %v3560_v47 = vadd.f32 1e-06, %v3559_v37 }
 0xf8b   : >> { %v10747_v15 = vmov %v9825_v20  ;;  %v3561_v42 = vpop.f32.mrb[51].mxu1  ;;  %v3634_v52 = vpop.f32.mrb[59].mxu0  ;;  %v9833_v0 = vmul.f32 %v6418_v25, %v3460_v43   ;;  %6439 = vrcp.f32 %v3629_v1  ;;  %v3633_v55 = vadd.f32 1e-06, %v3632_v61 }
 0xf8c   : >> { %v6420_v62 = vpop.eup %6419  ;;  %6441 = vrcp.f32 %v3558_v16  ;;  %v3562_v36 = vadd.f32 1e-06, %v3561_v42  ;;  %v3635_v28 = vadd.f32 1e-06, %v3634_v52  ;;  %v3467_v13 = vmul.f32 %v10758_v24, %v9733_v29  ;;  %v10764_v29 = vld [vmem:[#allocation99_spill] sm:$0xff] }
 0xf8d   : >> { %v10750_v40 = vmov %v9833_v0  ;;  %v6422_v7 = vpop.eup %6421  ;;  %v9837_v37 = vmul.f32 %v6420_v62, %v3462_v59   ;;  %6443 = vrcp.f32 %v3631_v9  ;;  %v10755_v0 = vld [vmem:[#allocation103_spill] sm:$0xff]  ;;  %v3469_v56 = vmul.f32 %v10760_v18, %v9735_v14 }
 0xf8e   : >> { %v6424_v27 = vpop.eup %6423  ;;  %v9841_v31 = vmul.f32 %v6422_v7, %v3463_v51   ;;  %v3466_v58 = vmul.f32 %v10755_v0, %v9731_v32  ;;  %6445 = vrcp.f32 %v3560_v47  ;;  %v10762_v32 = vld [vmem:[#allocation101_spill] sm:$0xff]  ;;  %v3470_v9 = vmul.f32 %v10764_v29, %v9739_v10  ;;  %v10767_v47 = vld [vmem:[#allocation98_spill] sm:$0xff]  ;;  %v10769_v7 = vld [vmem:[#allocation96_spill] sm:$0xff] }
 0xf8f   : >> { %v10752_v38 = vmov %v9837_v37  ;;  %v6426_v43 = vpop.eup %6425  ;;  %v9845_v17 = vmul.f32 %v6424_v27, %v3465_v39   ;;  %6447 = vrcp.f32 %v3633_v55  ;;  %v3468_v16 = vmul.f32 %v10762_v32, %v9737_v19  ;;  %v10771_v39 = vld [vmem:[#allocation97_spill] sm:$0xff]  ;;  %v10774_v27 = vld [vmem:[#allocation95_spill] sm:$0xff]  ;;  %v10786_v0 = vld [vmem:[#allocation110_spill] sm:$0xff] }
 0xf90   : >> { %v10754_v12 = vmov %v9841_v31  ;;  %v6428_v41 = vpop.eup %6427  ;;  %v9849_v48 = vmul.f32 %v6426_v43, %v3464_v8   ;;  %6449 = vrcp.f32 %v3562_v36  ;;  %v3471_v14 = vmul.f32 %v10767_v47, %v9741_v34 }
 0xf91   : >> { %10756 = vst [vmem:[#allocation68_spill] sm:$0xff] %v9845_v17  ;;  %v10757_v61 = vmov %v9845_v17  ;;  %v6430_v1 = vpop.eup %6429  ;;  %v9853_v11 = vmul.f32 %v6428_v41, %v3466_v58   ;;  %6451 = vrcp.f32 %v3635_v28  ;;  %v3473_v53 = vmul.f32 %v10769_v7, %v9743_v44  ;;  %v10783_v28 = vld [vmem:[#allocation93_spill] sm:$0xff]  ;;  %v10787_v58 = vld [vmem:[#allocation91_spill] sm:$0xff] }
 0xf92   : >> { %v10759_v59 = vmov %v9849_v48  ;;  %v6432_v20 = vpop.eup %6431  ;;  %v9857_v25 = vmul.f32 %v6430_v1, %v3467_v13   ;;  %v3472_v36 = vmul.f32 %v10771_v39, %v9745_v30  ;;  %v3474_v3 = vmul.f32 %v10774_v27, %v9747_v21  ;;  %v10831_v39 = vld [vmem:[#allocation88_spill] sm:$0xff]  ;;  %v10832_v7 = vld [vmem:[#allocation87_spill] sm:$0xff]  ;;  %v10835_v13 = vld [vmem:[#allocation86_spill] sm:$0xff] }
 0xf93   : >> { %v10761_v52 = vmov %v9853_v11  ;;  %v6434_v17 = vpop.eup %6433  ;;  %v9861_v37 = vmul.f32 %v6432_v20, %v3469_v56   ;;  %v3476_v43 = vmul.f32 %v10783_v28, %v9753_v5  ;;  %v3478_v24 = vmul.f32 %v10787_v58, %v10786_v0  ;;  %v10824_v58 = vld [vmem:[#allocation67_spill] sm:$0xff]  ;;  %v10826_v20 = vld [vmem:[#allocation62_spill] sm:$0xff]  ;;  %v10834_v11 = vld [vmem:[#allocation85_spill] sm:$0xff] }
 0xf94   : >> { %v10763_v62 = vmov %v9857_v25  ;;  %v6436_v49 = vpop.eup %6435  ;;  %v9865_v51 = vmul.f32 %v6434_v17, %v3468_v16   ;;  %v10814_v17 = vmov %v10757_v61  ;;  %v10816_v5 = vmov %v10754_v12  ;;  %v10836_v27 = vld [vmem:[#allocation89_spill] sm:$0xff]  ;;  %v10851_v61 = vld [vmem:[#allocation40_spill] sm:$0xff] (%p9902_p13) }
 0xf95   : >> { %10765 = vst [vmem:[#allocation69_spill] sm:$0xff] %v9861_v37  ;;  %v6438_v42 = vpop.eup %6437  ;;  %v9869_v19 = vmul.f32 %v6436_v49, %v3470_v9   ;;  %v10809_v54 = vmov %v9861_v37  ;;  %v10817_v37 = vmov %v10752_v38  ;;  %v10818_v18 = vmov %v9829_v22  ;;  %v10827_v9 = vld [vmem:[#allocation63_spill] sm:$0xff]  ;;  %v10829_v49 = vld [vmem:[#allocation60_spill] sm:$0xff]  ;;  %v10858_v13 = vld [vmem:[#allocation62_spill] sm:$0xff] (%p9902_p13) }
 0xf96   : >> { %v10768_v55 = vmov %v9865_v51  ;;  %v6440_v25 = vpop.eup %6439  ;;  %v9873_v29 = vmul.f32 %v6438_v42, %v3471_v14   ;;  %v10777_v51 = vld [vmem:[#allocation94_spill] sm:$0xff]  ;;  %v10819_v0 = vmov %v10750_v40  ;;  %v10820_v48 = vmov %v10747_v15  ;;  %v10833_v42 = vld [vmem:[#allocation70_spill] sm:$0xff]  ;;  %v10852_v5 = vld [vmem:[#allocation37_spill] sm:$0xff] (%p9902_p13) }
 0xf97   : >> { %v10770_v6 = vmov %v9869_v19  ;;  %v6442_v10 = vpop.eup %6441  ;;  %v9877_v32 = vmul.f32 %v6440_v25, %v3473_v53   ;;  %v3475_v8 = vmul.f32 %v10777_v51, %v9749_v63  ;;  %v10780_v19 = vld [vmem:[#allocation92_spill] sm:$0xff]  ;;  %v10811_v51 = vmov %v10768_v55  ;;  %v10838_v14 = vld [vmem:[#allocation74_spill] sm:$0xff] }
 0xf98   : >> { %10772 = vst [vmem:[#allocation111_spill] sm:$0xff] %v9873_v29  ;;  %v10773_v23 = vmov %v9873_v29  ;;  %v6444_v34 = vpop.eup %6443  ;;  %v9881_v41 = vmul.f32 %v6442_v10, %v3472_v36   ;;  %v3477_v31 = vmul.f32 %v10780_v19, %v9751_v26  ;;  %v10808_v19 = vmov %v10770_v6  ;;  %v10840_v10 = vld [vmem:[#allocation78_spill] sm:$0xff]  ;;  %v10859_v18 = vld [vmem:[#allocation67_spill] sm:$0xff] (%p9902_p13) }
 0xf99   : >> { %10775 = vst [vmem:[#allocation112_spill] sm:$0xff] %v9877_v32  ;;  %v6446_v44 = vpop.eup %6445  ;;  %v9885_v36 = vmul.f32 %v6444_v34, %v3474_v3   ;;  %v10804_v60 = vmov %v9877_v32  ;;  %v10807_v29 = vmov %v10773_v23  ;;  %v10812_v25 = vmov %v10763_v62  ;;  %v10825_v3 = vld [vmem:[#allocation66_spill] sm:$0xff]  ;;  %v10837_v34 = vld [vmem:[#allocation64_spill] sm:$0xff]  ;;  %v10842_v26 = vld [vmem:[#allocation35_spill] sm:$0xff] (%p9902_p13) }
 0xf9a   : >> { %10778 = vst [vmem:[#allocation113_spill] sm:$0xff] %v9881_v41  ;;  %v10779_v2 = vmov %v9881_v41  ;;  %v6448_v30 = vpop.eup %6447  ;;  %v9889_v1 = vmul.f32 %v6446_v44, %v3475_v8   ;;  %v10805_v32 = vmov %v10804_v60  ;;  %v10821_v47 = vmov %v10746_v35  ;;  %v10839_v44 = vld [vmem:[#allocation71_spill] sm:$0xff]  ;;  %2789 = sbr.rel (!%p9902_p13) target bundleno = 2963 (0xb93), region = 156  ;;  %3717 = vmatprep.subr.bf16.mxu1 (%p9902_p13), %v10842_v26  ;;  %v10850_v10 = vld [vmem:[#allocation39_spill] sm:$0xff] (%p9902_p13) }
 0xf9b   : >> { %10781 = vst [vmem:[#allocation114_spill] sm:$0xff] %v9885_v36  ;;  %v6450_v21 = vpop.eup %6449  ;;  %v9893_v16 = vmul.f32 %v6448_v30, %v3477_v31   ;;  %v10802_v57 = vmov %v9885_v36  ;;  %v10806_v41 = vmov %v10779_v2  ;;  %v10810_v30 = vmov %v10809_v54  ;;  %v10828_v31 = vld [vmem:[#allocation61_spill] sm:$0xff]  ;;  %v10844_v60 = vld [vmem:[#allocation88_spill] sm:$0xff] (%p9902_p13)  ;;  %v10849_v54 = vld [vmem:[#allocation34_spill] sm:$0xff] (%p9902_p13) }
 0xf9c   : >> { %10784 = vst [vmem:[#allocation115_spill] sm:$0xff] %v9889_v1  ;;  %v6452_v63 = vpop.eup %6451  ;;  %v9895_v8 = vmul.f32 %v6450_v21, %v3476_v43   ;;  %v10800_v33 = vmov %v9889_v1  ;;  %v10803_v36 = vmov %v10802_v57  ;;  %v10815_v21 = vmov %v10759_v59  ;;  %v10847_v57 = vld [vmem:[#allocation66_spill] sm:$0xff] (%p9902_p13)  ;;  %v10848_v2 = vld [vmem:[#allocation33_spill] sm:$0xff] (%p9902_p13)  ;;  %v10853_v41 = vld [vmem:[#allocation38_spill] sm:$0xff] (%p9902_p13) }
 0xf9d   : >> { %10788 = vst [vmem:[#allocation116_spill] sm:$0xff] %v9893_v16  ;;  %v9897_v43 = vmul.f32 %v6452_v63, %v3478_v24   ;;  %v10796_v53 = vmov %v9893_v16  ;;  %v10801_v1 = vmov %v10800_v33  ;;  %v10813_v63 = vmov %v10761_v52  ;;  %v10830_v24 = vld [vmem:[#allocation84_spill] sm:$0xff]  ;;  %3718 = vmatpush1.bf16.xpose.msra.mxu1 (%p9902_p13), %v10848_v2  ;;  %v10866_v32 = vld [vmem:[#allocation90_spill] sm:$0xff] (%p9902_p13) }
 0xf9e   : >> { %10790 = vst [vmem:[#allocation117_spill] sm:$0xff] %v9895_v8  ;;  %v10797_v16 = vmov %v10796_v53  ;;  %v10798_v45 = vmov %v9895_v8  ;;  %v10822_v56 = vmov %v10742_v46  ;;  %v10823_v28 = vmov %v10745_v50  ;;  %v10843_v53 = vld [vmem:[#allocation36_spill] sm:$0xff] (%p9902_p13)  ;;  %v10845_v33 = vld [vmem:[#allocation63_spill] sm:$0xff] (%p9902_p13)  ;;  %3719 = vmatprep.subr.bf16.mxu1 (%p9902_p13), %v10850_v10 }
 0xf9f   : >> { %10792 = vst [vmem:[#allocation118_spill] sm:$0xff] %v9897_v43  ;;  %v10793_v4 = vmov %v9897_v43  ;;  %v10799_v8 = vmov %v10798_v45  ;;  %3782 = vmatprep.subr.bf16.mxu0 (%p9902_p13), %v10843_v53  ;;  %v3702_v23 = vpack.c.bf16 (%p9902_p13), %v10845_v33, %v10844_v60  ;;  %v10854_v60 = vld [vmem:[#allocation82_spill] sm:$0xff] (%p9902_p13)  ;;  %v10855_v33 = vld [vmem:[#allocation87_spill] sm:$0xff] (%p9902_p13)  ;;  %v10857_v2 = vld [vmem:[#allocation84_spill] sm:$0xff] (%p9902_p13)  ;;  %v3708_v1 = vpack.c.bf16 (%p9902_p13), %v10752_v38, %v10746_v35 }
 0xfa0   : >> { %v10795_v43 = vmov %v10793_v4  ;;  %v10846_v4 = vld [vmem:[#allocation60_spill] sm:$0xff] (%p9902_p13)  ;;  %3783 = vmatpush1.bf16.xpose.msra.mxu0 (%p9902_p13), %v10849_v54  ;;  %v3703_v48 = vpack.c.bf16 (%p9902_p13), %v10858_v13, %v10857_v2  ;;  %v10067_v56 = vpack.c.bf16 (%p9902_p13), %v10747_v15, %v10859_v18  ;;  %v3712_v38 = vpack.c.bf16 (%p9902_p13), %v10770_v6, %v10761_v52  ;;  %v10863_v6 = vld [vmem:[#allocation69_spill] sm:$0xff] (%p9902_p13)  ;;  %v10871_v37 = vld [vmem:[#allocation112_spill] sm:$0xff] (%p9902_p13) }
 0xfa1   : > { %v10038_v45 = vpack.c.bf16 %v10847_v57, %v10846_v4  ;;  %3784 = vmatprep.subr.bf16.mxu0 %v10851_v61  ;;  %3749 = vmatprep.mubr.bf16.mxu1 %v3702_v23  ;;  %v10856_v57 = vld [vmem:[#allocation61_spill] sm:$0xff]  ;;  %v10056_v61 = vpack.c.bf16 %v10750_v40, %v10745_v50  ;;  %v3707_v50 = vpack.c.bf16 %v9829_v22, %v10742_v46  ;;  %v10860_v35 = vld [vmem:[#allocation81_spill] sm:$0xff]  ;;  %v10861_v46 = vld [vmem:[#allocation83_spill] sm:$0xff]  ;;  %v10874_v47 = vmov 0  }
 0xfa2   : > { %v10050_v4 = vpack.c.bf16 %v10856_v57, %v10855_v33  ;;  %v10074_v40 = vpack.c.bf16 %v10768_v55, %v10759_v59  ;;  %v10086_v15 = vpack.c.bf16 %v10763_v62, %v10754_v12  ;;  %v10862_v22 = vld [vmem:[#allocation68_spill] sm:$0xff]  ;;  %v10867_v16 = vld [vmem:[#allocation114_spill] sm:$0xff]  ;;  %v10869_v12 = vld [vmem:[#allocation111_spill] sm:$0xff] }
 0xfa3   : > { %3814 = vmatprep.mubr.bf16.mxu0 %v10038_v45  ;;  %v3711_v59 = vpack.c.bf16 %v10863_v6, %v10862_v22  ;;  %v10864_v11 = vld [vmem:[#allocation113_spill] sm:$0xff]  ;;  %v10870_v62 = vld [vmem:[#allocation115_spill] sm:$0xff] }
 0xfa4   : > { %v10105_v9 = vpack.c.bf16 %v10870_v62, %v10869_v12  ;;  %v10872_v54 = vld [vmem:[#allocation116_spill] sm:$0xff] }
 0xfa5   : > { %3720 = vmatpush1.bf16.xpose.msra.mxu1 %v10852_v5  ;;  %v10865_v52 = vld [vmem:[#allocation117_spill] sm:$0xff]  ;;  %v3715_v49 = vpack.c.bf16 %v10872_v54, %v10871_v37 }
 0xfa6   : > { %3847 = vmatprep.subr.bf16.mxu1 %v3702_v23  ;;  %v10093_v20 = vpack.c.bf16 %v10865_v52, %v10864_v11  ;;  %v10868_v17 = vld [vmem:[#allocation118_spill] sm:$0xff] }
 0xfa7   : > { %v3716_v29 = vpack.c.bf16 %v10868_v17, %v10867_v16 }
 0xfa8   : > { %3785 = vmatpush1.bf16.xpose.msra.mxu0 %v10853_v41 }
 0xfa9   : > { %5272 = vmatprep.subr.bf16.mxu0 %v10854_v60 }
 0xfac   : > { %3750 = vmatmul.mubr.bf16.vlgmr.msra.gmra.mrb[0].mxu1 %v10050_v4 }
 0xfad   : > { %3848 = vmatpush1.bf16.xpose.msra.mxu1 %v10050_v4  ;;  %3757 = vmatprep.mubr.bf16.mxu1 %v10056_v61 }
 0xfae   : > { %3849 = vmatprep.subr.bf16.mxu1 %v10056_v61 }
 0xfaf   : > { %3815 = vmatmul.mubr.bf16.vlgmr.msra.gmra.mrb[0].mxu0 %v3703_v48 }
 0xfb0   : > { %3822 = vmatprep.mubr.bf16.mxu0 %v3708_v1  ;;  %5273 = vmatpush3.bf16.msra.mxu0 %v10854_v60 }
 0xfb1   : > { %5274 = vmatprep.subr.bf16.mxu0 %v10860_v35 }
 0xfb4   : > { %5275 = vmatpush3.bf16.msra.mxu0 %v10860_v35  ;;  %3758 = vmatmul.mubr.bf16.gmra.mrb[4].mxu1 %v10067_v56 }
 0xfb5   : > { %3850 = vmatpush1.bf16.xpose.msra.mxu1 %v10067_v56  ;;  %3765 = vmatprep.mubr.bf16.mxu1 %v10074_v40 }
 0xfb6   : > { %3851 = vmatprep.subr.bf16.mxu1 %v10074_v40  ;;  %5276 = vmatprep.subr.bf16.mxu0 %v10861_v46 }
 0xfb7   : > { %3823 = vmatmul.mubr.bf16.gmra.mrb[4].mxu0 %v3707_v50 }
 0xfb8   : > { %3830 = vmatprep.mubr.bf16.mxu0 %v3712_v38  ;;  %5277 = vmatpush3.bf16.msra.mxu0 %v10861_v46 }
 0xfb9   : > { %5278 = vmatprep.subr.bf16.mxu0 %v10866_v32 }
 0xfbc   : > { %3766 = vmatmul.mubr.bf16.gmra.mrb[8].mxu1 %v10086_v15  ;;  %5279 = vmatpush3.bf16.msra.mxu0 %v10866_v32 }
 0xfbd   : > { %3852 = vmatpush1.bf16.xpose.msra.mxu1 %v10086_v15  ;;  %3773 = vmatprep.mubr.bf16.mxu1 %v10093_v20 }
 0xfbe   : > { %3853 = vmatprep.subr.bf16.mxu1 %v10093_v20  ;;  %4126 = vmatprep.subr.bf16.mxu0 %v3702_v23 }
 0xfbf   : > { %3831 = vmatmul.mubr.bf16.gmra.mrb[8].mxu0 %v3711_v59 }
 0xfc0   : > { %3838 = vmatprep.mubr.bf16.mxu0 %v3716_v29 }
 0xfc4   : > { %3774 = vmatmul.mubr.bf16.gmra.mrb[12].mxu1 %v10105_v9 }
 0xfc5   : > { %3854 = vmatpush1.bf16.xpose.msra.mxu1 %v10105_v9  ;;  %3879 = vmatprep.mubr.bf16.mxu1 %v3702_v23  ;;  %v10873_v23 = vmov 0.0  }
 0xfc6   : > { %3912 = vmatprep.subr.bf16.mxu1 %v10038_v45 }
 0xfc7   : > { %3839 = vmatmul.mubr.bf16.gmra.mrb[12].mxu0 %v3715_v49 }
 0xfcc   : > { %3880 = vmatmul.mubr.bf16.vlgmr.msra.gmra.mrb[16].mxu1 %v10050_v4 }
 0xfcd   : > { %3913 = vmatpush1.bf16.xpose.msra.mxu1 %v3703_v48  ;;  %3887 = vmatprep.mubr.bf16.mxu1 %v10056_v61 }
 0xfce   : > { %3914 = vmatprep.subr.bf16.mxu1 %v3708_v1 }
 0xfd4   : > { %3888 = vmatmul.mubr.bf16.gmra.mrb[20].mxu1 %v10067_v56 }
 0xfd5   : > { %3915 = vmatpush1.bf16.xpose.msra.mxu1 %v3707_v50  ;;  %3895 = vmatprep.mubr.bf16.mxu1 %v10074_v40 }
 0xfd6   : > { %3916 = vmatprep.subr.bf16.mxu1 %v3712_v38 }
 0xfdc   : > { %3896 = vmatmul.mubr.bf16.gmra.mrb[24].mxu1 %v10086_v15 }
 0xfdd   : > { %3917 = vmatpush1.bf16.xpose.msra.mxu1 %v3711_v59  ;;  %3903 = vmatprep.mubr.bf16.mxu1 %v10093_v20 }
 0xfde   : > { %3918 = vmatprep.subr.bf16.mxu1 %v3716_v29 }
 0xfe4   : > { %3904 = vmatmul.mubr.bf16.gmra.mrb[28].mxu1 %v10105_v9 }
 0xfe5   : > { %3919 = vmatpush1.bf16.xpose.msra.mxu1 %v3715_v49  ;;  %3944 = vmatprep.mubr.bf16.mxu1 %v10038_v45 }
 0xfe6   : > { %4179 = vmatprep.subr.bf16.mxu1 %v10038_v45 }
 0xfec   : > { %3945 = vmatmul.mubr.bf16.vlgmr.msra.gmra.mrb[16].mxu1 %v3703_v48 }
 0xfed   : > { %3952 = vmatprep.mubr.bf16.mxu1 %v3708_v1  ;;  %4180 = vmatpush1.bf16.msra.mxu1 %v3703_v48 }
 0xfee   : > { %4181 = vmatprep.subr.bf16.mxu1 %v3708_v1 }
 0xff1   : > { %4182 = vmatpush1.bf16.msra.mxu1 %v3707_v50 }
 0xff2   : > { %4183 = vmatprep.subr.bf16.mxu1 %v3712_v38 }
 0xff4   : > { %3953 = vmatmul.mubr.bf16.gmra.mrb[20].mxu1 %v3707_v50 }
 0xff5   : > { %3960 = vmatprep.mubr.bf16.mxu1 %v3712_v38  ;;  %4184 = vmatpush1.bf16.msra.mxu1 %v3711_v59 }
 0xff6   : > { %4185 = vmatprep.subr.bf16.mxu1 %v3716_v29 }
 0xff9   : > { %4186 = vmatpush1.bf16.msra.mxu1 %v3715_v49 }
 0xffa   : > { %5288 = vmatprep.subr.bf16.mxu1 %v10873_v23 }
 0xffc   : > { %3961 = vmatmul.mubr.bf16.gmra.mrb[24].mxu1 %v3711_v59 }
 0xffd   : > { %3968 = vmatprep.mubr.bf16.mxu1 %v3716_v29 }
0x1004   : > { %3969 = vmatmul.mubr.bf16.gmra.mrb[28].mxu1 %v3715_v49 }
0x1005   : > { %4211 = vmatprep.mubr.bf16.mxu1 %v10874_v47 }
0x107f   : > { %v3751_v14 = vpop.f32.mrb[0].mxu1 }
0x1080   : > { %v3753_v42 = vpop.f32.mrb[1].mxu1 }
0x1081   : > { %v3754_v25 = vpop.f32.mrb[2].mxu1 }
0x1082   : > { %v3816_v45 = vpop.f32.mrb[0].mxu0  ;;  %v3756_v27 = vpop.f32.mrb[3].mxu1 }
0x1083   : > { %v10123_v55 = vadd.f32 %v3816_v45, %v3751_v14  ;;  %v3818_v7 = vpop.f32.mrb[1].mxu0 }
0x1084   : > { %v3819_v39 = vpop.f32.mrb[2].mxu0 }
0x1085   : > { %v10125_v36 = vadd.f32 %v3819_v39, %v3754_v25  ;;  %v3821_v3 = vpop.f32.mrb[3].mxu0 }
0x1086   : > { %v10875_v3 = vld [vmem:[#allocation74_spill] sm:$0xff] }
0x1087   : > { %v3759_v34 = vpop.f32.mrb[4].mxu1 }
0x1088   : > { %v3761_v44 = vpop.f32.mrb[5].mxu1 }
0x1089   : > { %v3762_v31 = vpop.f32.mrb[6].mxu1 }
0x108a   : > { %v3824_v51 = vpop.f32.mrb[4].mxu0  ;;  %v3764_v43 = vpop.f32.mrb[7].mxu1 }
0x108b   : > { %v10127_v8 = vadd.f32 %v3824_v51, %v3759_v34  ;;  %v3826_v19 = vpop.f32.mrb[5].mxu0  ;;  %v10876_v51 = vld [vmem:[#allocation78_spill] sm:$0xff] }
0x108c   : > { %v3827_v30 = vpop.f32.mrb[6].mxu0  ;;  %v3985_v44 = vmul.f32 %v10123_v55, %v10876_v51 }
0x108d   : > { %v10129_v28 = vadd.f32 %v3827_v30, %v3762_v31  ;;  %v3829_v21 = vpop.f32.mrb[7].mxu0  ;;  %v10877_v31 = vld [vmem:[#allocation64_spill] sm:$0xff] }
0x108f   : > { %v3767_v0 = vpop.f32.mrb[8].mxu1  ;;  %v3988_v30 = vmul.f32 %v10129_v28, %v10877_v31 }
0x1090   : > { %v3769_v53 = vpop.f32.mrb[9].mxu1 }
0x1091   : > { %v3770_v26 = vpop.f32.mrb[10].mxu1 }
0x1092   : > { %v3832_v58 = vpop.f32.mrb[8].mxu0  ;;  %v3772_v41 = vpop.f32.mrb[11].mxu1 }
0x1093   : > { %v10131_v24 = vadd.f32 %v3832_v58, %v3767_v0  ;;  %v3834_v63 = vpop.f32.mrb[9].mxu0  ;;  %v10878_v0 = vld [vmem:[#allocation71_spill] sm:$0xff] }
0x1094   : > { %v3835_v10 = vpop.f32.mrb[10].mxu0  ;;  %v3986_v58 = vmul.f32 %v10125_v36, %v10878_v0  ;;  %v10879_v36 = vld [vmem:[#allocation85_spill] sm:$0xff] }
0x1095   : > { %v10133_v5 = vadd.f32 %v3835_v10, %v3770_v26  ;;  %v3837_v60 = vpop.f32.mrb[11].mxu0 }
0x1097   : > { %v3775_v33 = vpop.f32.mrb[12].mxu1 }
0x1098   : > { %v3777_v13 = vpop.f32.mrb[13].mxu1 }
0x1099   : > { %v3778_v1 = vpop.f32.mrb[14].mxu1 }
0x109a   : > { %v3840_v57 = vpop.f32.mrb[12].mxu0  ;;  %v3780_v35 = vpop.f32.mrb[15].mxu1 }
0x109b   : > { %v10135_v2 = vadd.f32 %v3840_v57, %v3775_v33  ;;  %v3842_v48 = vpop.f32.mrb[13].mxu0 }
0x109c   : > { %v3843_v18 = vpop.f32.mrb[14].mxu0 }
0x109d   : > { %v10137_v50 = vadd.f32 %v3843_v18, %v3778_v1  ;;  %v3845_v38 = vpop.f32.mrb[15].mxu0  ;;  %v3991_v48 = vmul.f32 %v10135_v2, %v10879_v36  ;;  %v10880_v18 = vld [vmem:[#allocation89_spill] sm:$0xff] }
0x109e   : > { %v3989_v35 = vmul.f32 %v10131_v24, %v10880_v18  ;;  %v10891_v18 = vld [vmem:[#allocation75_spill] sm:$0xff] }
0x10bf   : > { %v3946_v46 = vpop.f32.mrb[16].mxu1 }
0x10c0   : > { %v3948_v22 = vpop.f32.mrb[17].mxu1 }
0x10c1   : > { %v3949_v6 = vpop.f32.mrb[18].mxu1 }
0x10c2   : > { %v3977_v59 = vpack.c.bf16 %v3949_v6, %v3946_v46  ;;  %v3951_v11 = vpop.f32.mrb[19].mxu1  ;;  %v10881_v46 = vld [vmem:[#allocation70_spill] sm:$0xff] }
0x10c3   : > { %v3992_v22 = vmul.f32 %v10137_v50, %v10881_v46  ;;  %v10882_v11 = vld [vmem:[#allocation86_spill] sm:$0xff]  ;;  %v10893_v46 = vld [vmem:[#allocation41_spill] sm:$0xff] }
0x10c4   : > { %5280 = vmatprep.mubr.msk.bf16.mxu0 %vm1420_vm4, %v3977_v59 }
0x10c7   : > { %v3954_v52 = vpop.f32.mrb[20].mxu1 }
0x10c8   : > { %v3956_v32 = vpop.f32.mrb[21].mxu1 }
0x10c9   : > { %v3957_v16 = vpop.f32.mrb[22].mxu1 }
0x10ca   : > { %v3978_v17 = vpack.c.bf16 %v3957_v16, %v3954_v52  ;;  %v3959_v29 = vpop.f32.mrb[23].mxu1  ;;  %v3990_v52 = vmul.f32 %v10133_v5, %v10882_v11  ;;  %v10896_v11 = vld [vmem:[#allocation77_spill] sm:$0xff] }
0x10cb   : > { %v4249_v29 = vld [vmem:[#allocation8 + $0x8] sm:$0xff] }
0x10cc   : > { %5281 = vmatmul.mubr.msk.bf16.vlgmr.msra.gmra.mrb[16].mxu0 %vm1420_vm4, %v3978_v17 }
0x10cd   : > { %4127 = vmatpush1.bf16.msra.mxu0 %v10050_v4 }
0x10ce   : > { %4128 = vmatprep.subr.bf16.mxu0 %v10056_v61 }
0x10cf   : > { %v3962_v12 = vpop.f32.mrb[24].mxu1 }
0x10d0   : > { %v3964_v62 = vpop.f32.mrb[25].mxu1 }
0x10d1   : > { %v3965_v37 = vpop.f32.mrb[26].mxu1  ;;  %4129 = vmatpush1.bf16.msra.mxu0 %v10067_v56  ;;  %v4248_v62 = vld [vmem:[#allocation8] sm:$0xff] }
0x10d2   : > { %v3979_v54 = vpack.c.bf16 %v3965_v37, %v3962_v12  ;;  %v3967_v49 = vpop.f32.mrb[27].mxu1  ;;  %4130 = vmatprep.subr.bf16.mxu0 %v10074_v40  ;;  %v4253_v12 = vpack.c.bf16 %v4249_v29, %v4249_v29  ;;  %v4251_v37 = vld [vmem:[#allocation8 + $0x18] sm:$0xff] }
0x10d3   : > { %v4252_v49 = vpack.c.bf16 %v4248_v62, %v4248_v62 }
0x10d4   : > { %5284 = vmatprep.mubr.msk.bf16.mxu0 %vm1420_vm4, %v3979_v54 }
0x10d5   : > { %4131 = vmatpush1.bf16.msra.mxu0 %v10086_v15 }
0x10d6   : > { %4132 = vmatprep.subr.bf16.mxu0 %v10093_v20 }
0x10d7   : > { %v3970_v14 = vpop.f32.mrb[28].mxu1 }
0x10d8   : > { %v3972_v45 = vpop.f32.mrb[29].mxu1 }
0x10d9   : > { %v3973_v4 = vpop.f32.mrb[30].mxu1  ;;  %4133 = vmatpush1.bf16.msra.mxu0 %v10105_v9  ;;  %v3987_v9 = vmul.f32 %v10127_v8, %v10875_v3  ;;  %v10889_v3 = vld [vmem:[#allocation26_spill] sm:$0xff] }
0x10da   : > { %v3980_v61 = vpack.c.bf16 %v3973_v4, %v3970_v14  ;;  %v3975_v42 = vpop.f32.mrb[31].mxu1  ;;  %4256 = vmatprep.subr.bf16.mxu0 %v4253_v12  ;;  %v4255_v14 = vpack.c.bf16 %v4251_v37, %v4251_v37  ;;  %v10883_v4 = vld [vmem:[#allocation28_spill] sm:$0xff] }
0x10dc   : > { %5285 = vmatmul.mubr.msk.bf16.gmra.mrb[20].mxu0 %vm1420_vm4, %v3980_v61  ;;  %v10884_v61 = vld [vmem:[#allocation80_spill] sm:$0xff] }
0x10dd   : > { %4158 = vmatprep.mubr.bf16.mxu0 %v10874_v47  ;;  %v4233_v42 = vpack.c.bf16 %v10884_v61, %v10883_v4 }
0x119f   : > { %v5282_v56 = vpop.f32.mrb[16].mxu0 }
0x11a0   : > { %v4048_v7 = vadd.f32 1e-06, %v5282_v56  ;;  %v4039_v40 = vpop.f32.mrb[17].mxu0 }
0x11a1   : > { %v4040_v25 = vadd.f32 1e-06, %v4039_v40  ;;  %v5283_v39 = vpop.f32.mrb[18].mxu0  ;;  %v10885_v40 = vld [vmem:[#allocation27_spill] sm:$0xff] }
0x11a2   : > { %6453 = vrcp.f32 %v4048_v7  ;;  %v4051_v15 = vadd.f32 1e-06, %v5283_v39  ;;  %v4042_v27 = vpop.f32.mrb[19].mxu0  ;;  %v4250_v7 = vld [vmem:[#allocation8 + $0x10] sm:$0xff] }
0x11a3   : > { %6455 = vrcp.f32 %v4040_v25  ;;  %v4043_v20 = vadd.f32 1e-06, %v4042_v27  ;;  %v10886_v25 = vld [vmem:[#allocation79_spill] sm:$0xff]  ;;  %v10888_v27 = vld [vmem:[#allocation73_spill] sm:$0xff] }
0x11a4   : > { %6457 = vrcp.f32 %v4051_v15  ;;  %v4232_v39 = vpack.c.bf16 %v10886_v25, %v10885_v40  ;;  %v10887_v15 = vld [vmem:[#allocation32_spill] sm:$0xff]  ;;  %v10899_v40 = vld [vmem:[#allocation21_spill] sm:$0xff] }
0x11a5   : > { %6459 = vrcp.f32 %v4043_v20  ;;  %v4237_v20 = vpack.c.bf16 %v10888_v27, %v10887_v15 }
0x11ac   : > { %v6454_v34 = vpop.eup %6453 }
0x11ad   : > { %v6456_v19 = vpop.eup %6455  ;;  %v4075_v43 = vmul.f32 %v6454_v34, %v3987_v9  ;;  %v10890_v9 = vld [vmem:[#allocation30_spill] sm:$0xff] }
0x11ae   : > { %v6458_v21 = vpop.eup %6457  ;;  %v4071_v53 = vmul.f32 %v6456_v19, %v3985_v44  ;;  %v4236_v34 = vpack.c.bf16 %v10890_v9, %v10889_v3 }
0x11af   : > { %v6460_v63 = vpop.eup %6459  ;;  %v5286_v26 = vpop.f32.mrb[20].mxu0  ;;  %v4077_v10 = vmul.f32 %v6458_v21, %v3988_v30 }
0x11b0   : > { %v4064_v41 = vadd.f32 1e-06, %v5286_v26  ;;  %4086 = vxpose.xlu0.b32.start [1/8] (short) (narrow) %v4071_v53, 32  ;;  %v4055_v8 = vpop.f32.mrb[21].mxu0  ;;  %v4073_v60 = vmul.f32 %v6460_v63, %v3986_v58 }
0x11b1   : > { %v4056_v33 = vadd.f32 1e-06, %v4055_v8  ;;  %v5287_v57 = vpop.f32.mrb[22].mxu0 }
0x11b2   : > { %6461 = vrcp.f32 %v4064_v41  ;;  %v4067_v55 = vadd.f32 1e-06, %v5287_v57  ;;  %v4058_v13 = vpop.f32.mrb[23].mxu0 }
0x11b3   : > { %6463 = vrcp.f32 %v4056_v33  ;;  %v4059_v28 = vadd.f32 1e-06, %v4058_v13 }
0x11b4   : > { %6465 = vrcp.f32 %v4067_v55  ;;  %4087 = vxpose.xlu0.b32.cont [2/8] (short) (narrow) %v4073_v60, 32 }
0x11b5   : > { %6467 = vrcp.f32 %v4059_v28 }
0x11b8   : > { %4088 = vxpose.xlu0.b32.cont [3/8] (short) (narrow) %v4075_v43, 32 }
0x11bc   : > { %v6462_v1 = vpop.eup %6461  ;;  %4089 = vxpose.xlu0.b32.cont [4/8] (short) (narrow) %v4077_v10, 32 }
0x11bd   : > { %v6464_v38 = vpop.eup %6463  ;;  %v4083_v6 = vmul.f32 %v6462_v1, %v3991_v48 }
0x11be   : > { %v6466_v59 = vpop.eup %6465  ;;  %v4079_v32 = vmul.f32 %v6464_v38, %v3989_v35  ;;  %v10892_v35 = vld [vmem:[#allocation25_spill] sm:$0xff] }
0x11bf   : > { %v6468_v16 = vpop.eup %6467  ;;  %v4085_v17 = vmul.f32 %v6466_v59, %v3992_v22  ;;  %v4235_v38 = vpack.c.bf16 %v10892_v35, %v10891_v18  ;;  %v10894_v22 = vld [vmem:[#allocation76_spill] sm:$0xff] }
0x11c0   : > { %4090 = vxpose.xlu0.b32.cont [5/8] (short) (narrow) %v4079_v32, 32  ;;  %v4081_v2 = vmul.f32 %v6468_v16, %v3990_v52  ;;  %v10895_v59 = vld [vmem:[#allocation29_spill] sm:$0xff]  ;;  %v10897_v32 = vld [vmem:[#allocation31_spill] sm:$0xff] }
0x11c1   : > { %v4239_v52 = vpack.c.bf16 %v10896_v11, %v10895_v59  ;;  %v10898_v16 = vld [vmem:[#allocation65_spill] sm:$0xff] }
0x11c4   : > { %4091 = vxpose.xlu0.b32.cont [6/8] (short) (narrow) %v4081_v2, 32 }
0x11c8   : > { %4092 = vxpose.xlu0.b32.cont [7/8] (short) (narrow) %v4083_v6, 32  ;;  %v4234_v6 = vpack.c.bf16 %v10894_v22, %v10893_v46 }
0x11cc   : > { %4093 = vxpose.xlu0.b32.end [8/8] (short) (narrow) %v4085_v17, 32  ;;  %v4238_v17 = vpack.c.bf16 %v10898_v16, %v10897_v32 }
0x1230   : > { %v4102_v24 = vpop.trf.xlu0 }
0x1234   : > { %v4103_v50 = vpop.trf.xlu0 }
0x1235   : > { %v4118_v54 = vpack.c.bf16 %v4103_v50, %v4102_v24 }
0x1237   : > { %5115 = vmatmul.mubr.msk.bf16.vlgmr.msra.gmra.mrb[24].mxu0 %vm1420_vm4, %v4118_v54  ;;  %5117 = vmatmul.mubr.msk.bf16.vlgmr.msra.gmra.mrb[32].mxu1 %vm1420_vm4, %v4118_v54 }
0x1238   : > { %v4104_v5 = vpop.trf.xlu0  ;;  %4168 = vmatprep.mubr.bf16.mxu0 %v10874_v47  ;;  %4221 = vmatprep.mubr.bf16.mxu1 %v10874_v47  ;;  %v4254_v47 = vpack.c.bf16 %v4250_v7, %v4250_v7 }
0x1239   : > { %4257 = vmatpush1.bf16.xpose.msra.mxu0 %v4252_v49 }
0x123a   : > { %4321 = vmatprep.subr.bf16.mxu0 %v4255_v14 }
0x123c   : > { %v4105_v45 = vpop.trf.xlu0 }
0x123d   : > { %v4119_v56 = vpack.c.bf16 %v4105_v45, %v4104_v5 }
0x123f   : > { %5116 = vmatmul.mubr.msk.bf16.gmra.mrb[28].mxu0 %vm1420_vm4, %v4119_v56  ;;  %5118 = vmatmul.mubr.msk.bf16.gmra.mrb[36].mxu1 %vm1420_vm4, %v4119_v56 }
0x1240   : > { %4288 = vmatprep.mubr.bf16.mxu0 %v4233_v42  ;;  %5292 = vmatprep.mubr.msk.bf16.mxu1 %vm7404_vm0, %v10873_v23 }
0x1247   : > { %4289 = vmatmul.mubr.bf16.vlgmr.msra.gmra.mrb[32].mxu0 %v4232_v39 }
0x1248   : > { %4322 = vmatpush1.bf16.xpose.msra.mxu0 %v4254_v47  ;;  %4296 = vmatprep.mubr.bf16.mxu0 %v4237_v20 }
0x124f   : > { %4297 = vmatmul.mubr.bf16.gmra.mrb[36].mxu0 %v4236_v34 }
0x130a   : > { %v4160_v51 = vpop.f32.mrb[24].mxu0  ;;  %v4213_v44 = vpop.f32.mrb[32].mxu1 }
0x130b   : > { %v4162_v19 = vpop.f32.mrb[25].mxu0  ;;  %v4215_v31 = vpop.f32.mrb[33].mxu1 }
0x130c   : > { %v4164_v30 = vpop.f32.mrb[26].mxu0  ;;  %v4217_v43 = vpop.f32.mrb[34].mxu1 }
0x130d   : > { %v4240_v21 = vpack.c.bf16 %v4164_v30, %v4160_v51  ;;  %v4242_v0 = vpack.c.bf16 %v4217_v43, %v4213_v44  ;;  %v4166_v58 = vpop.f32.mrb[27].mxu0  ;;  %v4219_v53 = vpop.f32.mrb[35].mxu1  ;;  %v10900_v44 = vld [vmem:[#allocation22_spill] sm:$0xff] }
0x130e   : > { %v4241_v63 = vpack.c.bf16 %v4166_v58, %v4162_v19  ;;  %v4243_v26 = vpack.c.bf16 %v4219_v53, %v4215_v31 }
0x1310   : > { %4304 = vmatprep.mubr.bf16.mxu0 %v4241_v63 }
0x1311   : > { %4305 = vmatmul.mubr.bf16.gmra.mrb[40].mxu0 %v4240_v21 }
0x1312   : > { %v4170_v10 = vpop.f32.mrb[28].mxu0  ;;  %v4223_v41 = vpop.f32.mrb[36].mxu1 }
0x1313   : > { %v4172_v8 = vpop.f32.mrb[29].mxu0  ;;  %v4225_v60 = vpop.f32.mrb[37].mxu1 }
0x1314   : > { %v4174_v33 = vpop.f32.mrb[30].mxu0  ;;  %v4227_v57 = vpop.f32.mrb[38].mxu1 }
0x1315   : > { %v4244_v55 = vpack.c.bf16 %v4174_v33, %v4170_v10  ;;  %v4246_v13 = vpack.c.bf16 %v4227_v57, %v4223_v41  ;;  %v4176_v28 = vpop.f32.mrb[31].mxu0  ;;  %v4229_v36 = vpop.f32.mrb[39].mxu1 }
0x1316   : > { %v4245_v48 = vpack.c.bf16 %v4176_v28, %v4172_v8  ;;  %v4247_v1 = vpack.c.bf16 %v4229_v36, %v4225_v60  ;;  %v10901_v60 = vld [vmem:[#allocation23_spill] sm:$0xff] }
0x1318   : > { %4312 = vmatprep.mubr.bf16.mxu0 %v4245_v48 }
0x1319   : > { %4313 = vmatmul.mubr.bf16.gmra.mrb[44].mxu0 %v4244_v55 }
0x131a   : > { %4353 = vmatprep.mubr.bf16.mxu0 %v4235_v38 }
0x1321   : > { %4354 = vmatmul.mubr.bf16.vlgmr.msra.gmra.mrb[32].mxu0 %v4234_v6 }
0x1322   : > { %4361 = vmatprep.mubr.bf16.mxu0 %v4239_v52  ;;  %v10902_v52 = vld [vmem:[#allocation24_spill] sm:$0xff] }
0x1329   : > { %4362 = vmatmul.mubr.bf16.gmra.mrb[36].mxu0 %v4238_v17 }
0x132a   : > { %4369 = vmatprep.mubr.bf16.mxu0 %v4243_v26 }
0x1331   : > { %4370 = vmatmul.mubr.bf16.gmra.mrb[40].mxu0 %v4242_v0 }
0x1332   : > { %4377 = vmatprep.mubr.bf16.mxu0 %v4247_v1 }
0x1339   : > { %4378 = vmatmul.mubr.bf16.gmra.mrb[44].mxu0 %v4246_v13 }
0x13f4   : > { %v4355_v29 = vpop.f32.mrb[32].mxu0 }
0x13f5   : > { %4386 = vxpose.xlu1.b32.start [1/4] (short) (narrow) %v4355_v29, 8  ;;  %v4357_v2 = vpop.f32.mrb[33].mxu0 }
0x13f6   : > { %v4358_v12 = vpop.f32.mrb[34].mxu0 }
0x13f7   : > { %v4360_v24 = vpop.f32.mrb[35].mxu0 }
0x13f9   : > { %4387 = vxpose.xlu1.b32.cont [2/4] (short) (narrow) %v4358_v12, 8 }
0x13fc   : > { %v4363_v62 = vpop.f32.mrb[36].mxu0 }
0x13fd   : > { %4388 = vxpose.xlu1.b32.cont [3/4] (short) (narrow) %v4363_v62, 8  ;;  %v4365_v37 = vpop.f32.mrb[37].mxu0 }
0x13fe   : > { %v4366_v50 = vpop.f32.mrb[38].mxu0 }
0x13ff   : > { %v4368_v54 = vpop.f32.mrb[39].mxu0 }
0x1401   : > { %4389 = vxpose.xlu1.b32.end [4/4] (short) (narrow) %v4366_v50, 8 }
0x1404   : > { %v4371_v49 = vpop.f32.mrb[40].mxu0 }
0x1405   : > { %4418 = vxpose.xlu1.b32.start [1/4] (short) (narrow) %v4371_v49, 8  ;;  %v4373_v14 = vpop.f32.mrb[41].mxu0 }
0x1406   : > { %v4374_v5 = vpop.f32.mrb[42].mxu0 }
0x1407   : > { %v4376_v45 = vpop.f32.mrb[43].mxu0 }
0x1409   : > { %4419 = vxpose.xlu1.b32.cont [2/4] (short) (narrow) %v4374_v5, 8 }
0x140c   : > { %v4379_v4 = vpop.f32.mrb[44].mxu0 }
0x140d   : > { %4420 = vxpose.xlu1.b32.cont [3/4] (short) (narrow) %v4379_v4, 8  ;;  %v4381_v61 = vpop.f32.mrb[45].mxu0 }
0x140e   : > { %v4382_v42 = vpop.f32.mrb[46].mxu0  ;;  %v4529_v61 = vld [vmem:[#allocation10] sm:$0xff] }
0x140f   : > { %v4384_v56 = vpop.f32.mrb[47].mxu0 }
0x1410   : > { %v4531_v56 = vld [vmem:[#allocation10 + $0x10] sm:$0xff] }
0x1411   : > { %4421 = vxpose.xlu1.b32.end [4/4] (short) (narrow) %v4382_v42, 8  ;;  %v4530_v42 = vld [vmem:[#allocation10 + $0x8] sm:$0xff] }
0x1475   : > { %v4402_v7 = vpop.trf.xlu1 }
0x1476   : > { %v4450_v25 = vadd.f32 %v4402_v7, %v10899_v40  ;;  %v4533_v40 = vpack.c.bf16 %v4530_v42, %v4529_v61 }
0x1478   : > { %v4452_v39 = vmax.f32 %v4450_v25, 0.0  ;;  %v4532_v25 = vld [vmem:[#allocation10 + $0x18] sm:$0xff]  ;;  %5289 = vmatpush3.bf16.msra.mxu1 %v4533_v40 }
0x1479   : > { %5290 = vmatprep.subr.bf16.mxu1 %v10873_v23 }
0x147a   : > { %v4454_v47 = vsel %vm466_vm2, %v4452_v39, -inf }
0x147b   : > { %v4455_v15 = vrot.slane %v4454_v47, 4 }
0x147d   : > { %v4456_v27 = vmax.f32 %v4454_v47, %v4455_v15 }
0x147f   : > { %v4457_v20 = vrot.slane %v4456_v27, 2 }
0x1481   : > { %v4458_v3 = vmax.f32 %v4456_v27, %v4457_v20  ;;  %v4508_v20 = vsub.f32 0.0, %v10901_v60 }
0x1483   : > { %v4459_v9 = vrot.slane %v4458_v3, 1 }
0x1485   : > { %v4460_v34 = vmax.f32 %v4458_v3, %v4459_v9  ;;  %v4434_v51 = vpop.trf.xlu1  ;;  %v4509_v3 = vsub.f32 0.0, %v10902_v52  ;;  %v4510_v9 = vmul.f32 1.442695, %v4508_v20 }
0x1486   : > { %v4451_v19 = vadd.f32 %v4434_v51, %v10900_v44 }
0x1487   : > { %v4468_v31 = vsub.f32 %v4452_v39, %v4460_v34  ;;  %v4534_v39 = vpack.c.bf16 %v4532_v25, %v4531_v56  ;;  %v4512_v34 = vmul.f32 1.442695, %v4509_v3 }
0x1488   : > { %v4453_v30 = vmax.f32 %v4451_v19, 0.0 }
0x1489   : > { %v4470_v43 = vmul.f32 1.442695, %v4468_v31  ;;  %5291 = vmatpush3.bf16.msra.mxu1 %v4534_v39 }
0x148a   : > { %v4461_v21 = vsel %vm466_vm2, %v4453_v30, -inf }
0x148b   : > { %6469 = vpow2.f32 %v4470_v43  ;;  %v4462_v0 = vrot.slane %v4461_v21, 4 }
0x148d   : > { %v4463_v58 = vmax.f32 %v4461_v21, %v4462_v0 }
0x148f   : > { %v4464_v53 = vrot.slane %v4463_v58, 2 }
0x1491   : > { %v4465_v63 = vmax.f32 %v4463_v58, %v4464_v53 }
0x1493   : > { %v4466_v26 = vrot.slane %v4465_v63, 1 }
0x1495   : > { %v6470_v10 = vpop.eup %6469  ;;  %v4467_v41 = vmax.f32 %v4465_v63, %v4466_v26  ;;  %v5119_v26 = vld [vmem:[%s10270_s7] ss:$0 sm:$0xff] }
0x1496   : > { %v4474_v8 = vsel %vm466_vm2, %v6470_v10, 0.0  ;;  %v4488_v33 = vmul.f32 %v6470_v10, %v10901_v60 }
0x1497   : > { %v4475_v57 = vrot.slane %v4474_v8, 4  ;;  %v4469_v55 = vsub.f32 %v4453_v30, %v4467_v41 }
0x1498   : > { %v4490_v13 = vsel %vm466_vm2, %v4488_v33, 0.0 }
0x1499   : > { %v4476_v28 = vadd.f32 %v4475_v57, %v4474_v8  ;;  %v4472_v36 = vmul.f32 1.442695, %v4469_v55  ;;  %v4491_v48 = vrot.slane %v4490_v13, 4 }
0x149b   : > { %v4477_v1 = vrot.slane %v4476_v28, 2  ;;  %6471 = vpow2.f32 %v4472_v36  ;;  %v4492_v18 = vadd.f32 %v4491_v48, %v4490_v13 }
0x149d   : > { %v4478_v35 = vadd.f32 %v4477_v1, %v4476_v28  ;;  %v4493_v46 = vrot.slane %v4492_v18, 2 }
0x149f   : > { %v4479_v38 = vrot.slane %v4478_v35, 1  ;;  %v4494_v6 = vadd.f32 %v4493_v46, %v4492_v18 }
0x14a1   : > { %v4480_v22 = vadd.f32 %v4479_v38, %v4478_v35  ;;  %v4495_v17 = vrot.slane %v4494_v6, 1 }
0x14a3   : > { %6473 = vrcp.f32 %v4480_v22  ;;  %v4496_v62 = vadd.f32 %v4495_v17, %v4494_v6 }
0x14a5   : > { %v6472_v59 = vpop.eup %6471 }
0x14a6   : > { %v4481_v11 = vsel %vm466_vm2, %v6472_v59, 0.0  ;;  %v4489_v32 = vmul.f32 %v6472_v59, %v10902_v52 }
0x14a7   : > { %v4482_v16 = vrot.slane %v4481_v11, 4 }
0x14a8   : > { %v4497_v29 = vsel %vm466_vm2, %v4489_v32, 0.0 }
0x14a9   : > { %v4483_v2 = vadd.f32 %v4482_v16, %v4481_v11  ;;  %v4498_v12 = vrot.slane %v4497_v29, 4 }
0x14ab   : > { %v4484_v24 = vrot.slane %v4483_v2, 2  ;;  %v4499_v37 = vadd.f32 %v4498_v12, %v4497_v29 }
0x14ad   : > { %v6474_v50 = vpop.eup %6473  ;;  %v4485_v54 = vadd.f32 %v4484_v24, %v4483_v2  ;;  %v4500_v5 = vrot.slane %v4499_v37, 2 }
0x14ae   : > { %v4506_v49 = vmul.f32 %v6474_v50, %v4496_v62 }
0x14af   : > { %v4486_v14 = vrot.slane %v4485_v54, 1  ;;  %v4501_v4 = vadd.f32 %v4500_v5, %v4499_v37 }
0x14b0   : > { %4520 = vrot.lane.b32.xlu0 %v4506_v49, %s7408_s19 }
0x14b1   : > { %v4487_v45 = vadd.f32 %v4486_v14, %v4485_v54  ;;  %v4502_v7 = vrot.slane %v4501_v4, 1 }
0x14b3   : > { %6475 = vrcp.f32 %v4487_v45  ;;  %v4503_v47 = vadd.f32 %v4502_v7, %v4501_v4 }
0x14b4   : > { %6477 = vpow2.f32 %v4510_v9 }
0x14b5   : > { %6479 = vpow2.f32 %v4512_v34 }
0x14bd   : > { %v6476_v15 = vpop.eup %6475 }
0x14be   : > { %v4507_v27 = vmul.f32 %v6476_v15, %v4503_v47  ;;  %v6478_v51 = vpop.eup %6477 }
0x14bf   : > { %v6480_v44 = vpop.eup %6479  ;;  %v4514_v19 = vadd.f32 1.0, %v6478_v51 }
0x14c0   : > { %4522 = vrot.lane.b32.xlu1 %v4507_v27, %s7408_s19  ;;  %v4515_v31 = vadd.f32 1.0, %v6480_v44 }
0x14c1   : > { %6481 = vrcp.f32 %v4514_v19 }
0x14c2   : > { %6483 = vrcp.f32 %v4515_v31 }
0x14cb   : > { %v6482_v23 = vpop.eup %6481 }
0x14cc   : > { %v6484_v30 = vpop.eup %6483 }
0x1522   : > { %v4521_v43 = vpop.permute.xlu0 %4520 }
0x1523   : > { %v4526_v0 = vmul.f32 %v6482_v23, %v4521_v43 }
0x1532   : > { %v4523_v21 = vpop.permute.xlu1 %4522 }
0x1533   : > { %v4527_v58 = vmul.f32 %v6484_v30, %v4523_v21 }
0x1535   : > { %v4528_v53 = vpack.c.bf16 %v4527_v58, %v4526_v0 }
0x1537   : > { %4543 = vrot.lane.b32.xlu1 %v4528_v53, %s7409_s22 }
0x15a9   : > { %v4544_v63 = vpop.permute.xlu1 %4543 }
0x15aa   : > { %5293 = vmatmul.mubr.msk.bf16.vlgmr.msra.gmra.mrb[40].mxu1 %vm466_vm2, %v4544_v63 }
0x167d   : > { %v4582_v10 = vpop.f32.mrb[40].mxu1 }
0x167e   : > { %v4583_v41 = vadd.f32 %v5119_v26, %v4582_v10  ;;  %v5294_v8 = vpop.f32.mrb[41].mxu1 }
0x167f   : > { %v4585_v60 = vpop.f32.mrb[42].mxu1 }
0x1680   : > { %4589 = vst.msk [vmem:[%s8022_s25] sm:$0xff] %vm466_vm2, %v4583_v41  ;;  %v4586_v33 = vadd.f32 %v5119_v26, %v4585_v60  ;;  %v5295_v57 = vpop.f32.mrb[43].mxu1 }
0x1682   : > { %4590 = vst.msk [vmem:[%s8022_s25 + $0x8] sm:$0xff] %vm466_vm2, %v4586_v33 }
0x1683   : > { %6670 = shalt.err (!%p6667_p4)
}
0x1684   : > { %s6671_s25 = scalar_lea.hbm %s10213_s16, 256  ;;  %s6675_s19 = scalar_lea.hbm %s10903_s9, 512 }
0x1685   : > { %p6672_p11 = scmp.ne.s32.totalorder %s10213_s16, %s6671_s25  ;;  %p6676_p1 = scmp.lt.u32.totalorder %s10213_s16, %s10903_s9 }
0x1686   : > { %p6677_p2 = scmp.lt.u32.totalorder %s6675_s19, %s6671_s25  ;;  %p6679_p0 = scmp.lt.u32.totalorder %s6671_s25, %s10213_s16 }
0x1687   : > { %p6673_p7 = pnand %p6672_p11, %p7628_p10 }
0x1688   : > { %p6678_p13 = por %p6677_p2, %p6676_p1 }
0x1689   : > { %p6674_p12 = pneg %p6673_p7 }
0x168a   : > { %p6680_p6 = por %p6679_p0, %p6678_p13 }
0x168c   : > { %p6681_p8 = pnand %p6680_p6, %p6674_p12 }
0x168e   : > { %6684 = shalt.err (!%p6681_p8)
}
0x168f   : > { %s7411_s0 = smov 128   ;;  %s7412_s1 = smov 8  }
0x1690   : > { %5500 = dma.vmem_to_hbm [thread:$0]  (%p7628_p10), %s10215_s17, 256, %s10213_s16, %s4592_s13, %s7411_s0, %s7411_s0, %s7412_s1  }
0x1691 PF: > { %s10904_s15 = sld [smem:[#allocation19_spill]]  ;;  %s10905_s29 = sld [smem:[#allocation20_spill]] }
0x1692   : > { %p10907_p5 = scmp.ge.s32.totalorder %s7063_s12, 2 }
0x1697   : > { %s4620_s21 = sand.u32 1, %s10904_s15   ;;  %p10906_p3 = scmp.ne.s32.totalorder %s10905_s29, 0 }
0x1698   : > { %s4621_s24 = scalar_lea.sflag [#allocation4], %s4620_s21 }
0x1699   : > { %p5523_p9 = pnand %p10907_p5, %p10906_p3 }
0x169b   : > { %7046 = dma.done.wait (!%p5523_p9), %s4621_s24, 256  }
0x169c   : > { %7048 = vsyncadd (!%p5523_p9), %s4621_s24, 4294967040  ;;  %p27_p4 = scmp.ge.s32.totalorder %s7618_s14, 4   ;;  %s10908_s30 = smov %s7055_s10 }
0x169d   : > { %s10909_s10 = smov %s7059_s11  ;;  %s10910_s11 = smov %s7634_s28 }
0x169e   : > { %s10911_s12 = smov %s7618_s14  ;;  %29 = sbr.rel (!%p27_p4) target bundleno = 14 (0xe), region = 167 }
0x16a5   :  { %4626 = vsyncpa [#allocation3], 1 }
0x16a6   :  { %4628 = vsyncpa [#allocation3 + $0x1], 1 }
0x16a7   :  { %4629 = vsyncpa [#allocation6], 1 }
0x16a8   :  { %4630 = vsyncpa [#allocation9], 1 }
0x16a9   :  { %4631 = vsyncpa [#allocation12], 1 }
0x16aa   :  { %4633 = vsyncpa [#allocation12 + $0x1], 1 }
0x16ab   :  { %4634 = vsyncpa [#allocation4], 1 }
0x16ac   :  { %4636 = vsyncpa [#allocation4 + $0x1], 1 }

</bundles_post_ra>
